<compile_context>
chip_gen: v5e
topology: v5e:2x2
jax: 0.10.0
libtpu: 0.0.40
codegen_flags: <defaults>
</compile_context>

<pallas_src>
import functools

import jax
import jax.numpy as jnp
from jax.experimental import pallas as pl
from jax.experimental.pallas import tpu as pltpu

# ----------------------------- configuration --------------------------------
BATCH = 2
IN_CHANS = 3
IMG = 32
PATCH = 16
GRID_HW = IMG // PATCH                 # 2
NUM_PATCHES = GRID_HW * GRID_HW        # 4
SEQ = NUM_PATCHES + 1                  # 5 (CLS + patches)
SEQ_PAD = 8                            # padded to sublane granularity
EMBED = 256                            # real model: 768
HEADS = 2                              # real model: 12
HEAD_DIM = EMBED // HEADS              # 128 here (real: 64) -> lane-tile aligned heads
MLP_HIDDEN = 4 * EMBED
DEPTH = 2                              # real model: 12
PATCH_DIM = IN_CHANS * PATCH * PATCH   # 768
EPS = 1e-6                             # timm ViT LayerNorm eps
_NEG_INF = -1e30

_BLOCK_KEYS = ('ln1_w', 'ln1_b', 'w_qkv', 'b_qkv', 'w_proj', 'b_proj',
               'ln2_w', 'ln2_b', 'w_fc1', 'b_fc1', 'w_fc2', 'b_fc2')


# --------------------------- shared math (kernel + reference) ----------------
def _layernorm(v, w, b):
    # v: (N, D); w, b: (1, D)
    mu = jnp.mean(v, axis=-1, keepdims=True)
    var = jnp.mean(jnp.square(v - mu), axis=-1, keepdims=True)
    return (v - mu) * jax.lax.rsqrt(var + EPS) * w + b


def _attn_mask():
    # Additive mask over key positions: 0 for real tokens, -1e30 for padding.
    kpos = jax.lax.broadcasted_iota(jnp.int32, (1, SEQ_PAD), 1)
    return jnp.where(kpos < SEQ, 0.0, _NEG_INF).astype(jnp.float32)


def _init_tokens(patches_pad, patch_w, patch_b, cls, pos):
    # patches_pad: (SEQ_PAD, PATCH_DIM) with zero rows at CLS slot / padding.
    emb = jnp.dot(patches_pad, patch_w, preferred_element_type=jnp.float32)
    row = jax.lax.broadcasted_iota(jnp.int32, (SEQ_PAD, EMBED), 0)
    tok = jnp.where((row >= 1) & (row <= NUM_PATCHES), emb + patch_b, 0.0)
    tok = jnp.where(row == 0, cls, tok)
    return tok + pos


def _block_math(x, ln1_w, ln1_b, w_qkv, b_qkv, w_proj, b_proj,
                ln2_w, ln2_b, w_fc1, b_fc1, w_fc2, b_fc2, *, in_kernel):
    """One timm ViT block on a (SEQ_PAD, EMBED) token block."""
    # --- multi-head self-attention ------------------------------------------
    h = _layernorm(x, ln1_w, ln1_b)
    qkv = jnp.dot(h, w_qkv, preferred_element_type=jnp.float32) + b_qkv   # (N, 3D)

    scale = HEAD_DIM ** -0.5
    q = qkv[:, 0 * EMBED:1 * EMBED] * scale        # scale applied once (not per head)
    k = qkv[:, 1 * EMBED:2 * EMBED]
    v = qkv[:, 2 * EMBED:3 * EMBED]

    mask = _attn_mask()
    ctx_heads = []
    for hd in range(HEADS):                        # static unroll; 128-lane aligned slices
        sl = slice(hd * HEAD_DIM, (hd + 1) * HEAD_DIM)
        qh, kh, vh = q[:, sl], k[:, sl], v[:, sl]
        s = jnp.einsum('nd,md->nm', qh, kh, preferred_element_type=jnp.float32)
        s = s + mask
        s = jnp.exp(s - jnp.max(s, axis=-1, keepdims=True))
        denom = jnp.sum(s, axis=-1, keepdims=True)
        if in_kernel:
            p = s * pl.reciprocal(denom, approx=True)     # EUP, frees VALU slots
        else:
            p = s / denom
        ctx_heads.append(jnp.einsum('nm,md->nd', p, vh,
                                    preferred_element_type=jnp.float32))
    ctx = jnp.concatenate(ctx_heads, axis=-1)              # (N, EMBED)
    # single full-width (K=EMBED) output projection
    x = x + jnp.dot(ctx, w_proj, preferred_element_type=jnp.float32) + b_proj

    # --- MLP ------------------------------------------------------------------
    h2 = _layernorm(x, ln2_w, ln2_b)
    h2 = jnp.dot(h2, w_fc1, preferred_element_type=jnp.float32) + b_fc1
    h2 = jax.nn.gelu(h2, approximate=True)
    h2 = jnp.dot(h2, w_fc2, preferred_element_type=jnp.float32) + b_fc2
    return x + h2


# ------------------------------- fused trunk kernel ---------------------------
def _trunk_kernel(patches_ref, pw_ref, pb_ref, cls_ref, pos_ref,
                  ln1w_ref, ln1b_ref, wqkv_ref, bqkv_ref, wproj_ref, bproj_ref,
                  ln2w_ref, ln2b_ref, wfc1_ref, bfc1_ref, wfc2_ref, bfc2_ref,
                  normw_ref, normb_ref, o_ref):
    d = pl.program_id(1)

    # prologue: patch-embed + CLS + positional embedding (depth step 0 only)
    @pl.when(d == 0)
    def _prologue():
        o_ref[...] = _init_tokens(patches_ref[...], pw_ref[...], pb_ref[...],
                                  cls_ref[...], pos_ref[...])

    # one transformer block; tokens stay resident in the output VMEM buffer
    o_ref[...] = _block_math(
        o_ref[...],
        ln1w_ref[...], ln1b_ref[...], wqkv_ref[...], bqkv_ref[...],
        wproj_ref[...], bproj_ref[...], ln2w_ref[...], ln2b_ref[...],
        wfc1_ref[...], bfc1_ref[...], wfc2_ref[...], bfc2_ref[...],
        in_kernel=True)

    # epilogue: final LayerNorm (last depth step only)
    @pl.when(d == DEPTH - 1)
    def _epilogue():
        o_ref[...] = _layernorm(o_ref[...], normw_ref[...], normb_ref[...])


# ------------------------------ pallas_call wrapper ----------------------------
def _const_spec(a):
    ndim = a.ndim
    return pl.BlockSpec(a.shape, lambda i, d: (0,) * ndim)


def _layer_spec(a):
    # stacked per-layer weight: stream layer d's slice, squeezing the depth dim
    ndim = a.ndim
    return pl.BlockSpec((None,) + tuple(a.shape[1:]),
                        lambda i, d: (d,) + (0,) * (ndim - 1))


def _vmem_limit_bytes():
    # At real ViT-B scale this must cover the double-buffered per-layer weight
    # working set (use bf16 weights / MLP hidden-dim tiling on v7x's 64 MiB VMEM).
    try:
        cap = pltpu.get_tpu_info().vmem_capacity_bytes
    except Exception:
        cap = 128 * 1024 * 1024
    return min(64 * 1024 * 1024, (cap * 3) // 4)


def trunk_call(params, patches_pad):
    b = patches_pad.shape[0]
    blocks = params['blocks']

    args = (patches_pad, params['patch_w'], params['patch_b'],
            params['cls'], params['pos'])
    args += tuple(blocks[k] for k in _BLOCK_KEYS)
    args += (params['norm_w'], params['norm_b'])

    in_specs = [pl.BlockSpec((None, SEQ_PAD, PATCH_DIM), lambda i, d: (i, 0, 0))]
    in_specs += [_const_spec(a) for a in (params['patch_w'], params['patch_b'],
                                          params['cls'], params['pos'])]
    in_specs += [_layer_spec(blocks[k]) for k in _BLOCK_KEYS]
    in_specs += [_const_spec(params['norm_w']), _const_spec(params['norm_b'])]

    return pl.pallas_call(
        _trunk_kernel,
        out_shape=jax.ShapeDtypeStruct((b, SEQ_PAD, EMBED), jnp.float32),
        grid=(b, DEPTH),
        in_specs=in_specs,
        out_specs=pl.BlockSpec((None, SEQ_PAD, EMBED), lambda i, d: (i, 0, 0)),
        compiler_params=pltpu.CompilerParams(
            dimension_semantics=("parallel", "arbitrary"),
            vmem_limit_bytes=_vmem_limit_bytes(),
        ),
    )(*args)


# ----------------------------- params & glue ----------------------------------
def init_params(key):
    ks = jax.random.split(key, 12)

    def rnd(k, shape, std=0.02):
        return jax.random.normal(k, shape, jnp.float32) * std

    pos = jnp.zeros((SEQ_PAD, EMBED), jnp.float32).at[:SEQ].set(rnd(ks[3], (SEQ, EMBED)))
    return {
        'patch_w': rnd(ks[0], (PATCH_DIM, EMBED)),
        'patch_b': rnd(ks[1], (1, EMBED)),
        'cls':     rnd(ks[2], (1, EMBED)),
        'pos':     pos,
        'norm_w':  jnp.ones((1, EMBED), jnp.float32),
        'norm_b':  jnp.zeros((1, EMBED), jnp.float32),
        'blocks': {
            'ln1_w': jnp.ones((DEPTH, 1, EMBED), jnp.float32),
            'ln1_b': jnp.zeros((DEPTH, 1, EMBED), jnp.float32),
            'w_qkv': rnd(ks[4], (DEPTH, EMBED, 3 * EMBED)),
            'b_qkv': rnd(ks[5], (DEPTH, 1, 3 * EMBED)),
            'w_proj': rnd(ks[6], (DEPTH, EMBED, EMBED)),
            'b_proj': rnd(ks[7], (DEPTH, 1, EMBED)),
            'ln2_w': jnp.ones((DEPTH, 1, EMBED), jnp.float32),
            'ln2_b': jnp.zeros((DEPTH, 1, EMBED), jnp.float32),
            'w_fc1': rnd(ks[8], (DEPTH, EMBED, MLP_HIDDEN)),
            'b_fc1': rnd(ks[9], (DEPTH, 1, MLP_HIDDEN)),
            'w_fc2': rnd(ks[10], (DEPTH, MLP_HIDDEN, EMBED)),
            'b_fc2': rnd(ks[11], (DEPTH, 1, EMBED)),
        },
    }


def extract_patches(x):
    # NCHW -> (B, P, C*ph*pw): identical ordering to Conv2d(stride=patch)+flatten+transpose.
    b, c, h, w = x.shape
    x = x.reshape(b, c, h // PATCH, PATCH, w // PATCH, PATCH)
    x = x.transpose(0, 2, 4, 1, 3, 5)
    return x.reshape(b, NUM_PATCHES, c * PATCH * PATCH)


def pad_patches(p):
    # Place patch p at padded row p+1 (row 0 = CLS slot, rows SEQ.. = padding).
    b = p.shape[0]
    z_cls = jnp.zeros((b, 1, PATCH_DIM), p.dtype)
    z_pad = jnp.zeros((b, SEQ_PAD - SEQ, PATCH_DIM), p.dtype)
    return jnp.concatenate([z_cls, p, z_pad], axis=1)


def biomedclip_forward(params, x):
    """Equivalent of model.forward_features(x)[:, 1:, :] (drop CLS token)."""
    patches_pad = pad_patches(extract_patches(x))
    tok = trunk_call(params, patches_pad)
    return tok[:, 1:1 + NUM_PATCHES, :]


# ----------------------------- pure-JAX reference ------------------------------
def reference_forward(params, x):
    patches_pad = pad_patches(extract_patches(x))
    blocks = params['blocks']

    def single(p):
        tok = _init_tokens(p, params['patch_w'], params['patch_b'],
                           params['cls'], params['pos'])
        for d in range(DEPTH):
            tok = _block_math(tok, *(blocks[k][d] for k in _BLOCK_KEYS),
                              in_kernel=False)
        return _layernorm(tok, params['norm_w'], params['norm_b'])

    tok = jax.vmap(single)(patches_pad)
    return tok[:, 1:1 + NUM_PATCHES, :]


# ------------------------------------ main -------------------------------------
if __name__ == "__main__":
    root = jax.random.PRNGKey(0)
    pkey, xkey = jax.random.split(root)
    params = init_params(pkey)
    x = jax.random.normal(xkey, (BATCH, IN_CHANS, IMG, IMG), jnp.float32)

    fwd = jax.jit(functools.partial(biomedclip_forward, params))
    out = jax.block_until_ready(fwd(x))

    assert out.shape == (BATCH, NUM_PATCHES, EMBED), out.shape
    assert bool(jnp.all(jnp.isfinite(out)))

    ref = reference_forward(params, x)
    max_err = float(jnp.max(jnp.abs(out - ref)))
    scale = max(1.0, float(jnp.max(jnp.abs(ref))))
    if max_err > 5e-2 * scale:
        raise AssertionError(
            f"Pallas output mismatch vs reference: max_err={max_err} scale={scale}")

    print("KERNEL_OK")
</pallas_src>

<mosaic_0001>
module attributes {stable_mosaic.version = 11 : i64} {
  func.func @_trunk_kernel(%arg0: i32, %arg1: i32, %arg2: memref<1x8x768xf32, #tpu.memory_space<vmem>>, %arg3: memref<768x256xf32, #tpu.memory_space<vmem>>, %arg4: memref<1x256xf32, #tpu.memory_space<vmem>>, %arg5: memref<1x256xf32, #tpu.memory_space<vmem>>, %arg6: memref<8x256xf32, #tpu.memory_space<vmem>>, %arg7: memref<1x1x256xf32, #tpu.memory_space<vmem>>, %arg8: memref<1x1x256xf32, #tpu.memory_space<vmem>>, %arg9: memref<1x256x768xf32, #tpu.memory_space<vmem>>, %arg10: memref<1x1x768xf32, #tpu.memory_space<vmem>>, %arg11: memref<1x256x256xf32, #tpu.memory_space<vmem>>, %arg12: memref<1x1x256xf32, #tpu.memory_space<vmem>>, %arg13: memref<1x1x256xf32, #tpu.memory_space<vmem>>, %arg14: memref<1x1x256xf32, #tpu.memory_space<vmem>>, %arg15: memref<1x256x1024xf32, #tpu.memory_space<vmem>>, %arg16: memref<1x1x1024xf32, #tpu.memory_space<vmem>>, %arg17: memref<1x1024x256xf32, #tpu.memory_space<vmem>>, %arg18: memref<1x1x256xf32, #tpu.memory_space<vmem>>, %arg19: memref<1x256xf32, #tpu.memory_space<vmem>>, %arg20: memref<1x256xf32, #tpu.memory_space<vmem>>, %arg21: memref<1x8x256xf32, #tpu.memory_space<vmem>>) attributes {dimension_semantics = [#tpu.dimension_semantics<parallel>, #tpu.dimension_semantics<arbitrary>], iteration_bounds = array<i64: 2, 2>, scalar_prefetch = 0 : i64, scratch_operands = 0 : i64, tpu.core_type = #tpu.core_type<tc>, window_params = [{transform_indices = @transform_0, window_bounds = array<i64: 1, 8, 768>}, {pipeline_mode = #tpu.pipeline_mode<synchronous>, transform_indices = @transform_1, window_bounds = array<i64: 768, 256>}, {pipeline_mode = #tpu.pipeline_mode<synchronous>, transform_indices = @transform_2, window_bounds = array<i64: 1, 256>}, {pipeline_mode = #tpu.pipeline_mode<synchronous>, transform_indices = @transform_3, window_bounds = array<i64: 1, 256>}, {pipeline_mode = #tpu.pipeline_mode<synchronous>, transform_indices = @transform_4, window_bounds = array<i64: 8, 256>}, {transform_indices = @transform_5, window_bounds = array<i64: 1, 1, 256>}, {transform_indices = @transform_6, window_bounds = array<i64: 1, 1, 256>}, {transform_indices = @transform_7, window_bounds = array<i64: 1, 256, 768>}, {transform_indices = @transform_8, window_bounds = array<i64: 1, 1, 768>}, {transform_indices = @transform_9, window_bounds = array<i64: 1, 256, 256>}, {transform_indices = @transform_10, window_bounds = array<i64: 1, 1, 256>}, {transform_indices = @transform_11, window_bounds = array<i64: 1, 1, 256>}, {transform_indices = @transform_12, window_bounds = array<i64: 1, 1, 256>}, {transform_indices = @transform_13, window_bounds = array<i64: 1, 256, 1024>}, {transform_indices = @transform_14, window_bounds = array<i64: 1, 1, 1024>}, {transform_indices = @transform_15, window_bounds = array<i64: 1, 1024, 256>}, {transform_indices = @transform_16, window_bounds = array<i64: 1, 1, 256>}, {pipeline_mode = #tpu.pipeline_mode<synchronous>, transform_indices = @transform_17, window_bounds = array<i64: 1, 256>}, {pipeline_mode = #tpu.pipeline_mode<synchronous>, transform_indices = @transform_18, window_bounds = array<i64: 1, 256>}, {transform_indices = @transform_19, window_bounds = array<i64: 1, 8, 256>}]} {
    %c0_i32 = arith.constant 0 : i32
    %0 = arith.cmpi eq, %arg1, %c0_i32 : i32
    %1 = arith.extui %0 : i1 to i32
    %c0_i32_0 = arith.constant 0 : i32
    %2 = arith.cmpi ne, %1, %c0_i32_0 : i32
    scf.if %2 {
      %c0_71 = arith.constant 0 : index
      %c0_72 = arith.constant 0 : index
      %c0_73 = arith.constant 0 : index
      %152 = vector.load %arg2[%c0_71, %c0_72, %c0_73] : memref<1x8x768xf32, #tpu.memory_space<vmem>>, vector<1x8x768xf32>
      %153 = vector.shape_cast %152 : vector<1x8x768xf32> to vector<8x768xf32>
      %c0_74 = arith.constant 0 : index
      %c0_75 = arith.constant 0 : index
      %154 = vector.load %arg3[%c0_74, %c0_75] : memref<768x256xf32, #tpu.memory_space<vmem>>, vector<768x256xf32>
      %c0_76 = arith.constant 0 : index
      %c0_77 = arith.constant 0 : index
      %155 = vector.load %arg4[%c0_76, %c0_77] : memref<1x256xf32, #tpu.memory_space<vmem>>, vector<1x256xf32>
      %c0_78 = arith.constant 0 : index
      %c0_79 = arith.constant 0 : index
      %156 = vector.load %arg5[%c0_78, %c0_79] : memref<1x256xf32, #tpu.memory_space<vmem>>, vector<1x256xf32>
      %c0_80 = arith.constant 0 : index
      %c0_81 = arith.constant 0 : index
      %157 = vector.load %arg6[%c0_80, %c0_81] : memref<8x256xf32, #tpu.memory_space<vmem>>, vector<8x256xf32>
      %cst_82 = arith.constant dense<0.000000e+00> : vector<8x256xf32>
      %158 = tpu.matmul %153, %154, %cst_82 {dimension_numbers = #tpu.dot_dimension_numbers<[1], [0], [0], [1], [0, 0, 1, 1], [], []>} : vector<8x768xf32>, vector<768x256xf32>, vector<8x256xf32> -> vector<8x256xf32>
      %159 = tpu.iota {dimensions = array<i32: 0>} : vector<8x256xi32>
      %c1_i32_83 = arith.constant 1 : i32
      %160 = vector.broadcast %c1_i32_83 : i32 to vector<8x256xi32>
      %161 = arith.cmpi sge, %159, %160 : vector<8x256xi32>
      %c4_i32 = arith.constant 4 : i32
      %162 = vector.broadcast %c4_i32 : i32 to vector<8x256xi32>
      %163 = arith.cmpi sle, %159, %162 : vector<8x256xi32>
      %164 = arith.andi %161, %163 : vector<8x256xi1>
      %165 = vector.broadcast %155 : vector<1x256xf32> to vector<8x256xf32>
      %166 = arith.addf %158, %165 : vector<8x256xf32>
      %cst_84 = arith.constant 0.000000e+00 : f32
      %167 = vector.broadcast %cst_84 : f32 to vector<8x256xf32>
      %168 = arith.select %164, %166, %167 : vector<8x256xi1>, vector<8x256xf32>
      %c0_i32_85 = arith.constant 0 : i32
      %169 = vector.broadcast %c0_i32_85 : i32 to vector<8x256xi32>
      %170 = arith.cmpi eq, %159, %169 : vector<8x256xi32>
      %171 = vector.shape_cast %156 : vector<1x256xf32> to vector<1x256xf32>
      %172 = vector.broadcast %171 : vector<1x256xf32> to vector<8x256xf32>
      %173 = arith.select %170, %172, %168 : vector<8x256xi1>, vector<8x256xf32>
      %174 = arith.addf %173, %157 : vector<8x256xf32>
      %c0_86 = arith.constant 0 : index
      %c0_87 = arith.constant 0 : index
      %c0_88 = arith.constant 0 : index
      %175 = vector.load %arg21[%c0_86, %c0_87, %c0_88] : memref<1x8x256xf32, #tpu.memory_space<vmem>>, vector<1x8x256xf32>
      %176 = vector.shape_cast %175 : vector<1x8x256xf32> to vector<8x256xf32>
      %177 = vector.shape_cast %174 : vector<8x256xf32> to vector<1x8x256xf32>
      tpu.vector_store %arg21[%c0_86, %c0_87, %c0_88], %177 {strides = array<i32>} : memref<1x8x256xf32, #tpu.memory_space<vmem>>, vector<1x8x256xf32>,
    } else {
    }
    %c0 = arith.constant 0 : index
    %c0_1 = arith.constant 0 : index
    %c0_2 = arith.constant 0 : index
    %3 = vector.load %arg21[%c0, %c0_1, %c0_2] : memref<1x8x256xf32, #tpu.memory_space<vmem>>, vector<1x8x256xf32>
    %4 = vector.shape_cast %3 : vector<1x8x256xf32> to vector<8x256xf32>
    %c0_3 = arith.constant 0 : index
    %c0_4 = arith.constant 0 : index
    %c0_5 = arith.constant 0 : index
    %5 = vector.load %arg7[%c0_3, %c0_4, %c0_5] : memref<1x1x256xf32, #tpu.memory_space<vmem>>, vector<1x1x256xf32>
    %6 = vector.shape_cast %5 : vector<1x1x256xf32> to vector<1x256xf32>
    %c0_6 = arith.constant 0 : index
    %c0_7 = arith.constant 0 : index
    %c0_8 = arith.constant 0 : index
    %7 = vector.load %arg8[%c0_6, %c0_7, %c0_8] : memref<1x1x256xf32, #tpu.memory_space<vmem>>, vector<1x1x256xf32>
    %8 = vector.shape_cast %7 : vector<1x1x256xf32> to vector<1x256xf32>
    %c0_9 = arith.constant 0 : index
    %c0_10 = arith.constant 0 : index
    %c0_11 = arith.constant 0 : index
    %9 = vector.load %arg9[%c0_9, %c0_10, %c0_11] : memref<1x256x768xf32, #tpu.memory_space<vmem>>, vector<1x256x768xf32>
    %10 = vector.shape_cast %9 : vector<1x256x768xf32> to vector<256x768xf32>
    %c0_12 = arith.constant 0 : index
    %c0_13 = arith.constant 0 : index
    %c0_14 = arith.constant 0 : index
    %11 = vector.load %arg10[%c0_12, %c0_13, %c0_14] : memref<1x1x768xf32, #tpu.memory_space<vmem>>, vector<1x1x768xf32>
    %12 = vector.shape_cast %11 : vector<1x1x768xf32> to vector<1x768xf32>
    %c0_15 = arith.constant 0 : index
    %c0_16 = arith.constant 0 : index
    %c0_17 = arith.constant 0 : index
    %13 = vector.load %arg11[%c0_15, %c0_16, %c0_17] : memref<1x256x256xf32, #tpu.memory_space<vmem>>, vector<1x256x256xf32>
    %14 = vector.shape_cast %13 : vector<1x256x256xf32> to vector<256x256xf32>
    %c0_18 = arith.constant 0 : index
    %c0_19 = arith.constant 0 : index
    %c0_20 = arith.constant 0 : index
    %15 = vector.load %arg12[%c0_18, %c0_19, %c0_20] : memref<1x1x256xf32, #tpu.memory_space<vmem>>, vector<1x1x256xf32>
    %16 = vector.shape_cast %15 : vector<1x1x256xf32> to vector<1x256xf32>
    %c0_21 = arith.constant 0 : index
    %c0_22 = arith.constant 0 : index
    %c0_23 = arith.constant 0 : index
    %17 = vector.load %arg13[%c0_21, %c0_22, %c0_23] : memref<1x1x256xf32, #tpu.memory_space<vmem>>, vector<1x1x256xf32>
    %18 = vector.shape_cast %17 : vector<1x1x256xf32> to vector<1x256xf32>
    %c0_24 = arith.constant 0 : index
    %c0_25 = arith.constant 0 : index
    %c0_26 = arith.constant 0 : index
    %19 = vector.load %arg14[%c0_24, %c0_25, %c0_26] : memref<1x1x256xf32, #tpu.memory_space<vmem>>, vector<1x1x256xf32>
    %20 = vector.shape_cast %19 : vector<1x1x256xf32> to vector<1x256xf32>
    %c0_27 = arith.constant 0 : index
    %c0_28 = arith.constant 0 : index
    %c0_29 = arith.constant 0 : index
    %21 = vector.load %arg15[%c0_27, %c0_28, %c0_29] : memref<1x256x1024xf32, #tpu.memory_space<vmem>>, vector<1x256x1024xf32>
    %22 = vector.shape_cast %21 : vector<1x256x1024xf32> to vector<256x1024xf32>
    %c0_30 = arith.constant 0 : index
    %c0_31 = arith.constant 0 : index
    %c0_32 = arith.constant 0 : index
    %23 = vector.load %arg16[%c0_30, %c0_31, %c0_32] : memref<1x1x1024xf32, #tpu.memory_space<vmem>>, vector<1x1x1024xf32>
    %24 = vector.shape_cast %23 : vector<1x1x1024xf32> to vector<1x1024xf32>
    %c0_33 = arith.constant 0 : index
    %c0_34 = arith.constant 0 : index
    %c0_35 = arith.constant 0 : index
    %25 = vector.load %arg17[%c0_33, %c0_34, %c0_35] : memref<1x1024x256xf32, #tpu.memory_space<vmem>>, vector<1x1024x256xf32>
    %26 = vector.shape_cast %25 : vector<1x1024x256xf32> to vector<1024x256xf32>
    %c0_36 = arith.constant 0 : index
    %c0_37 = arith.constant 0 : index
    %c0_38 = arith.constant 0 : index
    %27 = vector.load %arg18[%c0_36, %c0_37, %c0_38] : memref<1x1x256xf32, #tpu.memory_space<vmem>>, vector<1x1x256xf32>
    %28 = vector.shape_cast %27 : vector<1x1x256xf32> to vector<1x256xf32>
    %cst = arith.constant dense<0.000000e+00> : vector<8xf32>
    %29 = vector.multi_reduction <add>, %4, %cst [1] : vector<8x256xf32> to vector<8xf32>
    %30 = vector.shape_cast %29 : vector<8xf32> to vector<8x1xf32>
    %cst_39 = arith.constant 2.560000e+02 : f32
    %31 = vector.broadcast %cst_39 : f32 to vector<8x1xf32>
    %32 = arith.divf %30, %31 : vector<8x1xf32>
    %33 = vector.broadcast %32 : vector<8x1xf32> to vector<8x256xf32>
    %34 = arith.subf %4, %33 : vector<8x256xf32>
    %35 = arith.mulf %34, %34 : vector<8x256xf32>
    %cst_40 = arith.constant dense<0.000000e+00> : vector<8xf32>
    %36 = vector.multi_reduction <add>, %35, %cst_40 [1] : vector<8x256xf32> to vector<8xf32>
    %37 = vector.shape_cast %36 : vector<8xf32> to vector<8x1xf32>
    %cst_41 = arith.constant 2.560000e+02 : f32
    %38 = vector.broadcast %cst_41 : f32 to vector<8x1xf32>
    %39 = arith.divf %37, %38 : vector<8x1xf32>
    %40 = vector.broadcast %32 : vector<8x1xf32> to vector<8x256xf32>
    %41 = arith.subf %4, %40 : vector<8x256xf32>
    %cst_42 = arith.constant 9.99999997E-7 : f32
    %42 = vector.broadcast %cst_42 : f32 to vector<8x1xf32>
    %43 = arith.addf %39, %42 : vector<8x1xf32>
    %44 = math.rsqrt %43 : vector<8x1xf32>
    %45 = vector.broadcast %44 : vector<8x1xf32> to vector<8x256xf32>
    %46 = arith.mulf %41, %45 : vector<8x256xf32>
    %47 = vector.broadcast %6 : vector<1x256xf32> to vector<8x256xf32>
    %48 = arith.mulf %46, %47 : vector<8x256xf32>
    %49 = vector.broadcast %8 : vector<1x256xf32> to vector<8x256xf32>
    %50 = arith.addf %48, %49 : vector<8x256xf32>
    %cst_43 = arith.constant dense<0.000000e+00> : vector<8x768xf32>
    %51 = tpu.matmul %50, %10, %cst_43 {dimension_numbers = #tpu.dot_dimension_numbers<[1], [0], [0], [1], [0, 0, 1, 1], [], []>} : vector<8x256xf32>, vector<256x768xf32>, vector<8x768xf32> -> vector<8x768xf32>
    %52 = vector.broadcast %12 : vector<1x768xf32> to vector<8x768xf32>
    %53 = arith.addf %51, %52 : vector<8x768xf32>
    %54 = vector.extract_strided_slice %53 {offsets = [0, 0], sizes = [8, 256], strides = [1, 1]} : vector<8x768xf32> to vector<8x256xf32>
    %cst_44 = arith.constant 0.0883883461 : f32
    %55 = vector.broadcast %cst_44 : f32 to vector<8x256xf32>
    %56 = arith.mulf %54, %55 : vector<8x256xf32>
    %57 = vector.extract_strided_slice %53 {offsets = [0, 256], sizes = [8, 256], strides = [1, 1]} : vector<8x768xf32> to vector<8x256xf32>
    %58 = vector.extract_strided_slice %53 {offsets = [0, 512], sizes = [8, 256], strides = [1, 1]} : vector<8x768xf32> to vector<8x256xf32>
    %59 = tpu.iota {dimensions = array<i32: 1>} : vector<1x8xi32>
    %c5_i32 = arith.constant 5 : i32
    %60 = vector.broadcast %c5_i32 : i32 to vector<1x8xi32>
    %61 = arith.cmpi slt, %59, %60 : vector<1x8xi32>
    %cst_45 = arith.constant 0.000000e+00 : f32
    %cst_46 = arith.constant -1.000000e+30 : f32
    %62 = vector.broadcast %cst_45 : f32 to vector<1x8xf32>
    %63 = vector.broadcast %cst_46 : f32 to vector<1x8xf32>
    %64 = arith.select %61, %62, %63 : vector<1x8xi1>, vector<1x8xf32>
    %65 = vector.extract_strided_slice %56 {offsets = [0, 0], sizes = [8, 128], strides = [1, 1]} : vector<8x256xf32> to vector<8x128xf32>
    %66 = vector.extract_strided_slice %57 {offsets = [0, 0], sizes = [8, 128], strides = [1, 1]} : vector<8x256xf32> to vector<8x128xf32>
    %67 = vector.extract_strided_slice %58 {offsets = [0, 0], sizes = [8, 128], strides = [1, 1]} : vector<8x256xf32> to vector<8x128xf32>
    "tpu.trace_start"() <{level = 10 : i32, message = "nd,md->nm"}> : () -> ()
    %cst_47 = arith.constant dense<0.000000e+00> : vector<8x8xf32>
    %68 = tpu.matmul %65, %66, %cst_47 {dimension_numbers = #tpu.dot_dimension_numbers<[1], [1], [0], [0], [0, 0, 1, 0], [], []>} : vector<8x128xf32>, vector<8x128xf32>, vector<8x8xf32> -> vector<8x8xf32>
    "tpu.trace_stop"() : () -> ()
    %69 = vector.broadcast %64 : vector<1x8xf32> to vector<8x8xf32>
    %70 = arith.addf %68, %69 : vector<8x8xf32>
    %cst_48 = arith.constant dense<0xFF800000> : vector<8xf32>
    %71 = vector.multi_reduction <maximumf>, %70, %cst_48 [1] : vector<8x8xf32> to vector<8xf32>
    %72 = vector.shape_cast %71 : vector<8xf32> to vector<8x1xf32>
    %73 = vector.broadcast %72 : vector<8x1xf32> to vector<8x8xf32>
    %74 = arith.subf %70, %73 : vector<8x8xf32>
    %75 = math.exp %74 : vector<8x8xf32>
    %cst_49 = arith.constant dense<0.000000e+00> : vector<8xf32>
    %76 = vector.multi_reduction <add>, %75, %cst_49 [1] : vector<8x8xf32> to vector<8xf32>
    %77 = vector.shape_cast %76 : vector<8xf32> to vector<8x1xf32>
    %78 = tpu.reciprocal %77 {approx = true} : vector<8x1xf32> -> vector<8x1xf32>
    %79 = vector.broadcast %78 : vector<8x1xf32> to vector<8x8xf32>
    %80 = arith.mulf %75, %79 : vector<8x8xf32>
    "tpu.trace_start"() <{level = 10 : i32, message = "nm,md->nd"}> : () -> ()
    %cst_50 = arith.constant dense<0.000000e+00> : vector<8x128xf32>
    %81 = tpu.matmul %80, %67, %cst_50 {dimension_numbers = #tpu.dot_dimension_numbers<[1], [0], [0], [1], [0, 0, 1, 1], [], []>} : vector<8x8xf32>, vector<8x128xf32>, vector<8x128xf32> -> vector<8x128xf32>
    "tpu.trace_stop"() : () -> ()
    %82 = vector.extract_strided_slice %56 {offsets = [0, 128], sizes = [8, 128], strides = [1, 1]} : vector<8x256xf32> to vector<8x128xf32>
    %83 = vector.extract_strided_slice %57 {offsets = [0, 128], sizes = [8, 128], strides = [1, 1]} : vector<8x256xf32> to vector<8x128xf32>
    %84 = vector.extract_strided_slice %58 {offsets = [0, 128], sizes = [8, 128], strides = [1, 1]} : vector<8x256xf32> to vector<8x128xf32>
    "tpu.trace_start"() <{level = 10 : i32, message = "nd,md->nm"}> : () -> ()
    %cst_51 = arith.constant dense<0.000000e+00> : vector<8x8xf32>
    %85 = tpu.matmul %82, %83, %cst_51 {dimension_numbers = #tpu.dot_dimension_numbers<[1], [1], [0], [0], [0, 0, 1, 0], [], []>} : vector<8x128xf32>, vector<8x128xf32>, vector<8x8xf32> -> vector<8x8xf32>
    "tpu.trace_stop"() : () -> ()
    %86 = vector.broadcast %64 : vector<1x8xf32> to vector<8x8xf32>
    %87 = arith.addf %85, %86 : vector<8x8xf32>
    %cst_52 = arith.constant dense<0xFF800000> : vector<8xf32>
    %88 = vector.multi_reduction <maximumf>, %87, %cst_52 [1] : vector<8x8xf32> to vector<8xf32>
    %89 = vector.shape_cast %88 : vector<8xf32> to vector<8x1xf32>
    %90 = vector.broadcast %89 : vector<8x1xf32> to vector<8x8xf32>
    %91 = arith.subf %87, %90 : vector<8x8xf32>
    %92 = math.exp %91 : vector<8x8xf32>
    %cst_53 = arith.constant dense<0.000000e+00> : vector<8xf32>
    %93 = vector.multi_reduction <add>, %92, %cst_53 [1] : vector<8x8xf32> to vector<8xf32>
    %94 = vector.shape_cast %93 : vector<8xf32> to vector<8x1xf32>
    %95 = tpu.reciprocal %94 {approx = true} : vector<8x1xf32> -> vector<8x1xf32>
    %96 = vector.broadcast %95 : vector<8x1xf32> to vector<8x8xf32>
    %97 = arith.mulf %92, %96 : vector<8x8xf32>
    "tpu.trace_start"() <{level = 10 : i32, message = "nm,md->nd"}> : () -> ()
    %cst_54 = arith.constant dense<0.000000e+00> : vector<8x128xf32>
    %98 = tpu.matmul %97, %84, %cst_54 {dimension_numbers = #tpu.dot_dimension_numbers<[1], [0], [0], [1], [0, 0, 1, 1], [], []>} : vector<8x8xf32>, vector<8x128xf32>, vector<8x128xf32> -> vector<8x128xf32>
    "tpu.trace_stop"() : () -> ()
    %99 = tpu.concatenate %81, %98 in 1 : vector<8x128xf32>, vector<8x128xf32> -> vector<8x256xf32>
    %cst_55 = arith.constant dense<0.000000e+00> : vector<8x256xf32>
    %100 = tpu.matmul %99, %14, %cst_55 {dimension_numbers = #tpu.dot_dimension_numbers<[1], [0], [0], [1], [0, 0, 1, 1], [], []>} : vector<8x256xf32>, vector<256x256xf32>, vector<8x256xf32> -> vector<8x256xf32>
    %101 = arith.addf %4, %100 : vector<8x256xf32>
    %102 = vector.broadcast %16 : vector<1x256xf32> to vector<8x256xf32>
    %103 = arith.addf %101, %102 : vector<8x256xf32>
    %cst_56 = arith.constant dense<0.000000e+00> : vector<8xf32>
    %104 = vector.multi_reduction <add>, %103, %cst_56 [1] : vector<8x256xf32> to vector<8xf32>
    %105 = vector.shape_cast %104 : vector<8xf32> to vector<8x1xf32>
    %cst_57 = arith.constant 2.560000e+02 : f32
    %106 = vector.broadcast %cst_57 : f32 to vector<8x1xf32>
    %107 = arith.divf %105, %106 : vector<8x1xf32>
    %108 = vector.broadcast %107 : vector<8x1xf32> to vector<8x256xf32>
    %109 = arith.subf %103, %108 : vector<8x256xf32>
    %110 = arith.mulf %109, %109 : vector<8x256xf32>
    %cst_58 = arith.constant dense<0.000000e+00> : vector<8xf32>
    %111 = vector.multi_reduction <add>, %110, %cst_58 [1] : vector<8x256xf32> to vector<8xf32>
    %112 = vector.shape_cast %111 : vector<8xf32> to vector<8x1xf32>
    %cst_59 = arith.constant 2.560000e+02 : f32
    %113 = vector.broadcast %cst_59 : f32 to vector<8x1xf32>
    %114 = arith.divf %112, %113 : vector<8x1xf32>
    %115 = vector.broadcast %107 : vector<8x1xf32> to vector<8x256xf32>
    %116 = arith.subf %103, %115 : vector<8x256xf32>
    %cst_60 = arith.constant 9.99999997E-7 : f32
    %117 = vector.broadcast %cst_60 : f32 to vector<8x1xf32>
    %118 = arith.addf %114, %117 : vector<8x1xf32>
    %119 = math.rsqrt %118 : vector<8x1xf32>
    %120 = vector.broadcast %119 : vector<8x1xf32> to vector<8x256xf32>
    %121 = arith.mulf %116, %120 : vector<8x256xf32>
    %122 = vector.broadcast %18 : vector<1x256xf32> to vector<8x256xf32>
    %123 = arith.mulf %121, %122 : vector<8x256xf32>
    %124 = vector.broadcast %20 : vector<1x256xf32> to vector<8x256xf32>
    %125 = arith.addf %123, %124 : vector<8x256xf32>
    %cst_61 = arith.constant dense<0.000000e+00> : vector<8x1024xf32>
    %126 = tpu.matmul %125, %22, %cst_61 {dimension_numbers = #tpu.dot_dimension_numbers<[1], [0], [0], [1], [0, 0, 1, 1], [], []>} : vector<8x256xf32>, vector<256x1024xf32>, vector<8x1024xf32> -> vector<8x1024xf32>
    %127 = vector.broadcast %24 : vector<1x1024xf32> to vector<8x1024xf32>
    %128 = arith.addf %126, %127 : vector<8x1024xf32>
    %129 = arith.mulf %128, %128 : vector<8x1024xf32>
    %130 = arith.mulf %128, %129 : vector<8x1024xf32>
    %cst_62 = arith.constant 4.471500e-02 : f32
    %131 = vector.broadcast %cst_62 : f32 to vector<8x1024xf32>
    %132 = arith.mulf %131, %130 : vector<8x1024xf32>
    %133 = arith.addf %128, %132 : vector<8x1024xf32>
    %cst_63 = arith.constant 0.797884583 : f32
    %134 = vector.broadcast %cst_63 : f32 to vector<8x1024xf32>
    %135 = arith.mulf %134, %133 : vector<8x1024xf32>
    %136 = math.tanh %135 : vector<8x1024xf32>
    %cst_64 = arith.constant 1.000000e+00 : f32
    %137 = vector.broadcast %cst_64 : f32 to vector<8x1024xf32>
    %138 = arith.addf %137, %136 : vector<8x1024xf32>
    %cst_65 = arith.constant 5.000000e-01 : f32
    %139 = vector.broadcast %cst_65 : f32 to vector<8x1024xf32>
    %140 = arith.mulf %139, %138 : vector<8x1024xf32>
    %141 = arith.mulf %128, %140 : vector<8x1024xf32>
    %cst_66 = arith.constant dense<0.000000e+00> : vector<8x256xf32>
    %142 = tpu.matmul %141, %26, %cst_66 {dimension_numbers = #tpu.dot_dimension_numbers<[1], [0], [0], [1], [0, 0, 1, 1], [], []>} : vector<8x1024xf32>, vector<1024x256xf32>, vector<8x256xf32> -> vector<8x256xf32>
    %143 = vector.broadcast %28 : vector<1x256xf32> to vector<8x256xf32>
    %144 = arith.addf %142, %143 : vector<8x256xf32>
    %145 = arith.addf %103, %144 : vector<8x256xf32>
    %c0_67 = arith.constant 0 : index
    %c0_68 = arith.constant 0 : index
    %c0_69 = arith.constant 0 : index
    %146 = vector.load %arg21[%c0_67, %c0_68, %c0_69] : memref<1x8x256xf32, #tpu.memory_space<vmem>>, vector<1x8x256xf32>
    %147 = vector.shape_cast %146 : vector<1x8x256xf32> to vector<8x256xf32>
    %148 = vector.shape_cast %145 : vector<8x256xf32> to vector<1x8x256xf32>
    tpu.vector_store %arg21[%c0_67, %c0_68, %c0_69], %148 {strides = array<i32>} : memref<1x8x256xf32, #tpu.memory_space<vmem>>, vector<1x8x256xf32>,
    %c1_i32 = arith.constant 1 : i32
    %149 = arith.cmpi eq, %arg1, %c1_i32 : i32
    %150 = arith.extui %149 : i1 to i32
    %c0_i32_70 = arith.constant 0 : i32
    %151 = arith.cmpi ne, %150, %c0_i32_70 : i32
    scf.if %151 {
      %c0_71 = arith.constant 0 : index
      %c0_72 = arith.constant 0 : index
      %c0_73 = arith.constant 0 : index
      %152 = vector.load %arg21[%c0_71, %c0_72, %c0_73] : memref<1x8x256xf32, #tpu.memory_space<vmem>>, vector<1x8x256xf32>
      %153 = vector.shape_cast %152 : vector<1x8x256xf32> to vector<8x256xf32>
      %c0_74 = arith.constant 0 : index
      %c0_75 = arith.constant 0 : index
      %154 = vector.load %arg19[%c0_74, %c0_75] : memref<1x256xf32, #tpu.memory_space<vmem>>, vector<1x256xf32>
      %c0_76 = arith.constant 0 : index
      %c0_77 = arith.constant 0 : index
      %155 = vector.load %arg20[%c0_76, %c0_77] : memref<1x256xf32, #tpu.memory_space<vmem>>, vector<1x256xf32>
      %cst_78 = arith.constant dense<0.000000e+00> : vector<8xf32>
      %156 = vector.multi_reduction <add>, %153, %cst_78 [1] : vector<8x256xf32> to vector<8xf32>
      %157 = vector.shape_cast %156 : vector<8xf32> to vector<8x1xf32>
      %cst_79 = arith.constant 2.560000e+02 : f32
      %158 = vector.broadcast %cst_79 : f32 to vector<8x1xf32>
      %159 = arith.divf %157, %158 : vector<8x1xf32>
      %160 = vector.broadcast %159 : vector<8x1xf32> to vector<8x256xf32>
      %161 = arith.subf %153, %160 : vector<8x256xf32>
      %162 = arith.mulf %161, %161 : vector<8x256xf32>
      %cst_80 = arith.constant dense<0.000000e+00> : vector<8xf32>
      %163 = vector.multi_reduction <add>, %162, %cst_80 [1] : vector<8x256xf32> to vector<8xf32>
      %164 = vector.shape_cast %163 : vector<8xf32> to vector<8x1xf32>
      %cst_81 = arith.constant 2.560000e+02 : f32
      %165 = vector.broadcast %cst_81 : f32 to vector<8x1xf32>
      %166 = arith.divf %164, %165 : vector<8x1xf32>
      %167 = vector.broadcast %159 : vector<8x1xf32> to vector<8x256xf32>
      %168 = arith.subf %153, %167 : vector<8x256xf32>
      %cst_82 = arith.constant 9.99999997E-7 : f32
      %169 = vector.broadcast %cst_82 : f32 to vector<8x1xf32>
      %170 = arith.addf %166, %169 : vector<8x1xf32>
      %171 = math.rsqrt %170 : vector<8x1xf32>
      %172 = vector.broadcast %171 : vector<8x1xf32> to vector<8x256xf32>
      %173 = arith.mulf %168, %172 : vector<8x256xf32>
      %174 = vector.broadcast %154 : vector<1x256xf32> to vector<8x256xf32>
      %175 = arith.mulf %173, %174 : vector<8x256xf32>
      %176 = vector.broadcast %155 : vector<1x256xf32> to vector<8x256xf32>
      %177 = arith.addf %175, %176 : vector<8x256xf32>
      %c0_83 = arith.constant 0 : index
      %c0_84 = arith.constant 0 : index
      %c0_85 = arith.constant 0 : index
      %178 = vector.load %arg21[%c0_83, %c0_84, %c0_85] : memref<1x8x256xf32, #tpu.memory_space<vmem>>, vector<1x8x256xf32>
      %179 = vector.shape_cast %178 : vector<1x8x256xf32> to vector<8x256xf32>
      %180 = vector.shape_cast %177 : vector<8x256xf32> to vector<1x8x256xf32>
      tpu.vector_store %arg21[%c0_83, %c0_84, %c0_85], %180 {strides = array<i32>} : memref<1x8x256xf32, #tpu.memory_space<vmem>>, vector<1x8x256xf32>,
    } else {
    }
    return
  }
  func.func @transform_0(%arg0: i32, %arg1: i32) -> (i32, i32, i32) {
    %c0_i32 = arith.constant 0 : i32
    %c0_i32_0 = arith.constant 0 : i32
    %c0_i32_1 = arith.constant 0 : i32
    return %arg0, %c0_i32, %c0_i32_0 : i32, i32, i32
  }
  func.func @transform_1(%arg0: i32, %arg1: i32) -> (i32, i32) {
    %c0_i32 = arith.constant 0 : i32
    %c0_i32_0 = arith.constant 0 : i32
    %c0_i32_1 = arith.constant 0 : i32
    return %c0_i32, %c0_i32_0 : i32, i32
  }
  func.func @transform_2(%arg0: i32, %arg1: i32) -> (i32, i32) {
    %c0_i32 = arith.constant 0 : i32
    %c0_i32_0 = arith.constant 0 : i32
    %c0_i32_1 = arith.constant 0 : i32
    return %c0_i32, %c0_i32_0 : i32, i32
  }
  func.func @transform_3(%arg0: i32, %arg1: i32) -> (i32, i32) {
    %c0_i32 = arith.constant 0 : i32
    %c0_i32_0 = arith.constant 0 : i32
    %c0_i32_1 = arith.constant 0 : i32
    return %c0_i32, %c0_i32_0 : i32, i32
  }
  func.func @transform_4(%arg0: i32, %arg1: i32) -> (i32, i32) {
    %c0_i32 = arith.constant 0 : i32
    %c0_i32_0 = arith.constant 0 : i32
    %c0_i32_1 = arith.constant 0 : i32
    return %c0_i32, %c0_i32_0 : i32, i32
  }
  func.func @transform_5(%arg0: i32, %arg1: i32) -> (i32, i32, i32) {
    %c0_i32 = arith.constant 0 : i32
    %c0_i32_0 = arith.constant 0 : i32
    %c0_i32_1 = arith.constant 0 : i32
    return %arg1, %c0_i32, %c0_i32_0 : i32, i32, i32
  }
  func.func @transform_6(%arg0: i32, %arg1: i32) -> (i32, i32, i32) {
    %c0_i32 = arith.constant 0 : i32
    %c0_i32_0 = arith.constant 0 : i32
    %c0_i32_1 = arith.constant 0 : i32
    return %arg1, %c0_i32, %c0_i32_0 : i32, i32, i32
  }
  func.func @transform_7(%arg0: i32, %arg1: i32) -> (i32, i32, i32) {
    %c0_i32 = arith.constant 0 : i32
    %c0_i32_0 = arith.constant 0 : i32
    %c0_i32_1 = arith.constant 0 : i32
    return %arg1, %c0_i32, %c0_i32_0 : i32, i32, i32
  }
  func.func @transform_8(%arg0: i32, %arg1: i32) -> (i32, i32, i32) {
    %c0_i32 = arith.constant 0 : i32
    %c0_i32_0 = arith.constant 0 : i32
    %c0_i32_1 = arith.constant 0 : i32
    return %arg1, %c0_i32, %c0_i32_0 : i32, i32, i32
  }
  func.func @transform_9(%arg0: i32, %arg1: i32) -> (i32, i32, i32) {
    %c0_i32 = arith.constant 0 : i32
    %c0_i32_0 = arith.constant 0 : i32
    %c0_i32_1 = arith.constant 0 : i32
    return %arg1, %c0_i32, %c0_i32_0 : i32, i32, i32
  }
  func.func @transform_10(%arg0: i32, %arg1: i32) -> (i32, i32, i32) {
    %c0_i32 = arith.constant 0 : i32
    %c0_i32_0 = arith.constant 0 : i32
    %c0_i32_1 = arith.constant 0 : i32
    return %arg1, %c0_i32, %c0_i32_0 : i32, i32, i32
  }
  func.func @transform_11(%arg0: i32, %arg1: i32) -> (i32, i32, i32) {
    %c0_i32 = arith.constant 0 : i32
    %c0_i32_0 = arith.constant 0 : i32
    %c0_i32_1 = arith.constant 0 : i32
    return %arg1, %c0_i32, %c0_i32_0 : i32, i32, i32
  }
  func.func @transform_12(%arg0: i32, %arg1: i32) -> (i32, i32, i32) {
    %c0_i32 = arith.constant 0 : i32
    %c0_i32_0 = arith.constant 0 : i32
    %c0_i32_1 = arith.constant 0 : i32
    return %arg1, %c0_i32, %c0_i32_0 : i32, i32, i32
  }
  func.func @transform_13(%arg0: i32, %arg1: i32) -> (i32, i32, i32) {
    %c0_i32 = arith.constant 0 : i32
    %c0_i32_0 = arith.constant 0 : i32
    %c0_i32_1 = arith.constant 0 : i32
    return %arg1, %c0_i32, %c0_i32_0 : i32, i32, i32
  }
  func.func @transform_14(%arg0: i32, %arg1: i32) -> (i32, i32, i32) {
    %c0_i32 = arith.constant 0 : i32
    %c0_i32_0 = arith.constant 0 : i32
    %c0_i32_1 = arith.constant 0 : i32
    return %arg1, %c0_i32, %c0_i32_0 : i32, i32, i32
  }
  func.func @transform_15(%arg0: i32, %arg1: i32) -> (i32, i32, i32) {
    %c0_i32 = arith.constant 0 : i32
    %c0_i32_0 = arith.constant 0 : i32
    %c0_i32_1 = arith.constant 0 : i32
    return %arg1, %c0_i32, %c0_i32_0 : i32, i32, i32
  }
  func.func @transform_16(%arg0: i32, %arg1: i32) -> (i32, i32, i32) {
    %c0_i32 = arith.constant 0 : i32
    %c0_i32_0 = arith.constant 0 : i32
    %c0_i32_1 = arith.constant 0 : i32
    return %arg1, %c0_i32, %c0_i32_0 : i32, i32, i32
  }
  func.func @transform_17(%arg0: i32, %arg1: i32) -> (i32, i32) {
    %c0_i32 = arith.constant 0 : i32
    %c0_i32_0 = arith.constant 0 : i32
    %c0_i32_1 = arith.constant 0 : i32
    return %c0_i32, %c0_i32_0 : i32, i32
  }
  func.func @transform_18(%arg0: i32, %arg1: i32) -> (i32, i32) {
    %c0_i32 = arith.constant 0 : i32
    %c0_i32_0 = arith.constant 0 : i32
    %c0_i32_1 = arith.constant 0 : i32
    return %c0_i32, %c0_i32_0 : i32, i32
  }
  func.func @transform_19(%arg0: i32, %arg1: i32) -> (i32, i32, i32) {
    %c0_i32 = arith.constant 0 : i32
    %c0_i32_0 = arith.constant 0 : i32
    %c0_i32_1 = arith.constant 0 : i32
    return %arg0, %c0_i32, %c0_i32_0 : i32, i32, i32
  }
}

</mosaic_0001>

<bundles_post_ra>
// kernel: biomedclip_forward.1
= control target key start
LH: loop header
LB: loop body
LE: loop exit
PB: predicated region body
PF: predicated region fallthrough
CT: control target
= control target key end

     0   :  { %s6083_s0 = inlined_call_operand.vmem [shape: f32[2,8,768], index: 0, kind: input, shape index: {}]   ;;  %s6084_s1 = inlined_call_operand.hbm [shape: f32[768,256], index: 1, kind: input, shape index: {}]   ;;  %s6085_s2 = inlined_call_operand.hbm [shape: f32[1,256], index: 2, kind: input, shape index: {}]   ;;  %s6086_s3 = inlined_call_operand.hbm [shape: f32[1,256], index: 3, kind: input, shape index: {}]   ;;  %s6087_s4 = inlined_call_operand.hbm [shape: f32[8,256], index: 4, kind: input, shape index: {}]   ;;  %s6088_s5 = inlined_call_operand.vmem [shape: f32[2,1,256], index: 5, kind: input, shape index: {}, may-alias: {5,11}]   ;;  %s6089_s6 = inlined_call_operand.vmem [shape: f32[2,1,256], index: 6, kind: input, shape index: {}, may-alias: {6,12}]   ;;  %s6090_s7 = inlined_call_operand.hbm [shape: f32[2,256,768], index: 7, kind: input, shape index: {}]   ;;  %s6091_s8 = inlined_call_operand.hbm [shape: f32[2,1,768], index: 8, kind: input, shape index: {}]   ;;  %s6092_s9 = inlined_call_operand.hbm [shape: f32[2,256,256], index: 9, kind: input, shape index: {}]   ;;  %s6093_s10 = inlined_call_operand.hbm [shape: f32[2,1,256], index: 10, kind: input, shape index: {}]   ;;  %s6094_s11 = inlined_call_operand.vmem [shape: f32[2,1,256], index: 11, kind: input, shape index: {}, may-alias: {5,11}]   ;;  %s6095_s12 = inlined_call_operand.vmem [shape: f32[2,1,256], index: 12, kind: input, shape index: {}, may-alias: {6,12}]   ;;  %s6096_s13 = inlined_call_operand.hbm [shape: f32[2,256,1024], index: 13, kind: input, shape index: {}]   ;;  %s6097_s14 = inlined_call_operand.hbm [shape: f32[2,1,1024], index: 14, kind: input, shape index: {}]   ;;  %s6098_s15 = inlined_call_operand.hbm [shape: f32[2,1024,256], index: 15, kind: input, shape index: {}]   ;;  %s6099_s16 = inlined_call_operand.hbm [shape: f32[2,1,256], index: 16, kind: input, shape index: {}]   ;;  %s6100_s17 = inlined_call_operand.vmem [shape: f32[1,256], index: 17, kind: input, shape index: {}]   ;;  %s6101_s18 = inlined_call_operand.vmem [shape: f32[1,256], index: 18, kind: input, shape index: {}]   ;;  %s6102_s19 = inlined_call_operand.vmem [shape: f32[2,8,256], index: 19, kind: output, shape index: {}]  }
   0x1   :  { %6120 = sst [smem:[#allocation32_spill]] %s6083_s0 }
   0x2   :  { %6121 = sst [smem:[#allocation33_spill]] %s6084_s1 }
   0x3   :  { %6122 = sst [smem:[#allocation34_spill]] %s6085_s2 }
   0x4   :  { %6123 = sst [smem:[#allocation35_spill]] %s6086_s3 }
   0x5   :  { %6124 = sst [smem:[#allocation36_spill]] %s6087_s4 }
   0x6   :  { %6125 = sst [smem:[#allocation37_spill]] %s6088_s5 }
   0x7   :  { %6126 = sst [smem:[#allocation38_spill]] %s6089_s6 }
   0x8   :  { %6127 = sst [smem:[#allocation39_spill]] %s6090_s7 }
   0x9   :  { %6128 = sst [smem:[#allocation40_spill]] %s6091_s8 }
   0xa   :  { %6129 = sst [smem:[#allocation41_spill]] %s6092_s9 }
   0xb   :  { %6130 = sst [smem:[#allocation42_spill]] %s6093_s10 }
   0xc   :  { %6131 = sst [smem:[#allocation43_spill]] %s6094_s11 }
   0xd   :  { %6132 = sst [smem:[#allocation44_spill]] %s6095_s12 }
   0xe   :  { %6133 = sst [smem:[#allocation45_spill]] %s6096_s13 }
   0xf   :  { %6134 = sst [smem:[#allocation46_spill]] %s6097_s14 }
  0x10   :  { %6135 = sst [smem:[#allocation47_spill]] %s6098_s15 }
  0x11   :  { %6136 = sst [smem:[#allocation48_spill]] %s6099_s16 }
  0x12   :  { %6137 = sst [smem:[#allocation49_spill]] %s6100_s17 }
  0x13   :  { %6138 = sst [smem:[#allocation50_spill]] %s6101_s18 }
  0x14   :  { %6139 = sst [smem:[#allocation51_spill]] %s6102_s19 }
  0x15   :  { %24 = vsyncpa [#allocation3], 0 }
  0x16   :  { %25 = vsyncpa [#allocation5], 0 }
  0x17   :  { %26 = vsyncpa [#allocation8], 0  ;;  %s4737_s0 = smov 0   ;;  %s4739_s30 = smov 0  }
  0x18   :  { %s4741_s20 = smov 0   ;;  %s4743_s21 = smov 0  }
  0x19   :  { %s4745_s1 = smov 0   ;;  %s4747_s22 = smov 0  }
  0x1a   :  { %s4749_s2 = smov 0   ;;  %s4751_s23 = smov 0  }
  0x1b LB: > { %6140 = sst [smem:[#allocation21_spill]] %s4599_s30  ;;  %s6104_s24 = sadd.s32 4294967295, %s4623_s23   ;;  %s4623_s23 = sphi %s4751_s23, %s32_s23   ;;  %s4619_s2 = sphi %s4749_s2, %s6201_s2   ;;  %s4615_s22 = sphi %s4747_s22, %s6200_s22   ;;  %s4611_s1 = sphi %s4745_s1, %s6199_s1   ;;  %s4607_s21 = sphi %s4743_s21, %s6198_s21   ;;  %s4603_s20 = sphi %s4741_s20, %s6197_s20   ;;  %s4599_s30 = sphi %s4739_s30, %s6196_s30   ;;  %s4595_s0 = sphi %s4737_s0, %s6195_s0  }
  0x1c   : > { %6141 = sst [smem:[#allocation22_spill]] %s4603_s20  ;;  %s41_s25 = sadd.s32 1, %s4615_s22 }
  0x1d   : > { %6142 = sst [smem:[#allocation23_spill]] %s4607_s21  ;;  %p42_p0 = scmp.ge.s32.totalorder %s41_s25, 2 }
  0x1e   : > { %6143 = sst [smem:[#allocation24_spill]] %s4611_s1  ;;  %s44_s3 = sadd.s32 1, %s4619_s2 }
  0x1f   : > { %6144 = sst [smem:[#allocation25_spill]] %s4615_s22  ;;  %s213_s26 = sadd.s32 1, %s4603_s20 }
  0x20   : > { %6145 = sst [smem:[#allocation26_spill]] %s4619_s2  ;;  %p220_p1 = scmp.ne.s32.totalorder %s4603_s20, %s4599_s30 }
  0x21   : > { %6146 = sst [smem:[#allocation27_spill]] %s4623_s23  ;;  %s6203_s25 = smov (%p42_p0, %s41_s25), 0 }
  0x22   : > { %6147 = sst [smem:[#allocation28_spill]] %s6203_s25  ;;  %s6205_s3 = smov (!%p42_p0, %s44_s3), %s4619_s2 }
  0x23   : > { %s210_s27 = ssub.s32 %s4615_s22, %s6203_s25  ;;  %p221_p2 = scmp.eq.s32.totalorder %s4623_s23, 0 }
  0x24   : > { %p46_p3 = scmp.ge.s32.totalorder %s6205_s3, 2  ;;  %p211_p4 = scmp.eq.s32.totalorder %s210_s27, 0 }
  0x25   : > { %p4787_p5 = por %p221_p2, %p220_p1  ;;  %p226_p6 = scmp.ne.s32.totalorder %s4599_s30, %s4595_s0 }
  0x26   : > { %s6207_s3 = smov (%p46_p3, %s6205_s3), 0  ;;  %p4799_p7 = scmp.eq.s32.totalorder %s6104_s24, 0 }
  0x27   : > { %6149 = sst [smem:[#allocation29_spill]] %s6207_s3  ;;  %p3939_p8 = scmp.ge.s32.totalorder %s4623_s23, 1 }
  0x28   : > { %s4795_s29 = scalar_select %p211_p4, %s4603_s20, %s213_s26  }
  0x29   : > { %p539_p9 = scmp.lt.s32.totalorder %s4623_s23, 5  ;;  %p4807_p10 = por %p4799_p7, %p226_p6 }
  0x2a   : > { %6150 = sst [smem:[#allocation30_spill]] %s4795_s29  ;;  %s4625_s2 = smov [#allocation2]  }
  0x2b   : > { %s6152_s27 = scalar_select %p4807_p10, 1, 0 }
  0x2c   : > { %s6154_s26 = sld [smem:[#allocation33_spill]]  ;;  %p4814_p11 = pnand %p3939_p8, %p539_p9 }
  0x2d   : > { %6153 = sst [smem:[#allocation31_spill]] %s6152_s27  ;;  %s552_s29 = sshll.u32 %s4625_s2, 4  ;;  %s553_s29 = int_to_ptr.vmem [resolvable:$true] %s552_s29 }
  0x2e   : > { %p4028_p12 = pneg %p4814_p11  ;;  %p4070_p0 = scmp.lt.s32.totalorder %s4623_s23, 4 }
  0x2f   : > { %s630_s3 = sand.u32 1, %s4623_s23   ;;  %s6108_s0 = smov 256  }
  0x30   : > { %p4822_p13 = pnand %p4028_p12, %p4799_p7  ;;  %p4835_p1 = pnand %p4070_p0, %p4787_p5 }
  0x31   : > { %s4840_s12 = sand.u32 1, %s4603_s20   ;;  %s3990_s6 = smul.u32 1536, %s4615_s22 }
  0x32   : > { %s550_s25 = sshll.u32 %s6154_s26, 4  ;;  %s6110_s26 = smov 16   ;;  %s551_s25 = int_to_ptr.hbm [resolvable:$true] %s550_s25 }
  0x33   : > { %4031 = dma.hbm_to_vmem [thread:$0]  (!%p4822_p13), %s551_s25, 24576, %s553_s29, [#allocation3], %s6108_s0, %s6108_s0, %s6110_s26  }
  0x34   : > { %s3989_s11 = smul.u32 1536, %s4840_s12  ;;  %s6158_s7 = sld [smem:[#allocation39_spill]] }
  0x35   : > { %s3991_s29 = smul.u32 6, %s4840_s12  ;;  %s4848_s0 = scalar_lea.sflag [#allocation3], %s630_s3 }
  0x36   : > { %s634_s1 = scalar_lea.vmem [#allocation9], %s3989_s11  ;;  %s4628_s26 = smov 768  }
  0x37   : > { %s642_s25 = sshll.u32 %s634_s1, 4  ;;  %s4629_s20 = smov 48   ;;  %s643_s25 = int_to_ptr.vmem [resolvable:$true] %s642_s25 }
  0x38   : > { %s3992_s27 = smul.u32 6, %s4615_s22  ;;  %s656_s5 = scalar_lea.vmem [#allocation10], %s3991_s29 }
  0x39   : > { %s3946_s11 = sshll.u32 %s4840_s12, 9  ;;  %s6159_s8 = sld [smem:[#allocation40_spill]] }
  0x3a   : > { %s639_s21 = scalar_lea.hbm %s6158_s7, %s3990_s6  ;;  %s664_s6 = sshll.u32 %s656_s5, 4  ;;  %s665_s6 = int_to_ptr.vmem [resolvable:$true] %s664_s6 }
  0x3b   : > { %s640_s28 = sshll.u32 %s639_s21, 4  ;;  %s3985_s7 = sshll.u32 %s4615_s22, 9  ;;  %s641_s28 = int_to_ptr.hbm [resolvable:$true] %s640_s28 }
  0x3c   : > { %4044 = dma.hbm_to_vmem [thread:$0]  (!%p4835_p1), %s641_s28, 24576, %s643_s25, %s4848_s0, %s4628_s26, %s4628_s26, %s4629_s20  }
  0x3d   : > { %s6160_s9 = sld [smem:[#allocation41_spill]]  ;;  %s675_s28 = scalar_lea.vmem [#allocation11], %s3946_s11 }
  0x3e   : > { %s683_s29 = sshll.u32 %s675_s28, 4  ;;  %s6161_s19 = smov 16   ;;  %s684_s29 = int_to_ptr.vmem [resolvable:$true] %s683_s29 }
  0x3f   : > { %s660_s1 = scalar_lea.hbm %s6159_s8, %s3992_s27  ;;  %s6115_s27 = sshll.u32 %s4840_s12, 1 }
  0x40   : > { %s662_s3 = sshll.u32 %s660_s1, 4  ;;  %s6162_s21 = smov 256   ;;  %s663_s3 = int_to_ptr.hbm [resolvable:$true] %s662_s3 }
  0x41   : > { %4047 = dma.hbm_to_vmem [thread:$0]  (!%p4835_p1), %s663_s3, 96, %s665_s6, %s4848_s0  }
  0x42   : > { %s6116_s6 = sshll.u32 %s4615_s22, 1  ;;  %s6163_s10 = sld [smem:[#allocation42_spill]] }
  0x43   : > { %s680_s25 = scalar_lea.hbm %s6160_s9, %s3985_s7  ;;  %s697_s11 = scalar_lea.vmem [#allocation12], %s6115_s27 }
  0x44   : > { %s681_s5 = sshll.u32 %s680_s25, 4  ;;  %s705_s20 = sshll.u32 %s697_s11, 4  ;;  %s682_s5 = int_to_ptr.hbm [resolvable:$true] %s681_s5  ;;  %s706_s20 = int_to_ptr.vmem [resolvable:$true] %s705_s20 }
  0x45   : > { %4050 = dma.hbm_to_vmem [thread:$0]  (!%p4835_p1), %s682_s5, 8192, %s684_s29, %s4848_s0, %s6162_s21, %s6162_s21, %s6161_s19  }
  0x46   : > { %s3951_s25 = sshll.u32 %s4840_s12, 11  ;;  %s3986_s28 = sshll.u32 %s4615_s22, 11 }
  0x47   : > { %s6164_s13 = sld [smem:[#allocation45_spill]]  ;;  %s730_s1 = scalar_lea.vmem [#allocation13], %s3951_s25 }
  0x48   : > { %s701_s7 = scalar_lea.hbm %s6163_s10, %s6116_s6  ;;  %s738_s3 = sshll.u32 %s730_s1, 4  ;;  %s739_s3 = int_to_ptr.vmem [resolvable:$true] %s738_s3 }
  0x49   : > { %s703_s26 = sshll.u32 %s701_s7, 4  ;;  %s3954_s11 = sshll.u32 %s4840_s12, 3  ;;  %s704_s26 = int_to_ptr.hbm [resolvable:$true] %s703_s26 }
  0x4a   : > { %4053 = dma.hbm_to_vmem [thread:$0]  (!%p4835_p1), %s704_s26, 32, %s706_s20, %s4848_s0  }
  0x4b   : > { %s4630_s7 = smov 1024   ;;  %s4631_s6 = smov 64  }
  0x4c   : > { %s3955_s9 = sshll.u32 %s4615_s22, 3  ;;  %s6165_s14 = sld [smem:[#allocation46_spill]] }
  0x4d   : > { %s735_s8 = scalar_lea.hbm %s6164_s13, %s3986_s28  ;;  %s752_s29 = scalar_lea.vmem [#allocation14], %s3954_s11 }
  0x4e   : > { %s736_s27 = sshll.u32 %s735_s8, 4  ;;  %s760_s5 = sshll.u32 %s752_s29, 4  ;;  %s737_s27 = int_to_ptr.hbm [resolvable:$true] %s736_s27  ;;  %s761_s5 = int_to_ptr.vmem [resolvable:$true] %s760_s5 }
  0x4f   : > { %4056 = dma.hbm_to_vmem [thread:$0]  (!%p4835_p1), %s737_s27, 32768, %s739_s3, %s4848_s0, %s4630_s7, %s4630_s7, %s4631_s6  }
  0x50   : > { %s6166_s30 = sld [smem:[#allocation34_spill]]  ;;  %s4632_s27 = smov [#allocation4]  }
  0x51   : > { %s567_s6 = sshll.u32 %s4632_s27, 4  ;;  %s6167_s15 = sld [smem:[#allocation47_spill]]  ;;  %s568_s6 = int_to_ptr.vmem [resolvable:$true] %s567_s6 }
  0x52   : > { %s756_s10 = scalar_lea.hbm %s6165_s14, %s3955_s9  ;;  %s771_s7 = scalar_lea.vmem [#allocation15], %s3951_s25 }
  0x53   : > { %s758_s13 = sshll.u32 %s756_s10, 4  ;;  %s779_s20 = sshll.u32 %s771_s7, 4  ;;  %s759_s13 = int_to_ptr.hbm [resolvable:$true] %s758_s13  ;;  %s780_s20 = int_to_ptr.vmem [resolvable:$true] %s779_s20 }
  0x54   : > { %4059 = dma.hbm_to_vmem [thread:$0]  (!%p4835_p1), %s759_s13, 128, %s761_s5, %s4848_s0  }
  0x55   : > { %s6168_s26 = sld [smem:[#allocation35_spill]]  ;;  %s4634_s1 = smov [#allocation7]  }
  0x56   : > { %s565_s23 = sshll.u32 %s6166_s30, 4  ;;  %s6169_s4 = sld [smem:[#allocation36_spill]]  ;;  %s566_s23 = int_to_ptr.hbm [resolvable:$true] %s565_s23 }
  0x57   : > { %s776_s11 = scalar_lea.hbm %s6167_s15, %s3986_s28  ;;  %s4633_s28 = smov [#allocation6]  }
  0x58   : > { %4034 = dma.hbm_to_vmem [thread:$0]  (!%p4822_p13), %s566_s23, 32, %s568_s6, [#allocation5]  }
  0x59   : > { %s777_s10 = sshll.u32 %s776_s11, 4  ;;  %s579_s23 = sshll.u32 %s4633_s28, 4  ;;  %s778_s10 = int_to_ptr.hbm [resolvable:$true] %s777_s10  ;;  %s580_s23 = int_to_ptr.vmem [resolvable:$true] %s579_s23 }
  0x5a   : > { %4062 = dma.hbm_to_vmem [thread:$0]  (!%p4835_p1), %s778_s10, 32768, %s780_s20, %s4848_s0, %s6162_s21, %s6162_s21, %s6161_s19  }
  0x5b   : > { %s577_s29 = sshll.u32 %s6168_s26, 4  ;;  %s591_s27 = sshll.u32 %s4634_s1, 4  ;;  %s578_s29 = int_to_ptr.hbm [resolvable:$true] %s577_s29  ;;  %s592_s27 = int_to_ptr.vmem [resolvable:$true] %s591_s27 }
  0x5c   : > { %s589_s8 = sshll.u32 %s6169_s4, 4  ;;  %s6170_s19 = sshll.u32 %s4615_s22, 1  ;;  %s590_s8 = int_to_ptr.hbm [resolvable:$true] %s589_s8 }
  0x5d   : > { %4037 = dma.hbm_to_vmem [thread:$0]  (!%p4822_p13), %s578_s29, 32, %s580_s23, [#allocation5]  }
  0x5e   : > { %s6171_s16 = sld [smem:[#allocation48_spill]]  ;;  %s6172_s11 = sshll.u32 %s4840_s12, 1 }
  0x5f   : > { %4040 = dma.hbm_to_vmem [thread:$0]  (!%p4822_p13), %s590_s8, 256, %s592_s27, [#allocation8]  }
  0x60   : > { %s793_s10 = scalar_lea.vmem [#allocation16], %s6172_s11 }
  0x61   : > { %s801_s7 = sshll.u32 %s793_s10, 4  ;;  %s802_s7 = int_to_ptr.vmem [resolvable:$true] %s801_s7 }
  0x62   : > { %810 = sbr.rel (%p4814_p11) target bundleno = 2419 (0x973), region = 96 }
  0x64   : > { %s797_s3 = scalar_lea.hbm %s6171_s16, %s6170_s19 }
  0x65   : > { %s799_s9 = sshll.u32 %s797_s3, 4  ;;  %s800_s9 = int_to_ptr.hbm [resolvable:$true] %s799_s9 }
  0x66   : > { %4065 = dma.hbm_to_vmem [thread:$0]  (!%p4835_p1), %s800_s9, 32, %s802_s7, %s4848_s0  }
  0x67   : > { %4578 = dma.done.wait (%p4799_p7), [#allocation3], 24576  }
  0x68   : > { %4580 = vsyncadd (%p4799_p7), [#allocation3], 4294942720 }
  0x69   : > { %4582 = dma.done.wait (%p4799_p7), [#allocation5], 64  }
  0x6a   : > { %4584 = vsyncadd (%p4799_p7), [#allocation5], 4294967232 }
  0x6b   : > { %4586 = dma.done.wait (%p4799_p7), [#allocation8], 256  }
  0x6c   : > { %4588 = vsyncadd (%p4799_p7), [#allocation8], 4294967040  ;;  %s6173_s12 = sld [smem:[#allocation27_spill]] }
  0x6d   : > { %s6175_s24 = sld [smem:[#allocation21_spill]] }
  0x72   : > { %s6174_s17 = sadd.s32 4294967295, %s6173_s12  }
  0x73   : > { %s832_s2 = sand.u32 1, %s6174_s17   ;;  %s4950_s20 = sand.u32 1, %s6175_s24  }
  0x74   : > { %s3993_s13 = smul.u32 1536, %s4950_s20  ;;  %s833_s30 = scalar_lea.sflag [#allocation3], %s832_s2 }
  0x76   : > { %s4953_s26 = scalar_lea.vmem [#allocation9], %s3993_s13 }
  0x77   : > { %4590 = dma.done.wait (%p4807_p10), %s833_s30, 98592  }
  0x78   : > { %4592 = vsyncadd (%p4807_p10), %s833_s30, 4294868704  ;;  %s6177_s18 = sld [smem:[#allocation24_spill]]  ;;  %s3994_s28 = smul.u32 6, %s4950_s20 }
  0x79   : > { %s6178_s29 = sld [smem:[#allocation23_spill]]  ;;  %s3966_s23 = sshll.u32 %s4950_s20, 9 }
  0x7a   : > { %s3967_s25 = sshll.u32 %s4950_s20, 1  ;;  %s3968_s5 = sshll.u32 %s4950_s20, 11 }
  0x7b   : > { %s3969_s8 = sshll.u32 %s4950_s20, 3  ;;  %s6179_s9 = sld [smem:[#allocation51_spill]] }
  0x7c   : > { %s6180_s12 = sld [smem:[#allocation32_spill]]  ;;  %s4996_s22 = scalar_lea.vmem [#allocation10], %s3994_s28 }
  0x7d   : > { %s6181_s2 = sld [smem:[#allocation37_spill]]  ;;  %s5000_s10 = scalar_lea.vmem [#allocation12], %s3967_s25 }
  0x7e   : > { %p1018_p2 = scmp.lt.s32.totalorder %s6177_s18, 1  ;;  %s6183_s4 = sld [smem:[#allocation43_spill]] }
  0x7f   : > { %p1023_p3 = scmp.lt.s32.totalorder %s6178_s29, 1  ;;  %s5002_s7 = scalar_lea.vmem [#allocation13], %s3968_s5 }
  0x80   : > { %s6209_s18 = smov (!%p1018_p2, %s6177_s18), 1  ;;  %s5006_s24 = scalar_lea.vmem [#allocation15], %s3968_s5 }
  0x81   : > { %s1024_s1 = scalar_select %p1023_p3, %s6178_s29, 1 }
  0x82   : > { %s3995_s27 = smul.u32 48, %s6209_s18  ;;  %s3988_s19 = sshll.u32 %s6209_s18, 4 }
  0x83   : > { %s4968_s21 = sshll.u32 %s1024_s1, 1  ;;  %s4973_s11 = scalar_lea.vmem %s6179_s9, %s3988_s19 }
  0x84   : > { %s4978_s17 = scalar_lea.vmem %s6180_s12, %s3995_s27  ;;  %s1026_s20 = scalar_lea.vmem %s6181_s2, %s4968_s21 }
  0x85   : > { %s6182_s18 = sld [smem:[#allocation38_spill]]  ;;  %s1034_s14 = scalar_lea.vmem %s6183_s4, %s4968_s21 }
  0x86   : > { %s6184_s9 = sld [smem:[#allocation44_spill]]  ;;  %s4998_s27 = scalar_lea.vmem [#allocation11], %s3966_s23 }
  0x87   : > { %s5004_s12 = scalar_lea.vmem [#allocation14], %s3969_s8  ;;  %s5008_s0 = scalar_lea.vmem [#allocation16], %s3967_s25 }
  0x88   : > { %p3979_p4 = scmp.ne.s32.totalorder %s6178_s29, 0 }
  0x8a   : > { %1047 = sbr.rel (%p3979_p4) target bundleno = 384 (0x180), region = 148 }
  0x8b   : > { %s1030_s1 = scalar_lea.vmem %s6182_s18, %s4968_s21 }
  0x8c   : > { %s1038_s16 = scalar_lea.vmem %s6184_s9, %s4968_s21 }
  0x8f   : > { %v1148_v0 = vld [vmem:[#allocation2 + $0x2f0] sm:$0xff]  ;;  %v1146_v2 = vld [vmem:[#allocation2 + $0x2e0] sm:$0xff]  ;;  %v1085_v62 = vld [vmem:[#allocation2 + $0xf8] sm:$0xff] }
  0x90   : > { %v1084_v1 = vld [vmem:[#allocation2 + $0xf0] sm:$0xff]  ;;  %1300 = vmatpush.msra.mxu2 %v1148_v0  ;;  %v1082_v4 = vld [vmem:[#allocation2 + $0xe0] sm:$0xff] }
  0x91   : > { %1260 = vmatpush.msra.mxu0 %v1084_v1  ;;  %v1180_v3 = vld [vmem:[#allocation2 + $0x3f0] sm:$0xff]  ;;  %v1178_v7 = vld [vmem:[#allocation2 + $0x3e0] sm:$0xff]  ;;  %v1117_v1 = vld [vmem:[#allocation2 + $0x1f8] sm:$0xff] }
  0x92   : > { %v1116_v5 = vld [vmem:[#allocation2 + $0x1f0] sm:$0xff]  ;;  %1320 = vmatpush.msra.mxu3 %v1180_v3  ;;  %1301 = vmatpush.msra.mxu2 %v1146_v2  ;;  %v1114_v9 = vld [vmem:[#allocation2 + $0x1e0] sm:$0xff]  ;;  %v1083_v2 = vld [vmem:[#allocation2 + $0xe8] sm:$0xff] }
  0x93   : > { %1280 = vmatpush.msra.mxu1 %v1116_v5  ;;  %v1144_v6 = vld [vmem:[#allocation2 + $0x2d0] sm:$0xff]  ;;  %1261 = vmatpush.msra.mxu0 %v1082_v4  ;;  %v1142_v11 = vld [vmem:[#allocation2 + $0x2c0] sm:$0xff] }
  0x94   : > { %v1080_v8 = vld [vmem:[#allocation2 + $0xd0] sm:$0xff]  ;;  %1321 = vmatpush.msra.mxu3 %v1178_v7  ;;  %v1078_v12 = vld [vmem:[#allocation2 + $0xc0] sm:$0xff]  ;;  %1302 = vmatpush.msra.mxu2 %v1144_v6  ;;  %v1081_v6 = vld [vmem:[#allocation2 + $0xd8] sm:$0xff] }
  0x95   : > { %v1176_v10 = vld [vmem:[#allocation2 + $0x3d0] sm:$0xff]  ;;  %1281 = vmatpush.msra.mxu1 %v1114_v9  ;;  %1262 = vmatpush.msra.mxu0 %v1080_v8  ;;  %v1174_v14 = vld [vmem:[#allocation2 + $0x3c0] sm:$0xff]  ;;  %v1115_v7 = vld [vmem:[#allocation2 + $0x1e8] sm:$0xff] }
  0x96   : > { %v1112_v13 = vld [vmem:[#allocation2 + $0x1d0] sm:$0xff]  ;;  %v1110_v15 = vld [vmem:[#allocation2 + $0x1c0] sm:$0xff]  ;;  %1322 = vmatpush.msra.mxu3 %v1176_v10  ;;  %1303 = vmatpush.msra.mxu2 %v1142_v11  ;;  %v1079_v10 = vld [vmem:[#allocation2 + $0xc8] sm:$0xff] }
  0x97   : > { %1282 = vmatpush.msra.mxu1 %v1112_v13  ;;  %v1140_v16 = vld [vmem:[#allocation2 + $0x2b0] sm:$0xff]  ;;  %1263 = vmatpush.msra.mxu0 %v1078_v12  ;;  %v1138_v20 = vld [vmem:[#allocation2 + $0x2a0] sm:$0xff]  ;;  %v1113_v11 = vld [vmem:[#allocation2 + $0x1d8] sm:$0xff] }
  0x98   : > { %v1076_v17 = vld [vmem:[#allocation2 + $0xb0] sm:$0xff]  ;;  %1323 = vmatpush.msra.mxu3 %v1174_v14  ;;  %v1074_v21 = vld [vmem:[#allocation2 + $0xa0] sm:$0xff]  ;;  %1304 = vmatpush.msra.mxu2 %v1140_v16  ;;  %v1077_v14 = vld [vmem:[#allocation2 + $0xb8] sm:$0xff] }
  0x99   : > { %v1172_v18 = vld [vmem:[#allocation2 + $0x3b0] sm:$0xff]  ;;  %1283 = vmatpush.msra.mxu1 %v1110_v15  ;;  %1264 = vmatpush.msra.mxu0 %v1076_v17  ;;  %v1170_v22 = vld [vmem:[#allocation2 + $0x3a0] sm:$0xff]  ;;  %v1111_v15 = vld [vmem:[#allocation2 + $0x1c8] sm:$0xff] }
  0x9a   : > { %v1108_v19 = vld [vmem:[#allocation2 + $0x1b0] sm:$0xff]  ;;  %v1106_v23 = vld [vmem:[#allocation2 + $0x1a0] sm:$0xff]  ;;  %1324 = vmatpush.msra.mxu3 %v1172_v18  ;;  %1305 = vmatpush.msra.mxu2 %v1138_v20  ;;  %v1075_v18 = vld [vmem:[#allocation2 + $0xa8] sm:$0xff] }
  0x9b   : > { %1284 = vmatpush.msra.mxu1 %v1108_v19  ;;  %v1136_v24 = vld [vmem:[#allocation2 + $0x290] sm:$0xff]  ;;  %1265 = vmatpush.msra.mxu0 %v1074_v21  ;;  %v1134_v28 = vld [vmem:[#allocation2 + $0x280] sm:$0xff]  ;;  %v1109_v19 = vld [vmem:[#allocation2 + $0x1b8] sm:$0xff] }
  0x9c   : > { %v1072_v25 = vld [vmem:[#allocation2 + $0x90] sm:$0xff]  ;;  %1325 = vmatpush.msra.mxu3 %v1170_v22  ;;  %v1070_v29 = vld [vmem:[#allocation2 + $0x80] sm:$0xff]  ;;  %1306 = vmatpush.msra.mxu2 %v1136_v24  ;;  %v1073_v22 = vld [vmem:[#allocation2 + $0x98] sm:$0xff] }
  0x9d   : > { %v1168_v26 = vld [vmem:[#allocation2 + $0x390] sm:$0xff]  ;;  %1285 = vmatpush.msra.mxu1 %v1106_v23  ;;  %1266 = vmatpush.msra.mxu0 %v1072_v25  ;;  %v1166_v30 = vld [vmem:[#allocation2 + $0x380] sm:$0xff]  ;;  %v1107_v23 = vld [vmem:[#allocation2 + $0x1a8] sm:$0xff] }
  0x9e   : > { %v1104_v27 = vld [vmem:[#allocation2 + $0x190] sm:$0xff]  ;;  %v1102_v31 = vld [vmem:[#allocation2 + $0x180] sm:$0xff]  ;;  %1326 = vmatpush.msra.mxu3 %v1168_v26  ;;  %1307 = vmatpush.msra.mxu2 %v1134_v28  ;;  %v1071_v26 = vld [vmem:[#allocation2 + $0x88] sm:$0xff] }
  0x9f   : > { %1286 = vmatpush.msra.mxu1 %v1104_v27  ;;  %v1132_v32 = vld [vmem:[#allocation2 + $0x270] sm:$0xff]  ;;  %1267 = vmatpush.msra.mxu0 %v1070_v29  ;;  %v1130_v36 = vld [vmem:[#allocation2 + $0x260] sm:$0xff]  ;;  %v1105_v27 = vld [vmem:[#allocation2 + $0x198] sm:$0xff] }
  0xa0   : > { %v1068_v33 = vld [vmem:[#allocation2 + $0x70] sm:$0xff]  ;;  %1327 = vmatpush.msra.mxu3 %v1166_v30  ;;  %v1066_v37 = vld [vmem:[#allocation2 + $0x60] sm:$0xff]  ;;  %1308 = vmatpush.msra.mxu2 %v1132_v32  ;;  %v1069_v30 = vld [vmem:[#allocation2 + $0x78] sm:$0xff] }
  0xa1   : > { %v1164_v34 = vld [vmem:[#allocation2 + $0x370] sm:$0xff]  ;;  %1287 = vmatpush.msra.mxu1 %v1102_v31  ;;  %1268 = vmatpush.msra.mxu0 %v1068_v33  ;;  %v1162_v38 = vld [vmem:[#allocation2 + $0x360] sm:$0xff]  ;;  %v1103_v31 = vld [vmem:[#allocation2 + $0x188] sm:$0xff] }
  0xa2   : > { %v1100_v35 = vld [vmem:[#allocation2 + $0x170] sm:$0xff]  ;;  %v1098_v39 = vld [vmem:[#allocation2 + $0x160] sm:$0xff]  ;;  %1328 = vmatpush.msra.mxu3 %v1164_v34  ;;  %1309 = vmatpush.msra.mxu2 %v1130_v36  ;;  %v1067_v34 = vld [vmem:[#allocation2 + $0x68] sm:$0xff] }
  0xa3   : > { %1288 = vmatpush.msra.mxu1 %v1100_v35  ;;  %v1128_v40 = vld [vmem:[#allocation2 + $0x250] sm:$0xff]  ;;  %1269 = vmatpush.msra.mxu0 %v1066_v37  ;;  %v1126_v44 = vld [vmem:[#allocation2 + $0x240] sm:$0xff]  ;;  %v1101_v35 = vld [vmem:[#allocation2 + $0x178] sm:$0xff] }
  0xa4   : > { %v1064_v41 = vld [vmem:[#allocation2 + $0x50] sm:$0xff]  ;;  %1329 = vmatpush.msra.mxu3 %v1162_v38  ;;  %v1062_v45 = vld [vmem:[#allocation2 + $0x40] sm:$0xff]  ;;  %1310 = vmatpush.msra.mxu2 %v1128_v40  ;;  %v1065_v38 = vld [vmem:[#allocation2 + $0x58] sm:$0xff] }
  0xa5   : > { %v1160_v42 = vld [vmem:[#allocation2 + $0x350] sm:$0xff]  ;;  %1289 = vmatpush.msra.mxu1 %v1098_v39  ;;  %1270 = vmatpush.msra.mxu0 %v1064_v41  ;;  %v1158_v46 = vld [vmem:[#allocation2 + $0x340] sm:$0xff]  ;;  %v1099_v39 = vld [vmem:[#allocation2 + $0x168] sm:$0xff] }
  0xa6   : > { %v1096_v43 = vld [vmem:[#allocation2 + $0x150] sm:$0xff]  ;;  %v1094_v47 = vld [vmem:[#allocation2 + $0x140] sm:$0xff]  ;;  %1330 = vmatpush.msra.mxu3 %v1160_v42  ;;  %1311 = vmatpush.msra.mxu2 %v1126_v44  ;;  %v1063_v42 = vld [vmem:[#allocation2 + $0x48] sm:$0xff] }
  0xa7   : > { %1290 = vmatpush.msra.mxu1 %v1096_v43  ;;  %v1124_v48 = vld [vmem:[#allocation2 + $0x230] sm:$0xff]  ;;  %1271 = vmatpush.msra.mxu0 %v1062_v45  ;;  %v1122_v52 = vld [vmem:[#allocation2 + $0x220] sm:$0xff]  ;;  %v1097_v43 = vld [vmem:[#allocation2 + $0x158] sm:$0xff] }
  0xa8   : > { %v1060_v49 = vld [vmem:[#allocation2 + $0x30] sm:$0xff]  ;;  %1331 = vmatpush.msra.mxu3 %v1158_v46  ;;  %v1058_v53 = vld [vmem:[#allocation2 + $0x20] sm:$0xff]  ;;  %1312 = vmatpush.msra.mxu2 %v1124_v48  ;;  %v1061_v46 = vld [vmem:[#allocation2 + $0x38] sm:$0xff] }
  0xa9   : > { %v1156_v50 = vld [vmem:[#allocation2 + $0x330] sm:$0xff]  ;;  %1291 = vmatpush.msra.mxu1 %v1094_v47  ;;  %1272 = vmatpush.msra.mxu0 %v1060_v49  ;;  %v1154_v54 = vld [vmem:[#allocation2 + $0x320] sm:$0xff]  ;;  %v1095_v47 = vld [vmem:[#allocation2 + $0x148] sm:$0xff] }
  0xaa   : > { %v1092_v51 = vld [vmem:[#allocation2 + $0x130] sm:$0xff]  ;;  %v1090_v55 = vld [vmem:[#allocation2 + $0x120] sm:$0xff]  ;;  %1332 = vmatpush.msra.mxu3 %v1156_v50  ;;  %1313 = vmatpush.msra.mxu2 %v1122_v52  ;;  %v1059_v50 = vld [vmem:[#allocation2 + $0x28] sm:$0xff] }
  0xab   : > { %1292 = vmatpush.msra.mxu1 %v1092_v51  ;;  %v1120_v56 = vld [vmem:[#allocation2 + $0x210] sm:$0xff]  ;;  %1273 = vmatpush.msra.mxu0 %v1058_v53  ;;  %v1118_v60 = vld [vmem:[#allocation2 + $0x200] sm:$0xff]  ;;  %v1093_v51 = vld [vmem:[#allocation2 + $0x138] sm:$0xff] }
  0xac   : > { %v1056_v57 = vld [vmem:[#allocation2 + $0x10] sm:$0xff]  ;;  %1333 = vmatpush.msra.mxu3 %v1154_v54  ;;  %v1054_v61 = vld [vmem:[#allocation2] sm:$0xff]  ;;  %1314 = vmatpush.msra.mxu2 %v1120_v56  ;;  %v1057_v54 = vld [vmem:[#allocation2 + $0x18] sm:$0xff] }
  0xad   : > { %v1152_v58 = vld [vmem:[#allocation2 + $0x310] sm:$0xff]  ;;  %1293 = vmatpush.msra.mxu1 %v1090_v55  ;;  %1274 = vmatpush.msra.mxu0 %v1056_v57  ;;  %v1150_v63 = vld [vmem:[#allocation2 + $0x300] sm:$0xff]  ;;  %v1091_v55 = vld [vmem:[#allocation2 + $0x128] sm:$0xff] }
  0xae   : > { %v1088_v59 = vld [vmem:[#allocation2 + $0x110] sm:$0xff]  ;;  %1334 = vmatpush.msra.mxu3 %v1152_v58  ;;  %1315 = vmatpush.msra.mxu2 %v1118_v60  ;;  %v1086_v3 = vld [vmem:[#allocation2 + $0x100] sm:$0xff]  ;;  %v1055_v58 = vld [vmem:[#allocation2 + $0x8] sm:$0xff] }
  0xaf   : > { %1294 = vmatpush.msra.mxu1 %v1088_v59  ;;  %v1212_v0 = vld [vmem:[#allocation2 + $0x4f0] sm:$0xff]  ;;  %1275 = vmatpush.msra.mxu0 %v1054_v61  ;;  %v1210_v4 = vld [vmem:[#allocation2 + $0x4e0] sm:$0xff]  ;;  %v1089_v59 = vld [vmem:[#allocation2 + $0x118] sm:$0xff] }
  0xb0   : > { %1380 = vmatpush.msrb.mxu2 %v1085_v62  ;;  %1335 = vmatpush.msra.mxu3 %v1150_v63  ;;  %v1244_v5 = vld [vmem:[#allocation2 + $0x5f0] sm:$0xff]  ;;  %v1242_v9 = vld [vmem:[#allocation2 + $0x5e0] sm:$0xff]  ;;  %v1213_v62 = vld [vmem:[#allocation2 + $0x4f8] sm:$0xff] }
  0xb1   : > { %1340 = vmatpush.msrb.mxu0 %v1212_v0  ;;  %1295 = vmatpush.msra.mxu1 %v1086_v3  ;;  %v1208_v8 = vld [vmem:[#allocation2 + $0x4d0] sm:$0xff]  ;;  %v1206_v12 = vld [vmem:[#allocation2 + $0x4c0] sm:$0xff]  ;;  %v1087_v0 = vld [vmem:[#allocation2 + $0x108] sm:$0xff] }
  0xb2   : > { %1400 = vmatpush.msrb.mxu3 %v1117_v1  ;;  %1381 = vmatpush.msrb.mxu2 %v1083_v2  ;;  %v1240_v13 = vld [vmem:[#allocation2 + $0x5d0] sm:$0xff]  ;;  %v1238_v17 = vld [vmem:[#allocation2 + $0x5c0] sm:$0xff]  ;;  %v5019_v2 = vld [vmem:[%s4978_s17 + $0x18] sm:$0xff] }
  0xb3   : > { %1341 = vmatpush.msrb.mxu0 %v1210_v4  ;;  %1360 = vmatpush.msrb.mxu1 %v1244_v5  ;;  %v1204_v16 = vld [vmem:[#allocation2 + $0x4b0] sm:$0xff]  ;;  %v1202_v20 = vld [vmem:[#allocation2 + $0x4a0] sm:$0xff]  ;;  %v1149_v3 = vld [vmem:[#allocation2 + $0x2f8] sm:$0xff] }
  0xb4   : > { %1382 = vmatpush.msrb.mxu2 %v1081_v6  ;;  %1401 = vmatpush.msrb.mxu3 %v1115_v7  ;;  %v1236_v21 = vld [vmem:[#allocation2 + $0x5b0] sm:$0xff]  ;;  %v1234_v25 = vld [vmem:[#allocation2 + $0x5a0] sm:$0xff]  ;;  %v1211_v4 = vld [vmem:[#allocation2 + $0x4e8] sm:$0xff] }
  0xb5   : > { %1342 = vmatpush.msrb.mxu0 %v1208_v8  ;;  %1361 = vmatpush.msrb.mxu1 %v1242_v9  ;;  %v1200_v24 = vld [vmem:[#allocation2 + $0x490] sm:$0xff]  ;;  %v1198_v28 = vld [vmem:[#allocation2 + $0x480] sm:$0xff]  ;;  %v1245_v5 = vld [vmem:[#allocation2 + $0x5f8] sm:$0xff] }
  0xb6   : > { %1383 = vmatpush.msrb.mxu2 %v1079_v10  ;;  %1402 = vmatpush.msrb.mxu3 %v1113_v11  ;;  %v1232_v29 = vld [vmem:[#allocation2 + $0x590] sm:$0xff]  ;;  %v1230_v33 = vld [vmem:[#allocation2 + $0x580] sm:$0xff]  ;;  %v1147_v7 = vld [vmem:[#allocation2 + $0x2e8] sm:$0xff] }
  0xb7   : > { %1343 = vmatpush.msrb.mxu0 %v1206_v12  ;;  %1362 = vmatpush.msrb.mxu1 %v1240_v13  ;;  %v1196_v32 = vld [vmem:[#allocation2 + $0x470] sm:$0xff]  ;;  %v1194_v36 = vld [vmem:[#allocation2 + $0x460] sm:$0xff]  ;;  %v5024_v8 = vld [vmem:[%s4978_s17 + $0x8] sm:$0xff] }
  0xb8   : > { %1384 = vmatpush.msrb.mxu2 %v1077_v14  ;;  %1403 = vmatpush.msrb.mxu3 %v1111_v15  ;;  %v1228_v37 = vld [vmem:[#allocation2 + $0x570] sm:$0xff]  ;;  %v1226_v41 = vld [vmem:[#allocation2 + $0x560] sm:$0xff]  ;;  %v1209_v9 = vld [vmem:[#allocation2 + $0x4d8] sm:$0xff] }
  0xb9   : > { %1344 = vmatpush.msrb.mxu0 %v1204_v16  ;;  %1363 = vmatpush.msrb.mxu1 %v1238_v17  ;;  %v1192_v40 = vld [vmem:[#allocation2 + $0x450] sm:$0xff]  ;;  %v1190_v44 = vld [vmem:[#allocation2 + $0x440] sm:$0xff]  ;;  %v1181_v10 = vld [vmem:[#allocation2 + $0x3f8] sm:$0xff] }
  0xba   : > { %1385 = vmatpush.msrb.mxu2 %v1075_v18  ;;  %1404 = vmatpush.msrb.mxu3 %v1109_v19  ;;  %v1224_v45 = vld [vmem:[#allocation2 + $0x550] sm:$0xff]  ;;  %v1222_v49 = vld [vmem:[#allocation2 + $0x540] sm:$0xff]  ;;  %v1243_v11 = vld [vmem:[#allocation2 + $0x5e8] sm:$0xff] }
  0xbb   : > { %1345 = vmatpush.msrb.mxu0 %v1202_v20  ;;  %1364 = vmatpush.msrb.mxu1 %v1236_v21  ;;  %v1188_v48 = vld [vmem:[#allocation2 + $0x430] sm:$0xff]  ;;  %v1186_v52 = vld [vmem:[#allocation2 + $0x420] sm:$0xff]  ;;  %v1145_v12 = vld [vmem:[#allocation2 + $0x2d8] sm:$0xff] }
  0xbc   : > { %1386 = vmatpush.msrb.mxu2 %v1073_v22  ;;  %1405 = vmatpush.msrb.mxu3 %v1107_v23  ;;  %v1220_v53 = vld [vmem:[#allocation2 + $0x530] sm:$0xff]  ;;  %v1218_v57 = vld [vmem:[#allocation2 + $0x520] sm:$0xff]  ;;  %v1207_v13 = vld [vmem:[#allocation2 + $0x4c8] sm:$0xff] }
  0xbd   : > { %1346 = vmatpush.msrb.mxu0 %v1200_v24  ;;  %1365 = vmatpush.msrb.mxu1 %v1234_v25  ;;  %v1184_v56 = vld [vmem:[#allocation2 + $0x410] sm:$0xff]  ;;  %v1182_v61 = vld [vmem:[#allocation2 + $0x400] sm:$0xff]  ;;  %v1179_v14 = vld [vmem:[#allocation2 + $0x3e8] sm:$0xff] }
  0xbe   : > { %1387 = vmatpush.msrb.mxu2 %v1071_v26  ;;  %1406 = vmatpush.msrb.mxu3 %v1105_v27  ;;  %v5012_v60 = vld [vmem:[%s4978_s17 + $0x10] sm:$0xff]  ;;  %v5015_v1 = vld [vmem:[%s4978_s17] sm:$0xff]  ;;  %v1241_v15 = vld [vmem:[#allocation2 + $0x5d8] sm:$0xff] }
  0xbf   : > { %1347 = vmatpush.msrb.mxu0 %v1198_v28  ;;  %1366 = vmatpush.msrb.mxu1 %v1232_v29  ;;  %v1216_v63 = vld [vmem:[#allocation2 + $0x510] sm:$0xff]  ;;  %v1214_v6 = vld [vmem:[#allocation2 + $0x500] sm:$0xff]  ;;  %v1143_v16 = vld [vmem:[#allocation2 + $0x2c8] sm:$0xff] }
  0xc0   : > { %1388 = vmatpush.msrb.mxu2 %v1069_v30  ;;  %1407 = vmatpush.msrb.mxu3 %v1103_v31  ;;  %v1205_v17 = vld [vmem:[#allocation2 + $0x4b8] sm:$0xff]  ;;  %v1239_v19 = vld [vmem:[#allocation2 + $0x5c8] sm:$0xff]  ;;  %v5028_v20 = vld [vmem:[%s4978_s17 + $0x20] sm:$0xff] }
  0xc1   : > { %1348 = vmatpush.msrb.mxu0 %v1196_v32  ;;  %1367 = vmatpush.msrb.mxu1 %v1230_v33  ;;  %v1177_v18 = vld [vmem:[#allocation2 + $0x3d8] sm:$0xff]  ;;  %v1203_v21 = vld [vmem:[#allocation2 + $0x4a8] sm:$0xff] }
  0xc2   : > { %1389 = vmatpush.msrb.mxu2 %v1067_v34  ;;  %1408 = vmatpush.msrb.mxu3 %v1101_v35  ;;  %v1141_v22 = vld [vmem:[#allocation2 + $0x2b8] sm:$0xff]  ;;  %v1175_v23 = vld [vmem:[#allocation2 + $0x3c8] sm:$0xff] }
  0xc3   : > { %1349 = vmatpush.msrb.mxu0 %v1194_v36  ;;  %1368 = vmatpush.msrb.mxu1 %v1228_v37  ;;  %v1237_v24 = vld [vmem:[#allocation2 + $0x5b8] sm:$0xff]  ;;  %v5031_v25 = vld [vmem:[%s4978_s17 + $0x28] sm:$0xff] }
  0xc4   : > { %1390 = vmatpush.msrb.mxu2 %v1065_v38  ;;  %1409 = vmatpush.msrb.mxu3 %v1099_v39  ;;  %v1139_v26 = vld [vmem:[#allocation2 + $0x2a8] sm:$0xff]  ;;  %v1173_v27 = vld [vmem:[#allocation2 + $0x3b8] sm:$0xff] }
  0xc5   : > { %1350 = vmatpush.msrb.mxu0 %v1192_v40  ;;  %1369 = vmatpush.msrb.mxu1 %v1226_v41  ;;  %v1201_v28 = vld [vmem:[#allocation2 + $0x498] sm:$0xff]  ;;  %v1235_v29 = vld [vmem:[#allocation2 + $0x5a8] sm:$0xff] }
  0xc6   : > { %1391 = vmatpush.msrb.mxu2 %v1063_v42  ;;  %1410 = vmatpush.msrb.mxu3 %v1097_v43  ;;  %v1137_v30 = vld [vmem:[#allocation2 + $0x298] sm:$0xff]  ;;  %v1171_v31 = vld [vmem:[#allocation2 + $0x3a8] sm:$0xff] }
  0xc7   : > { %1351 = vmatpush.msrb.mxu0 %v1190_v44  ;;  %1370 = vmatpush.msrb.mxu1 %v1224_v45  ;;  %v1199_v32 = vld [vmem:[#allocation2 + $0x488] sm:$0xff]  ;;  %v1233_v33 = vld [vmem:[#allocation2 + $0x598] sm:$0xff] }
  0xc8   : > { %1392 = vmatpush.msrb.mxu2 %v1061_v46  ;;  %1411 = vmatpush.msrb.mxu3 %v1095_v47  ;;  %v1135_v34 = vld [vmem:[#allocation2 + $0x288] sm:$0xff]  ;;  %v1169_v35 = vld [vmem:[#allocation2 + $0x398] sm:$0xff] }
  0xc9   : > { %1352 = vmatpush.msrb.mxu0 %v1188_v48  ;;  %1371 = vmatpush.msrb.mxu1 %v1222_v49  ;;  %v1197_v36 = vld [vmem:[#allocation2 + $0x478] sm:$0xff]  ;;  %v1231_v37 = vld [vmem:[#allocation2 + $0x588] sm:$0xff] }
  0xca   : > { %1393 = vmatpush.msrb.mxu2 %v1059_v50  ;;  %1412 = vmatpush.msrb.mxu3 %v1093_v51  ;;  %v1133_v38 = vld [vmem:[#allocation2 + $0x278] sm:$0xff]  ;;  %v1167_v39 = vld [vmem:[#allocation2 + $0x388] sm:$0xff] }
  0xcb   : > { %1353 = vmatpush.msrb.mxu0 %v1186_v52  ;;  %1372 = vmatpush.msrb.mxu1 %v1220_v53  ;;  %v1195_v40 = vld [vmem:[#allocation2 + $0x468] sm:$0xff]  ;;  %v1229_v41 = vld [vmem:[#allocation2 + $0x578] sm:$0xff] }
  0xcc   : > { %1394 = vmatpush.msrb.mxu2 %v1057_v54  ;;  %1413 = vmatpush.msrb.mxu3 %v1091_v55  ;;  %v1131_v42 = vld [vmem:[#allocation2 + $0x268] sm:$0xff]  ;;  %v1165_v43 = vld [vmem:[#allocation2 + $0x378] sm:$0xff] }
  0xcd   : > { %1354 = vmatpush.msrb.mxu0 %v1184_v56  ;;  %1373 = vmatpush.msrb.mxu1 %v1218_v57  ;;  %v1193_v44 = vld [vmem:[#allocation2 + $0x458] sm:$0xff]  ;;  %v1227_v45 = vld [vmem:[#allocation2 + $0x568] sm:$0xff] }
  0xce   : > { %1395 = vmatpush.msrb.mxu2 %v1055_v58  ;;  %1414 = vmatpush.msrb.mxu3 %v1089_v59  ;;  %v1129_v46 = vld [vmem:[#allocation2 + $0x258] sm:$0xff]  ;;  %v1163_v47 = vld [vmem:[#allocation2 + $0x368] sm:$0xff] }
  0xcf   : > { %1316 = vmatmul.f32.vlgmr.msra.gmra.mxu2 %v5012_v60  ;;  %1355 = vmatpush.msrb.mxu0 %v1182_v61  ;;  %v1191_v48 = vld [vmem:[#allocation2 + $0x448] sm:$0xff]  ;;  %v1225_v49 = vld [vmem:[#allocation2 + $0x558] sm:$0xff] }
  0xd0   : > { %1460 = vmatpush.msra.mxu2 %v1213_v62  ;;  %1374 = vmatpush.msrb.mxu1 %v1216_v63  ;;  %v1127_v50 = vld [vmem:[#allocation2 + $0x248] sm:$0xff]  ;;  %v1161_v51 = vld [vmem:[#allocation2 + $0x358] sm:$0xff] }
  0xd1   : > { %1415 = vmatpush.msrb.mxu3 %v1087_v0  ;;  %1276 = vmatmul.f32.vlgmr.msra.gmra.mxu0 %v5015_v1  ;;  %v1189_v52 = vld [vmem:[#allocation2 + $0x438] sm:$0xff]  ;;  %v1223_v53 = vld [vmem:[#allocation2 + $0x548] sm:$0xff] }
  0xd2   : > { %1336 = vmatmul.f32.vlgmr.msra.gmra.mxu3 %v5019_v2  ;;  %1420 = vmatpush.msra.mxu0 %v1149_v3  ;;  %v1125_v54 = vld [vmem:[#allocation2 + $0x238] sm:$0xff]  ;;  %v1159_v55 = vld [vmem:[#allocation2 + $0x348] sm:$0xff] }
  0xd3   : > { %1461 = vmatpush.msra.mxu2 %v1211_v4  ;;  %1480 = vmatpush.msra.mxu3 %v1245_v5  ;;  %v1187_v56 = vld [vmem:[#allocation2 + $0x428] sm:$0xff]  ;;  %v1221_v57 = vld [vmem:[#allocation2 + $0x538] sm:$0xff] }
  0xd4   : > { %1375 = vmatpush.msrb.mxu1 %v1214_v6  ;;  %1421 = vmatpush.msra.mxu0 %v1147_v7  ;;  %v1123_v58 = vld [vmem:[#allocation2 + $0x228] sm:$0xff]  ;;  %v1157_v59 = vld [vmem:[#allocation2 + $0x338] sm:$0xff] }
  0xd5   : > { %1296 = vmatmul.f32.vlgmr.msra.gmra.mxu1 %v5024_v8  ;;  %1462 = vmatpush.msra.mxu2 %v1209_v9  ;;  %v1185_v61 = vld [vmem:[#allocation2 + $0x418] sm:$0xff]  ;;  %v1219_v62 = vld [vmem:[#allocation2 + $0x528] sm:$0xff] }
  0xd6   : > { %1440 = vmatpush.msra.mxu1 %v1181_v10  ;;  %1481 = vmatpush.msra.mxu3 %v1243_v11  ;;  %v1121_v63 = vld [vmem:[#allocation2 + $0x218] sm:$0xff]  ;;  %v1155_v0 = vld [vmem:[#allocation2 + $0x328] sm:$0xff] }
  0xd7   : > { %1422 = vmatpush.msra.mxu0 %v1145_v12  ;;  %1463 = vmatpush.msra.mxu2 %v1207_v13  ;;  %v1217_v3 = vld [vmem:[#allocation2 + $0x518] sm:$0xff]  ;;  %v1119_v4 = vld [vmem:[#allocation2 + $0x208] sm:$0xff]  ;;  %v1250_v12 = vlaneseq }
  0xd8   : > { %1441 = vmatpush.msra.mxu1 %v1179_v14  ;;  %1482 = vmatpush.msra.mxu3 %v1241_v15  ;;  %v1153_v5 = vld [vmem:[#allocation2 + $0x318] sm:$0xff]  ;;  %v1215_v6 = vld [vmem:[#allocation2 + $0x508] sm:$0xff] }
  0xd9   : > { %1423 = vmatpush.msra.mxu0 %v1143_v16  ;;  %1464 = vmatpush.msra.mxu2 %v1205_v17  ;;  %v1151_v7 = vld [vmem:[#allocation2 + $0x308] sm:$0xff]  ;;  %v1251_v16 = vshrl.u32 %v1250_v12, 7 }
  0xda   : > { %1442 = vmatpush.msra.mxu1 %v1177_v18  ;;  %1483 = vmatpush.msra.mxu3 %v1239_v19 }
  0xdb   : > { %1356 = vmatmul.f32.vlgmr.msrb.gmra.mxu0 %v5028_v20  ;;  %1465 = vmatpush.msra.mxu2 %v1203_v21  ;;  %vm1252_vm0 = vcmp.ge.s32.totalorder %v1251_v16, 1  ;;  %vm1253_vm1 = vcmp.le.s32.totalorder %v1251_v16, 4  ;;  %vm1502_vm3 = vcmp.eq.s32.totalorder %v1251_v16, 0 }
  0xdc   : > { %1424 = vmatpush.msra.mxu0 %v1141_v22  ;;  %1443 = vmatpush.msra.mxu1 %v1175_v23  ;;  %vm5041_vm2 = vmand %vm1252_vm0, %vm1253_vm1 }
  0xdd   : > { %1484 = vmatpush.msra.mxu3 %v1237_v24  ;;  %1376 = vmatmul.f32.vlgmr.msrb.gmra.mxu1 %v5031_v25 }
  0xde   : > { %1425 = vmatpush.msra.mxu0 %v1139_v26  ;;  %1444 = vmatpush.msra.mxu1 %v1173_v27 }
  0xdf   : > { %1466 = vmatpush.msra.mxu2 %v1201_v28  ;;  %1485 = vmatpush.msra.mxu3 %v1235_v29 }
  0xe0   : > { %1426 = vmatpush.msra.mxu0 %v1137_v30  ;;  %1445 = vmatpush.msra.mxu1 %v1171_v31 }
  0xe1   : > { %1467 = vmatpush.msra.mxu2 %v1199_v32  ;;  %1486 = vmatpush.msra.mxu3 %v1233_v33 }
  0xe2   : > { %1427 = vmatpush.msra.mxu0 %v1135_v34  ;;  %1446 = vmatpush.msra.mxu1 %v1169_v35 }
  0xe3   : > { %1468 = vmatpush.msra.mxu2 %v1197_v36  ;;  %1487 = vmatpush.msra.mxu3 %v1231_v37 }
  0xe4   : > { %1428 = vmatpush.msra.mxu0 %v1133_v38  ;;  %1447 = vmatpush.msra.mxu1 %v1167_v39 }
  0xe5   : > { %1469 = vmatpush.msra.mxu2 %v1195_v40  ;;  %1488 = vmatpush.msra.mxu3 %v1229_v41 }
  0xe6   : > { %1429 = vmatpush.msra.mxu0 %v1131_v42  ;;  %1448 = vmatpush.msra.mxu1 %v1165_v43  ;;  %v1249_v43 = vld [vmem:[#allocation7 + $0x8] sm:$0xff] }
  0xe7   : > { %1470 = vmatpush.msra.mxu2 %v1193_v44  ;;  %1489 = vmatpush.msra.mxu3 %v1227_v45 }
  0xe8   : > { %1430 = vmatpush.msra.mxu0 %v1129_v46  ;;  %1449 = vmatpush.msra.mxu1 %v1163_v47 }
  0xe9   : > { %1471 = vmatpush.msra.mxu2 %v1191_v48  ;;  %1490 = vmatpush.msra.mxu3 %v1225_v49 }
  0xea   : > { %1396 = vmatmul.f32.vlgmr.msrb.gmra.mxu2 %v5015_v1  ;;  %1431 = vmatpush.msra.mxu0 %v1127_v50  ;;  %v1183_v1 = vld [vmem:[#allocation2 + $0x408] sm:$0xff] }
  0xeb   : > { %1450 = vmatpush.msra.mxu1 %v1161_v51  ;;  %1472 = vmatpush.msra.mxu2 %v1189_v52 }
  0xec   : > { %1491 = vmatpush.msra.mxu3 %v1223_v53  ;;  %1432 = vmatpush.msra.mxu0 %v1125_v54 }
  0xed   : > { %1416 = vmatmul.f32.vlgmr.msrb.gmra.mxu3 %v5024_v8  ;;  %1451 = vmatpush.msra.mxu1 %v1159_v55  ;;  %v1246_v8 = vld [vmem:[#allocation4] sm:$0x3] }
  0xee   : > { %1473 = vmatpush.msra.mxu2 %v1187_v56  ;;  %1492 = vmatpush.msra.mxu3 %v1221_v57  ;;  %v1256_v9 = vperm.slane %v1246_v8, 0  ;;  %v1257_v29 = vperm.slane %v1246_v8, 1 }
  0xef   : > { %1433 = vmatpush.msra.mxu0 %v1123_v58  ;;  %1452 = vmatpush.msra.mxu1 %v1157_v59 }
  0xf0   : > { %1474 = vmatpush.msra.mxu2 %v1185_v61  ;;  %1493 = vmatpush.msra.mxu3 %v1219_v62 }
  0xf1   : > { %1434 = vmatpush.msra.mxu0 %v1121_v63  ;;  %1453 = vmatpush.msra.mxu1 %v1155_v0 }
  0xf2   : > { %1475 = vmatpush.msra.mxu2 %v1183_v1  ;;  %1494 = vmatpush.msra.mxu3 %v1217_v3 }
  0xf3   : > { %1476 = vmatmul.f32.vlgmr.msra.gmra.mxu2 %v5028_v20  ;;  %1435 = vmatpush.msra.mxu0 %v1119_v4  ;;  %v1247_v20 = vld [vmem:[#allocation6] sm:$0x3] }
  0xf4   : > { %1454 = vmatpush.msra.mxu1 %v1153_v5  ;;  %1495 = vmatpush.msra.mxu3 %v1215_v6  ;;  %v1504_v23 = vperm.slane %v1247_v20, 0  ;;  %v1505_v41 = vperm.slane %v1247_v20, 1 }
  0xf5   : > { %1436 = vmatmul.f32.vlgmr.msra.gmra.mxu0 %v5012_v60  ;;  %1496 = vmatmul.f32.vlgmr.msra.gmra.mxu3 %v5031_v25  ;;  %v1248_v25 = vld [vmem:[#allocation7] sm:$0xff] }
  0xf6   : > { %1455 = vmatpush.msra.mxu1 %v1151_v7 }
  0xf7   : > { %1456 = vmatmul.f32.vlgmr.msra.gmra.mxu1 %v5019_v2 }
 0x14e   : > { %v1277_v10 = vpop.f32.mrf.mxu0 }
 0x14f   : > { %v1278_v11 = vadd.f32 %v1277_v10, %v1256_v9 }
 0x152   : > { %v1297_v13 = vpop.f32.mrf.mxu1  ;;  %v1317_v14 = vpop.f32.mrf.mxu2 }
 0x153   : > { %v1298_v15 = vadd.f32 %v1297_v13, %v1278_v11 }
 0x155   : > { %v1318_v17 = vadd.f32 %v1317_v14, %v1298_v15  ;;  %v1337_v18 = vpop.f32.mrf.mxu3 }
 0x157   : > { %v1338_v19 = vadd.f32 %v1337_v18, %v1318_v17 }
 0x158   : > { %v1357_v60 = vpop.f32.mrf.mxu0 }
 0x159   : > { %v1358_v21 = vadd.f32 %v1357_v60, %v1338_v19 }
 0x15a   : > { %v1377_v22 = vpop.f32.mrf.mxu1 }
 0x15b   : > { %v1378_v24 = vadd.f32 %v1377_v22, %v1358_v21 }
 0x15d   : > { %v1500_v26 = vsel %vm5041_vm2, %v1378_v24, 0.0 }
 0x15e   : > { %v1508_v27 = vsel %vm1502_vm3, %v1504_v23, %v1500_v26 }
 0x15f   : > { %v1510_v28 = vadd.f32 %v1508_v27, %v1248_v25 }
 0x161   : > { %1512 = vst [vmem:[%s4973_s11] sm:$0xff] %v1510_v28 }
 0x16d   : > { %v1397_v30 = vpop.f32.mrf.mxu2 }
 0x16e   : > { %v1398_v31 = vadd.f32 %v1397_v30, %v1257_v29 }
 0x170   : > { %v1417_v32 = vpop.f32.mrf.mxu3 }
 0x171   : > { %v1418_v33 = vadd.f32 %v1417_v32, %v1398_v31 }
 0x172   : > { %v1437_v34 = vpop.f32.mrf.mxu0 }
 0x173   : > { %v1438_v35 = vadd.f32 %v1437_v34, %v1418_v33 }
 0x174   : > { %v1457_v36 = vpop.f32.mrf.mxu1 }
 0x175   : > { %v1458_v37 = vadd.f32 %v1457_v36, %v1438_v35 }
 0x176   : > { %v1477_v38 = vpop.f32.mrf.mxu2 }
 0x177   : > { %v1478_v39 = vadd.f32 %v1477_v38, %v1458_v37 }
 0x178   : > { %v1497_v40 = vpop.f32.mrf.mxu3 }
 0x179   : > { %v1498_v42 = vadd.f32 %v1497_v40, %v1478_v39 }
 0x17b   : > { %v1501_v44 = vsel %vm5041_vm2, %v1498_v42, 0.0 }
 0x17c   : > { %v1509_v45 = vsel %vm1502_vm3, %v1505_v41, %v1501_v44 }
 0x17d   : > { %v1511_v46 = vadd.f32 %v1509_v45, %v1249_v43 }
 0x17f   : > { %1513 = vst [vmem:[%s4973_s11 + $0x8] sm:$0xff] %v1511_v46 }
 0x180 PF: > { %v5054_v47 = vld [vmem:[%s4973_s11] sm:$0xff]  ;;  %v4635_v50 = vmov 256.0   ;;  %v1609_v53 = vld [vmem:[%s4953_s26 + $0x2d8] sm:$0xff]  ;;  %v1602_v55 = vld [vmem:[%s4953_s26 + $0x2a0] sm:$0xff]  ;;  %vm2617_vm9 = vcmask 64512  }
 0x181   : > { %4151 = vrcp.f32 %v4635_v50  ;;  %v1608_v51 = vld [vmem:[%s4953_s26 + $0x2d0] sm:$0xff]  ;;  %v1705_v54 = vld [vmem:[%s4953_s26 + $0x5d8] sm:$0xff]  ;;  %v1698_v56 = vld [vmem:[%s4953_s26 + $0x5a0] sm:$0xff]  ;;  %2391 = vmatpush.msra.mxu2 %v1609_v53 }
 0x182   : > { %v1704_v52 = vld [vmem:[%s4953_s26 + $0x5d0] sm:$0xff]  ;;  %2351 = vmatpush.msra.mxu0 %v1608_v51  ;;  %2411 = vmatpush.msra.mxu3 %v1705_v54  ;;  %v1603_v58 = vld [vmem:[%s4953_s26 + $0x2a8] sm:$0xff]  ;;  %v1597_v63 = vld [vmem:[%s4953_s26 + $0x278] sm:$0xff] }
 0x183   : > { %2371 = vmatpush.msra.mxu1 %v1704_v52  ;;  %v1699_v59 = vld [vmem:[%s4953_s26 + $0x5a8] sm:$0xff]  ;;  %v1596_v61 = vld [vmem:[%s4953_s26 + $0x270] sm:$0xff]  ;;  %v1693_v0 = vld [vmem:[%s4953_s26 + $0x578] sm:$0xff]  ;;  %2392 = vmatpush.msra.mxu2 %v1603_v58 }
 0x184   : > { %2352 = vmatpush.msra.mxu0 %v1602_v55  ;;  %v1692_v62 = vld [vmem:[%s4953_s26 + $0x570] sm:$0xff]  ;;  %2412 = vmatpush.msra.mxu3 %v1699_v59  ;;  %v1590_v1 = vld [vmem:[%s4953_s26 + $0x240] sm:$0xff]  ;;  %v1591_v5 = vld [vmem:[%s4953_s26 + $0x248] sm:$0xff] }
 0x185   : > { %2372 = vmatpush.msra.mxu1 %v1698_v56  ;;  %v1686_v3 = vld [vmem:[%s4953_s26 + $0x540] sm:$0xff]  ;;  %v1687_v6 = vld [vmem:[%s4953_s26 + $0x548] sm:$0xff]  ;;  %2393 = vmatpush.msra.mxu2 %v1597_v63  ;;  %v1584_v7 = vld [vmem:[%s4953_s26 + $0x210] sm:$0xff] }
 0x186   : > { %v5057_v48 = vld [vmem:[%s4973_s11 + $0x8] sm:$0xff]  ;;  %2353 = vmatpush.msra.mxu0 %v1596_v61  ;;  %2413 = vmatpush.msra.mxu3 %v1693_v0  ;;  %v1578_v11 = vld [vmem:[%s4953_s26 + $0x1e0] sm:$0xff]  ;;  %v1579_v14 = vld [vmem:[%s4953_s26 + $0x1e8] sm:$0xff] }
 0x187   : > { %v2292_v49 = vadd.f32 %v5057_v48, %v5054_v47  ;;  %v5067_v57 = vpop.eup %4151  ;;  %2373 = vmatpush.msra.mxu1 %v1692_v62  ;;  %v1680_v8 = vld [vmem:[%s4953_s26 + $0x510] sm:$0xff]  ;;  %v1585_v9 = vld [vmem:[%s4953_s26 + $0x218] sm:$0xff]  ;;  %2394 = vmatpush.msra.mxu2 %v1591_v5  ;;  %v1674_v12 = vld [vmem:[%s4953_s26 + $0x4e0] sm:$0xff] }
 0x188   : > { %v2296_v4 = vmul.f32 256.0, %v5067_v57  ;;  %2354 = vmatpush.msra.mxu0 %v1590_v1  ;;  %v1681_v10 = vld [vmem:[%s4953_s26 + $0x518] sm:$0xff]  ;;  %2414 = vmatpush.msra.mxu3 %v1687_v6  ;;  %v1675_v15 = vld [vmem:[%s4953_s26 + $0x4e8] sm:$0xff]  ;;  %v1572_v16 = vld [vmem:[%s4953_s26 + $0x1b0] sm:$0xff]  ;;  %vm2300_vm4 = vweird.f32 %v5067_v57 }
 0x189   : > { %2293 = vadd.xlane.f32.xlu0 %v2292_v49  ;;  %2374 = vmatpush.msra.mxu1 %v1686_v3  ;;  %v1668_v17 = vld [vmem:[%s4953_s26 + $0x4b0] sm:$0xff]  ;;  %v1573_v18 = vld [vmem:[%s4953_s26 + $0x1b8] sm:$0xff]  ;;  %v1566_v20 = vld [vmem:[%s4953_s26 + $0x180] sm:$0xff] }
 0x18a   : > { %v2297_v13 = vsub.f32 1.0, %v2296_v4  ;;  %2355 = vmatpush.msra.mxu0 %v1584_v7  ;;  %2395 = vmatpush.msra.mxu2 %v1585_v9  ;;  %v1669_v19 = vld [vmem:[%s4953_s26 + $0x4b8] sm:$0xff]  ;;  %v1662_v60 = vld [vmem:[%s4953_s26 + $0x480] sm:$0xff]  ;;  %v1567_v2 = vld [vmem:[%s4953_s26 + $0x188] sm:$0xff] }
 0x18b   : > { %2375 = vmatpush.msra.mxu1 %v1680_v8  ;;  %2415 = vmatpush.msra.mxu3 %v1681_v10  ;;  %v1663_v22 = vld [vmem:[%s4953_s26 + $0x488] sm:$0xff]  ;;  %v1560_v23 = vld [vmem:[%s4953_s26 + $0x150] sm:$0xff]  ;;  %v1561_v25 = vld [vmem:[%s4953_s26 + $0x158] sm:$0xff] }
 0x18c   : > { %2356 = vmatpush.msra.mxu0 %v1578_v11  ;;  %2396 = vmatpush.msra.mxu2 %v1579_v14  ;;  %v2298_v21 = vmul.f32 %v5067_v57, %v2297_v13  ;;  %v1656_v24 = vld [vmem:[%s4953_s26 + $0x450] sm:$0xff]  ;;  %v1657_v26 = vld [vmem:[%s4953_s26 + $0x458] sm:$0xff]  ;;  %v1554_v27 = vld [vmem:[%s4953_s26 + $0x120] sm:$0xff] }
 0x18d   : > { %2376 = vmatpush.msra.mxu1 %v1674_v12  ;;  %2416 = vmatpush.msra.mxu3 %v1675_v15  ;;  %v1650_v28 = vld [vmem:[%s4953_s26 + $0x420] sm:$0xff]  ;;  %v1555_v30 = vld [vmem:[%s4953_s26 + $0x128] sm:$0xff]  ;;  %v1548_v32 = vld [vmem:[%s4953_s26 + $0xf0] sm:$0xff] }
 0x18e   : > { %2357 = vmatpush.msra.mxu0 %v1572_v16  ;;  %2397 = vmatpush.msra.mxu2 %v1573_v18  ;;  %v2299_v29 = vadd.f32 %v5067_v57, %v2298_v21  ;;  %v1651_v31 = vld [vmem:[%s4953_s26 + $0x428] sm:$0xff]  ;;  %v1644_v33 = vld [vmem:[%s4953_s26 + $0x3f0] sm:$0xff]  ;;  %v1549_v34 = vld [vmem:[%s4953_s26 + $0xf8] sm:$0xff] }
 0x18f   : > { %2377 = vmatpush.msra.mxu1 %v1668_v17  ;;  %2417 = vmatpush.msra.mxu3 %v1669_v19  ;;  %v1645_v35 = vld [vmem:[%s4953_s26 + $0x3f8] sm:$0xff]  ;;  %v1542_v36 = vld [vmem:[%s4953_s26 + $0xc0] sm:$0xff]  ;;  %v1543_v39 = vld [vmem:[%s4953_s26 + $0xc8] sm:$0xff] }
 0x190   : > { %2358 = vmatpush.msra.mxu0 %v1566_v20  ;;  %2398 = vmatpush.msra.mxu2 %v1567_v2  ;;  %v1638_v37 = vld [vmem:[%s4953_s26 + $0x3c0] sm:$0xff]  ;;  %v5114_v38 = vsel %vm2300_vm4, %v5067_v57, %v2299_v29  ;;  %v1639_v40 = vld [vmem:[%s4953_s26 + $0x3c8] sm:$0xff]  ;;  %v1536_v41 = vld [vmem:[%s4953_s26 + $0x90] sm:$0xff] }
 0x191   : > { %2378 = vmatpush.msra.mxu1 %v1662_v60  ;;  %2418 = vmatpush.msra.mxu3 %v1663_v22  ;;  %v1632_v42 = vld [vmem:[%s4953_s26 + $0x390] sm:$0xff]  ;;  %v1537_v44 = vld [vmem:[%s4953_s26 + $0x98] sm:$0xff]  ;;  %v1530_v49 = vld [vmem:[%s4953_s26 + $0x60] sm:$0xff] }
 0x192   : > { %2359 = vmatpush.msra.mxu0 %v1560_v23  ;;  %2399 = vmatpush.msra.mxu2 %v1561_v25  ;;  %v1633_v45 = vld [vmem:[%s4953_s26 + $0x398] sm:$0xff]  ;;  %v1626_v50 = vld [vmem:[%s4953_s26 + $0x360] sm:$0xff]  ;;  %v1531_v51 = vld [vmem:[%s4953_s26 + $0x68] sm:$0xff] }
 0x193   : > { %2379 = vmatpush.msra.mxu1 %v1656_v24  ;;  %2419 = vmatpush.msra.mxu3 %v1657_v26  ;;  %v1627_v52 = vld [vmem:[%s4953_s26 + $0x368] sm:$0xff]  ;;  %v1524_v55 = vld [vmem:[%s4953_s26 + $0x30] sm:$0xff]  ;;  %v1525_v57 = vld [vmem:[%s4953_s26 + $0x38] sm:$0xff] }
 0x194   : > { %2360 = vmatpush.msra.mxu0 %v1554_v27  ;;  %2400 = vmatpush.msra.mxu2 %v1555_v30  ;;  %v1620_v56 = vld [vmem:[%s4953_s26 + $0x330] sm:$0xff]  ;;  %v1621_v58 = vld [vmem:[%s4953_s26 + $0x338] sm:$0xff]  ;;  %v1614_v61 = vld [vmem:[%s4953_s26 + $0x300] sm:$0xff] }
 0x195   : > { %2380 = vmatpush.msra.mxu1 %v1650_v28  ;;  %2420 = vmatpush.msra.mxu3 %v1651_v31  ;;  %v1519_v62 = vld [vmem:[%s4953_s26 + $0x8] sm:$0xff]  ;;  %v1610_v1 = vld [vmem:[%s4953_s26 + $0x2e0] sm:$0xff]  ;;  %v1604_v6 = vld [vmem:[%s4953_s26 + $0x2b0] sm:$0xff] }
 0x196   : > { %2361 = vmatpush.msra.mxu0 %v1548_v32  ;;  %2401 = vmatpush.msra.mxu2 %v1549_v34  ;;  %v1615_v0 = vld [vmem:[%s4953_s26 + $0x308] sm:$0xff]  ;;  %v1706_v3 = vld [vmem:[%s4953_s26 + $0x5e0] sm:$0xff]  ;;  %v1700_v7 = vld [vmem:[%s4953_s26 + $0x5b0] sm:$0xff] }
 0x197   : > { %2381 = vmatpush.msra.mxu1 %v1644_v33  ;;  %2421 = vmatpush.msra.mxu3 %v1645_v35  ;;  %v1611_v4 = vld [vmem:[%s4953_s26 + $0x2e8] sm:$0xff]  ;;  %v1605_v8 = vld [vmem:[%s4953_s26 + $0x2b8] sm:$0xff]  ;;  %v1598_v10 = vld [vmem:[%s4953_s26 + $0x280] sm:$0xff] }
 0x198   : > { %2362 = vmatpush.msra.mxu0 %v1542_v36  ;;  %2402 = vmatpush.msra.mxu2 %v1543_v39  ;;  %v1707_v5 = vld [vmem:[%s4953_s26 + $0x5e8] sm:$0xff]  ;;  %v1701_v9 = vld [vmem:[%s4953_s26 + $0x5b8] sm:$0xff]  ;;  %v1694_v11 = vld [vmem:[%s4953_s26 + $0x580] sm:$0xff] }
 0x199   : > { %2382 = vmatpush.msra.mxu1 %v1638_v37  ;;  %2422 = vmatpush.msra.mxu3 %v1639_v40  ;;  %v1599_v12 = vld [vmem:[%s4953_s26 + $0x288] sm:$0xff]  ;;  %v1592_v14 = vld [vmem:[%s4953_s26 + $0x250] sm:$0xff]  ;;  %v1593_v16 = vld [vmem:[%s4953_s26 + $0x258] sm:$0xff] }
 0x19a   : > { %2363 = vmatpush.msra.mxu0 %v1536_v41  ;;  %2403 = vmatpush.msra.mxu2 %v1537_v44  ;;  %v1695_v13 = vld [vmem:[%s4953_s26 + $0x588] sm:$0xff]  ;;  %v1688_v15 = vld [vmem:[%s4953_s26 + $0x550] sm:$0xff]  ;;  %v1689_v17 = vld [vmem:[%s4953_s26 + $0x558] sm:$0xff] }
 0x19b   : > { %2383 = vmatpush.msra.mxu1 %v1632_v42  ;;  %2423 = vmatpush.msra.mxu3 %v1633_v45  ;;  %v1586_v18 = vld [vmem:[%s4953_s26 + $0x220] sm:$0xff]  ;;  %v1587_v20 = vld [vmem:[%s4953_s26 + $0x228] sm:$0xff]  ;;  %v1580_v21 = vld [vmem:[%s4953_s26 + $0x1f0] sm:$0xff] }
 0x19c   : > { %2364 = vmatpush.msra.mxu0 %v1530_v49  ;;  %2404 = vmatpush.msra.mxu2 %v1531_v51  ;;  %v1682_v19 = vld [vmem:[%s4953_s26 + $0x520] sm:$0xff]  ;;  %v1683_v60 = vld [vmem:[%s4953_s26 + $0x528] sm:$0xff]  ;;  %v1676_v2 = vld [vmem:[%s4953_s26 + $0x4f0] sm:$0xff] }
 0x19d   : > { %2384 = vmatpush.msra.mxu1 %v1626_v50  ;;  %2424 = vmatpush.msra.mxu3 %v1627_v52  ;;  %v1581_v22 = vld [vmem:[%s4953_s26 + $0x1f8] sm:$0xff]  ;;  %v1574_v24 = vld [vmem:[%s4953_s26 + $0x1c0] sm:$0xff]  ;;  %v1575_v26 = vld [vmem:[%s4953_s26 + $0x1c8] sm:$0xff] }
 0x19e   : > { %2365 = vmatpush.msra.mxu0 %v1524_v55  ;;  %2405 = vmatpush.msra.mxu2 %v1525_v57  ;;  %v1677_v23 = vld [vmem:[%s4953_s26 + $0x4f8] sm:$0xff]  ;;  %v1670_v25 = vld [vmem:[%s4953_s26 + $0x4c0] sm:$0xff]  ;;  %v1671_v27 = vld [vmem:[%s4953_s26 + $0x4c8] sm:$0xff] }
 0x19f   : > { %2385 = vmatpush.msra.mxu1 %v1620_v56  ;;  %2425 = vmatpush.msra.mxu3 %v1621_v58  ;;  %v1568_v28 = vld [vmem:[%s4953_s26 + $0x190] sm:$0xff]  ;;  %v1569_v30 = vld [vmem:[%s4953_s26 + $0x198] sm:$0xff]  ;;  %v1562_v32 = vld [vmem:[%s4953_s26 + $0x160] sm:$0xff] }
 0x1a0   : > { %2406 = vmatpush.msra.mxu2 %v1519_v62  ;;  %v1664_v29 = vld [vmem:[%s4953_s26 + $0x490] sm:$0xff]  ;;  %v1665_v31 = vld [vmem:[%s4953_s26 + $0x498] sm:$0xff]  ;;  %v1658_v33 = vld [vmem:[%s4953_s26 + $0x460] sm:$0xff] }
 0x1a1   : > { %2386 = vmatpush.msra.mxu1 %v1614_v61  ;;  %2426 = vmatpush.msra.mxu3 %v1615_v0  ;;  %v1563_v34 = vld [vmem:[%s4953_s26 + $0x168] sm:$0xff]  ;;  %v1556_v36 = vld [vmem:[%s4953_s26 + $0x130] sm:$0xff]  ;;  %v1557_v39 = vld [vmem:[%s4953_s26 + $0x138] sm:$0xff] }
 0x1a2   : > { %2471 = vmatpush.msrb.mxu2 %v1611_v4  ;;  %v1659_v35 = vld [vmem:[%s4953_s26 + $0x468] sm:$0xff]  ;;  %v1652_v37 = vld [vmem:[%s4953_s26 + $0x430] sm:$0xff]  ;;  %v1653_v40 = vld [vmem:[%s4953_s26 + $0x438] sm:$0xff] }
 0x1a3   : > { %2451 = vmatpush.msrb.mxu1 %v1706_v3  ;;  %2491 = vmatpush.msrb.mxu3 %v1707_v5  ;;  %v1550_v41 = vld [vmem:[%s4953_s26 + $0x100] sm:$0xff]  ;;  %v1647_v44 = vld [vmem:[%s4953_s26 + $0x408] sm:$0xff]  ;;  %v1544_v45 = vld [vmem:[%s4953_s26 + $0xd0] sm:$0xff] }
 0x1a4   : > { %2472 = vmatpush.msrb.mxu2 %v1605_v8  ;;  %v1646_v42 = vld [vmem:[%s4953_s26 + $0x400] sm:$0xff]  ;;  %v1545_v49 = vld [vmem:[%s4953_s26 + $0xd8] sm:$0xff]  ;;  %v1539_v55 = vld [vmem:[%s4953_s26 + $0xa8] sm:$0xff] }
 0x1a5   : > { %2452 = vmatpush.msrb.mxu1 %v1700_v7  ;;  %2492 = vmatpush.msrb.mxu3 %v1701_v9  ;;  %v1641_v50 = vld [vmem:[%s4953_s26 + $0x3d8] sm:$0xff]  ;;  %v1538_v51 = vld [vmem:[%s4953_s26 + $0xa0] sm:$0xff]  ;;  %v1635_v56 = vld [vmem:[%s4953_s26 + $0x3a8] sm:$0xff] }
 0x1a6   : > { %2473 = vmatpush.msrb.mxu2 %v1599_v12  ;;  %v1634_v52 = vld [vmem:[%s4953_s26 + $0x3a0] sm:$0xff]  ;;  %v1532_v57 = vld [vmem:[%s4953_s26 + $0x70] sm:$0xff]  ;;  %v1527_v62 = vld [vmem:[%s4953_s26 + $0x48] sm:$0xff] }
 0x1a7   : > { %2453 = vmatpush.msrb.mxu1 %v1694_v11  ;;  %2493 = vmatpush.msrb.mxu3 %v1695_v13  ;;  %v1628_v58 = vld [vmem:[%s4953_s26 + $0x370] sm:$0xff]  ;;  %v1622_v61 = vld [vmem:[%s4953_s26 + $0x340] sm:$0xff]  ;;  %v1521_v3 = vld [vmem:[%s4953_s26 + $0x18] sm:$0xff] }
 0x1a8   : > { %2474 = vmatpush.msrb.mxu2 %v1593_v16  ;;  %v1520_v0 = vld [vmem:[%s4953_s26 + $0x10] sm:$0xff]  ;;  %v1617_v4 = vld [vmem:[%s4953_s26 + $0x318] sm:$0xff]  ;;  %v1516_v12 = vld [vmem:[%s1026_s20] sm:$0x3] }
 0x1a9   : > { %2454 = vmatpush.msrb.mxu1 %v1688_v15  ;;  %2494 = vmatpush.msrb.mxu3 %v1689_v17  ;;  %v2325_v16 = vperm.slane %v1516_v12, 0  ;;  %v2326_v17 = vperm.slane %v1516_v12, 1  ;;  %v1540_v12 = vld [vmem:[%s4953_s26 + $0xb0] sm:$0xff] }
 0x1aa   : > { %2475 = vmatpush.msrb.mxu2 %v1587_v20 }
 0x1ab   : > { %2455 = vmatpush.msrb.mxu1 %v1682_v19  ;;  %2495 = vmatpush.msrb.mxu3 %v1683_v60 }
 0x1ac   : > { %2476 = vmatpush.msrb.mxu2 %v1581_v22 }
 0x1ad   : > { %2456 = vmatpush.msrb.mxu1 %v1676_v2  ;;  %2496 = vmatpush.msrb.mxu3 %v1677_v23 }
 0x1ae   : > { %2477 = vmatpush.msrb.mxu2 %v1575_v26  ;;  %v1708_v26 = vld [vmem:[%s4953_s26 + $0x5f0] sm:$0xff] }
 0x1af   : > { %2457 = vmatpush.msrb.mxu1 %v1670_v25  ;;  %2497 = vmatpush.msrb.mxu3 %v1671_v27  ;;  %v1612_v25 = vld [vmem:[%s4953_s26 + $0x2f0] sm:$0xff]  ;;  %v1613_v27 = vld [vmem:[%s4953_s26 + $0x2f8] sm:$0xff] }
 0x1b0   : > { %2478 = vmatpush.msrb.mxu2 %v1569_v30  ;;  %v1703_v30 = vld [vmem:[%s4953_s26 + $0x5c8] sm:$0xff] }
 0x1b1   : > { %2458 = vmatpush.msrb.mxu1 %v1664_v29  ;;  %2498 = vmatpush.msrb.mxu3 %v1665_v31  ;;  %v1607_v29 = vld [vmem:[%s4953_s26 + $0x2c8] sm:$0xff]  ;;  %v1600_v31 = vld [vmem:[%s4953_s26 + $0x290] sm:$0xff] }
 0x1b2   : > { %2479 = vmatpush.msrb.mxu2 %v1563_v34  ;;  %v1697_v34 = vld [vmem:[%s4953_s26 + $0x598] sm:$0xff] }
 0x1b3   : > { %2459 = vmatpush.msrb.mxu1 %v1658_v33  ;;  %2499 = vmatpush.msrb.mxu3 %v1659_v35  ;;  %v1601_v33 = vld [vmem:[%s4953_s26 + $0x298] sm:$0xff]  ;;  %v1594_v35 = vld [vmem:[%s4953_s26 + $0x260] sm:$0xff] }
 0x1b4   : > { %2480 = vmatpush.msrb.mxu2 %v1557_v39  ;;  %v1691_v39 = vld [vmem:[%s4953_s26 + $0x568] sm:$0xff] }
 0x1b5   : > { %2460 = vmatpush.msrb.mxu1 %v1652_v37  ;;  %2500 = vmatpush.msrb.mxu3 %v1653_v40  ;;  %v1595_v37 = vld [vmem:[%s4953_s26 + $0x268] sm:$0xff]  ;;  %v1588_v40 = vld [vmem:[%s4953_s26 + $0x230] sm:$0xff] }
 0x1b7   : > { %2461 = vmatpush.msrb.mxu1 %v1646_v42  ;;  %2501 = vmatpush.msrb.mxu3 %v1647_v44  ;;  %v1589_v42 = vld [vmem:[%s4953_s26 + $0x238] sm:$0xff]  ;;  %v1582_v44 = vld [vmem:[%s4953_s26 + $0x200] sm:$0xff] }
 0x1b9   : > { %2502 = vmatpush.msrb.mxu3 %v1641_v50  ;;  %v1576_v50 = vld [vmem:[%s4953_s26 + $0x1d0] sm:$0xff] }
 0x1bb   : > { %2503 = vmatpush.msrb.mxu3 %v1635_v56  ;;  %v1570_v56 = vld [vmem:[%s4953_s26 + $0x1a0] sm:$0xff] }
 0x1fc   : > { %v2294_v43 = vpop.xlane.xlu0 %2293 }
 0x1fd   : > { %v2302_v46 = vmul.f32 %v5114_v38, %v2294_v43  ;;  %v1551_v43 = vld [vmem:[%s4953_s26 + $0x108] sm:$0xff] }
 0x1fe   : > { %2481 = vmatpush.msrb.mxu2 %v1551_v43  ;;  %v1685_v43 = vld [vmem:[%s4953_s26 + $0x538] sm:$0xff] }
 0x1ff   : > { %v5128_v53 = vsub.f32 %v5054_v47, %v2302_v46  ;;  %v5131_v54 = vsub.f32 %v5057_v48, %v2302_v46  ;;  %v1518_v48 = vld [vmem:[%s4953_s26] sm:$0xff]  ;;  %v1640_v46 = vld [vmem:[%s4953_s26 + $0x3d0] sm:$0xff] }
 0x200   : > { %2366 = vmatpush.msra.mxu0 %v1518_v48  ;;  %2462 = vmatpush.msrb.mxu1 %v1640_v46  ;;  %v1526_v48 = vld [vmem:[%s4953_s26 + $0x40] sm:$0xff]  ;;  %v1583_v46 = vld [vmem:[%s4953_s26 + $0x208] sm:$0xff] }
 0x201   : > { %v2305_v59 = vmul.f32 %v5128_v53, %v5128_v53  ;;  %v2306_v47 = vmul.f32 %v5131_v54, %v5131_v54  ;;  %2482 = vmatpush.msrb.mxu2 %v1545_v49  ;;  %v1679_v49 = vld [vmem:[%s4953_s26 + $0x508] sm:$0xff] }
 0x202   : > { %2431 = vmatpush.msrb.mxu0 %v1610_v1  ;;  %2463 = vmatpush.msrb.mxu1 %v1634_v52  ;;  %v1616_v1 = vld [vmem:[%s4953_s26 + $0x310] sm:$0xff]  ;;  %v1577_v52 = vld [vmem:[%s4953_s26 + $0x1d8] sm:$0xff] }
 0x203   : > { %v2307_v63 = vadd.f32 %v2306_v47, %v2305_v59  ;;  %2483 = vmatpush.msrb.mxu2 %v1539_v55  ;;  %v1533_v59 = vld [vmem:[%s4953_s26 + $0x78] sm:$0xff] }
 0x204   : > { %2432 = vmatpush.msrb.mxu0 %v1604_v6  ;;  %2464 = vmatpush.msrb.mxu1 %v1628_v58  ;;  %v1629_v47 = vld [vmem:[%s4953_s26 + $0x378] sm:$0xff]  ;;  %v1571_v58 = vld [vmem:[%s4953_s26 + $0x1a8] sm:$0xff] }
 0x205   : > { %2308 = vadd.xlane.f32.xlu0 %v2307_v63  ;;  %2484 = vmatpush.msrb.mxu2 %v1533_v59  ;;  %v1623_v63 = vld [vmem:[%s4953_s26 + $0x348] sm:$0xff]  ;;  %v1673_v55 = vld [vmem:[%s4953_s26 + $0x4d8] sm:$0xff] }
 0x206   : > { %2433 = vmatpush.msrb.mxu0 %v1598_v10  ;;  %2504 = vmatpush.msrb.mxu3 %v1629_v47  ;;  %v1667_v59 = vld [vmem:[%s4953_s26 + $0x4a8] sm:$0xff]  ;;  %v1564_v47 = vld [vmem:[%s4953_s26 + $0x170] sm:$0xff] }
 0x207   : > { %2465 = vmatpush.msrb.mxu1 %v1622_v61  ;;  %2485 = vmatpush.msrb.mxu2 %v1527_v62  ;;  %v1565_v61 = vld [vmem:[%s4953_s26 + $0x178] sm:$0xff] }
 0x208   : > { %2434 = vmatpush.msrb.mxu0 %v1592_v14  ;;  %2505 = vmatpush.msrb.mxu3 %v1623_v63  ;;  %v1517_v14 = vld [vmem:[%s1030_s1] sm:$0x3]  ;;  %v1661_v62 = vld [vmem:[%s4953_s26 + $0x478] sm:$0xff]  ;;  %v1558_v63 = vld [vmem:[%s4953_s26 + $0x140] sm:$0xff] }
 0x209   : > { %2466 = vmatpush.msrb.mxu1 %v1616_v1  ;;  %2486 = vmatpush.msrb.mxu2 %v1521_v3  ;;  %v2332_v19 = vperm.slane %v1517_v14, 0  ;;  %v2333_v20 = vperm.slane %v1517_v14, 1  ;;  %v1559_v1 = vld [vmem:[%s4953_s26 + $0x148] sm:$0xff]  ;;  %v1541_v14 = vld [vmem:[%s4953_s26 + $0xb8] sm:$0xff] }
 0x20a   : > { %2435 = vmatpush.msrb.mxu0 %v1586_v18  ;;  %2506 = vmatpush.msrb.mxu3 %v1617_v4  ;;  %v1655_v3 = vld [vmem:[%s4953_s26 + $0x448] sm:$0xff]  ;;  %v1552_v4 = vld [vmem:[%s4953_s26 + $0x110] sm:$0xff] }
 0x20c   : > { %2436 = vmatpush.msrb.mxu0 %v1580_v21 }
 0x20e   : > { %2437 = vmatpush.msrb.mxu0 %v1574_v24 }
 0x210   : > { %2438 = vmatpush.msrb.mxu0 %v1568_v28  ;;  %v1702_v28 = vld [vmem:[%s4953_s26 + $0x5c0] sm:$0xff] }
 0x212   : > { %2439 = vmatpush.msrb.mxu0 %v1562_v32  ;;  %v1696_v32 = vld [vmem:[%s4953_s26 + $0x590] sm:$0xff] }
 0x214   : > { %2440 = vmatpush.msrb.mxu0 %v1556_v36  ;;  %v1690_v36 = vld [vmem:[%s4953_s26 + $0x560] sm:$0xff] }
 0x216   : > { %2441 = vmatpush.msrb.mxu0 %v1550_v41  ;;  %v1684_v41 = vld [vmem:[%s4953_s26 + $0x530] sm:$0xff] }
 0x218   : > { %2442 = vmatpush.msrb.mxu0 %v1544_v45  ;;  %v1678_v45 = vld [vmem:[%s4953_s26 + $0x500] sm:$0xff] }
 0x21a   : > { %2443 = vmatpush.msrb.mxu0 %v1538_v51  ;;  %v1672_v51 = vld [vmem:[%s4953_s26 + $0x4d0] sm:$0xff] }
 0x21c   : > { %2444 = vmatpush.msrb.mxu0 %v1532_v57  ;;  %v1666_v57 = vld [vmem:[%s4953_s26 + $0x4a0] sm:$0xff] }
 0x21e   : > { %2445 = vmatpush.msrb.mxu0 %v1526_v48  ;;  %v1660_v48 = vld [vmem:[%s4953_s26 + $0x470] sm:$0xff] }
 0x220   : > { %2446 = vmatpush.msrb.mxu0 %v1520_v0  ;;  %v1654_v0 = vld [vmem:[%s4953_s26 + $0x440] sm:$0xff] }
 0x278   : > { %v2309_v5 = vpop.xlane.xlu0 %2308 }
 0x279   : > { %v2310_v6 = vmul.f32 %v2309_v5, %v5114_v38  ;;  %v1648_v5 = vld [vmem:[%s4953_s26 + $0x410] sm:$0xff] }
 0x27b   : > { %v2311_v7 = vadd.f32 1e-06, %v2310_v6  ;;  %v1553_v6 = vld [vmem:[%s4953_s26 + $0x118] sm:$0xff] }
 0x27d   : > { %4153 = vrsqrt.f32 %v2311_v7  ;;  %vm2318_vm6 = vweird.f32 %v2311_v7 }
 0x283   : > { %v4154_v8 = vpop.eup %4153 }
 0x284   : > { %v2313_v9 = vmul.f32 %v4154_v8, %v2311_v7  ;;  %vm2319_vm5 = vweird.f32 %v4154_v8  ;;  %v1649_v7 = vld [vmem:[%s4953_s26 + $0x418] sm:$0xff] }
 0x285   : > { %vm2320_vm7 = vmor %vm2318_vm6, %vm2319_vm5 }
 0x286   : > { %v2314_v10 = vmul.f32 %v4154_v8, %v2313_v9  ;;  %v1642_v9 = vld [vmem:[%s4953_s26 + $0x3e0] sm:$0xff] }
 0x288   : > { %v2315_v11 = vmul.f32 0.5, %v2314_v10  ;;  %v1547_v10 = vld [vmem:[%s4953_s26 + $0xe8] sm:$0xff] }
 0x28a   : > { %v2316_v13 = vsub.f32 1.5, %v2315_v11  ;;  %v1643_v11 = vld [vmem:[%s4953_s26 + $0x3e8] sm:$0xff] }
 0x28c   : > { %v2317_v15 = vmul.f32 %v4154_v8, %v2316_v13  ;;  %v1636_v13 = vld [vmem:[%s4953_s26 + $0x3b0] sm:$0xff] }
 0x28e   : > { %v2321_v18 = vsel %vm2320_vm7, %v4154_v8, %v2317_v15  ;;  %v1546_v8 = vld [vmem:[%s4953_s26 + $0xe0] sm:$0xff]  ;;  %v1637_v15 = vld [vmem:[%s4953_s26 + $0x3b8] sm:$0xff] }
 0x28f   : > { %v2322_v60 = vmul.f32 %v2321_v18, %v5128_v53  ;;  %v2323_v21 = vmul.f32 %v2321_v18, %v5131_v54  ;;  %v1709_v53 = vld [vmem:[%s4953_s26 + $0x5f8] sm:$0xff]  ;;  %v1606_v54 = vld [vmem:[%s4953_s26 + $0x2c0] sm:$0xff]  ;;  %v1535_v18 = vld [vmem:[%s4953_s26 + $0x88] sm:$0xff] }
 0x291   : > { %v2329_v2 = vmul.f32 %v2325_v16, %v2322_v60  ;;  %v2330_v22 = vmul.f32 %v2326_v17, %v2323_v21  ;;  %v1534_v16 = vld [vmem:[%s4953_s26 + $0x80] sm:$0xff]  ;;  %v1624_v60 = vld [vmem:[%s4953_s26 + $0x350] sm:$0xff]  ;;  %v1529_v21 = vld [vmem:[%s4953_s26 + $0x58] sm:$0xff] }
 0x292   : > { %v1630_v17 = vld [vmem:[%s4953_s26 + $0x380] sm:$0xff] }
 0x293   : > { %v5222_v23 = vadd.f32 %v2332_v19, %v2329_v2  ;;  %v5224_v24 = vadd.f32 %v2333_v20, %v2330_v22  ;;  %v1631_v19 = vld [vmem:[%s4953_s26 + $0x388] sm:$0xff]  ;;  %v1528_v20 = vld [vmem:[%s4953_s26 + $0x50] sm:$0xff]  ;;  %v1625_v2 = vld [vmem:[%s4953_s26 + $0x358] sm:$0xff] }
 0x294   : > { %v1522_v22 = vld [vmem:[%s4953_s26 + $0x20] sm:$0xff] }
 0x295   : > { %2367 = vmatmul.f32.vlgmr.msra.gmra.mxu0 %v5222_v23  ;;  %2387 = vmatmul.f32.vlgmr.msra.gmra.mxu1 %v5224_v24 }
 0x296   : > { %2407 = vmatmul.f32.vlgmr.msra.gmra.mxu2 %v5222_v23  ;;  %2427 = vmatmul.f32.vlgmr.msra.gmra.mxu3 %v5224_v24 }
 0x297   : > { %2511 = vmatpush.msra.mxu0 %v1612_v25  ;;  %2531 = vmatpush.msra.mxu1 %v1708_v26  ;;  %v1618_v25 = vld [vmem:[%s4953_s26 + $0x320] sm:$0xff]  ;;  %v1523_v26 = vld [vmem:[%s4953_s26 + $0x28] sm:$0xff] }
 0x298   : > { %2551 = vmatpush.msra.mxu2 %v1613_v27  ;;  %2571 = vmatpush.msra.mxu3 %v1709_v53  ;;  %v1619_v27 = vld [vmem:[%s4953_s26 + $0x328] sm:$0xff] }
 0x299   : > { %2512 = vmatpush.msra.mxu0 %v1606_v54  ;;  %2532 = vmatpush.msra.mxu1 %v1702_v28  ;;  %v1710_v54 = vld [vmem:[%s4996_s22] sm:$0x3f] }
 0x29a   : > { %2552 = vmatpush.msra.mxu2 %v1607_v29  ;;  %2572 = vmatpush.msra.mxu3 %v1703_v30  ;;  %v2339_v29 = vperm.slane %v1710_v54, 0 }
 0x29b   : > { %2513 = vmatpush.msra.mxu0 %v1600_v31  ;;  %2533 = vmatpush.msra.mxu1 %v1696_v32  ;;  %v2341_v31 = vperm.slane %v1710_v54, 2 }
 0x29c   : > { %2553 = vmatpush.msra.mxu2 %v1601_v33  ;;  %2573 = vmatpush.msra.mxu3 %v1697_v34 }
 0x29d   : > { %2514 = vmatpush.msra.mxu0 %v1594_v35  ;;  %2534 = vmatpush.msra.mxu1 %v1690_v36  ;;  %v2340_v35 = vperm.slane %v1710_v54, 1 }
 0x29e   : > { %2554 = vmatpush.msra.mxu2 %v1595_v37  ;;  %2574 = vmatpush.msra.mxu3 %v1691_v39 }
 0x29f   : > { %2447 = vmatmul.f32.vlgmr.msrb.gmra.mxu0 %v5222_v23  ;;  %2467 = vmatmul.f32.vlgmr.msrb.gmra.mxu1 %v5224_v24 }
 0x2a0   : > { %2487 = vmatmul.f32.vlgmr.msrb.gmra.mxu2 %v5222_v23  ;;  %2507 = vmatmul.f32.vlgmr.msrb.gmra.mxu3 %v5224_v24 }
 0x2a1   : > { %2515 = vmatpush.msra.mxu0 %v1588_v40  ;;  %2535 = vmatpush.msra.mxu1 %v1684_v41  ;;  %v2342_v41 = vperm.slane %v1710_v54, 3 }
 0x2a2   : > { %2555 = vmatpush.msra.mxu2 %v1589_v42  ;;  %2575 = vmatpush.msra.mxu3 %v1685_v43 }
 0x2a3   : > { %2516 = vmatpush.msra.mxu0 %v1582_v44  ;;  %2536 = vmatpush.msra.mxu1 %v1678_v45 }
 0x2a4   : > { %2556 = vmatpush.msra.mxu2 %v1583_v46  ;;  %2576 = vmatpush.msra.mxu3 %v1679_v49 }
 0x2a5   : > { %2517 = vmatpush.msra.mxu0 %v1576_v50  ;;  %2537 = vmatpush.msra.mxu1 %v1672_v51  ;;  %v2343_v50 = vperm.slane %v1710_v54, 4 }
 0x2a6   : > { %2557 = vmatpush.msra.mxu2 %v1577_v52  ;;  %2577 = vmatpush.msra.mxu3 %v1673_v55 }
 0x2a7   : > { %2518 = vmatpush.msra.mxu0 %v1570_v56  ;;  %2538 = vmatpush.msra.mxu1 %v1666_v57  ;;  %v2344_v57 = vperm.slane %v1710_v54, 5  ;;  %v1767_v54 = vld [vmem:[%s4998_s27 + $0x1c0] sm:$0xff] }
 0x2a8   : > { %2558 = vmatpush.msra.mxu2 %v1571_v58  ;;  %2578 = vmatpush.msra.mxu3 %v1667_v59 }
 0x2a9   : > { %2519 = vmatpush.msra.mxu0 %v1564_v47  ;;  %2539 = vmatpush.msra.mxu1 %v1660_v48 }
 0x2aa   : > { %2559 = vmatpush.msra.mxu2 %v1565_v61  ;;  %2579 = vmatpush.msra.mxu3 %v1661_v62  ;;  %v2593_v61 = vlaneseq }
 0x2ab   : > { %2520 = vmatpush.msra.mxu0 %v1558_v63  ;;  %2540 = vmatpush.msra.mxu1 %v1654_v0  ;;  %v4636_v63 = vmov -1e+30  }
 0x2ac   : > { %2560 = vmatpush.msra.mxu2 %v1559_v1  ;;  %2580 = vmatpush.msra.mxu3 %v1655_v3  ;;  %v2594_v62 = vand.u32 127, %v2593_v61  ;;  %v1721_v61 = vld [vmem:[%s4998_s27 + $0x50] sm:$0xff] }
 0x2ad   : > { %2521 = vmatpush.msra.mxu0 %v1552_v4  ;;  %2541 = vmatpush.msra.mxu1 %v1648_v5 }
 0x2ae   : > { %2561 = vmatpush.msra.mxu2 %v1553_v6  ;;  %2581 = vmatpush.msra.mxu3 %v1649_v7  ;;  %vm2595_vm8 = vcmp.lt.s32.totalorder %v2594_v62, 5  ;;  %v1722_v62 = vld [vmem:[%s4998_s27 + $0x58] sm:$0xff] }
 0x2af   : > { %2522 = vmatpush.msra.mxu0 %v1546_v8  ;;  %2542 = vmatpush.msra.mxu1 %v1642_v9  ;;  %v2596_v0 = vsel %vm2595_vm8, 0.0, %v4636_v63  ;;  %v1751_v63 = vld [vmem:[%s4998_s27 + $0x140] sm:$0xff] }
 0x2b0   : > { %2562 = vmatpush.msra.mxu2 %v1547_v10  ;;  %2582 = vmatpush.msra.mxu3 %v1643_v11 }
 0x2b1   : > { %2523 = vmatpush.msra.mxu0 %v1540_v12  ;;  %2543 = vmatpush.msra.mxu1 %v1636_v13 }
 0x2b2   : > { %2563 = vmatpush.msra.mxu2 %v1541_v14  ;;  %2583 = vmatpush.msra.mxu3 %v1637_v15 }
 0x2b3   : > { %2524 = vmatpush.msra.mxu0 %v1534_v16  ;;  %2544 = vmatpush.msra.mxu1 %v1630_v17 }
 0x2b4   : > { %2564 = vmatpush.msra.mxu2 %v1535_v18  ;;  %2584 = vmatpush.msra.mxu3 %v1631_v19  ;;  %v1773_v18 = vld [vmem:[%s4998_s27 + $0x1f0] sm:$0xff]  ;;  %v1774_v19 = vld [vmem:[%s4998_s27 + $0x1f8] sm:$0xff] }
 0x2b5   : > { %2525 = vmatpush.msra.mxu0 %v1528_v20  ;;  %2545 = vmatpush.msra.mxu1 %v1624_v60  ;;  %v1741_v20 = vld [vmem:[%s4998_s27 + $0xf0] sm:$0xff]  ;;  %v1771_v60 = vld [vmem:[%s4998_s27 + $0x1e0] sm:$0xff] }
 0x2b6   : > { %2565 = vmatpush.msra.mxu2 %v1529_v21  ;;  %2585 = vmatpush.msra.mxu3 %v1625_v2  ;;  %v1742_v21 = vld [vmem:[%s4998_s27 + $0xf8] sm:$0xff]  ;;  %v1772_v2 = vld [vmem:[%s4998_s27 + $0x1e8] sm:$0xff] }
 0x2b7   : > { %2526 = vmatpush.msra.mxu0 %v1522_v22  ;;  %2546 = vmatpush.msra.mxu1 %v1618_v25  ;;  %v1739_v22 = vld [vmem:[%s4998_s27 + $0xe0] sm:$0xff]  ;;  %v1769_v25 = vld [vmem:[%s4998_s27 + $0x1d0] sm:$0xff] }
 0x2b8   : > { %2566 = vmatpush.msra.mxu2 %v1523_v26  ;;  %2586 = vmatpush.msra.mxu3 %v1619_v27  ;;  %v1740_v26 = vld [vmem:[%s4998_s27 + $0xe8] sm:$0xff]  ;;  %v1770_v27 = vld [vmem:[%s4998_s27 + $0x1d8] sm:$0xff] }
 0x2b9   : > { %2527 = vmatmul.f32.vlgmr.msra.gmra.mxu0 %v5222_v23  ;;  %2547 = vmatmul.f32.vlgmr.msra.gmra.mxu1 %v5224_v24 }
 0x2ba   : > { %2567 = vmatmul.f32.vlgmr.msra.gmra.mxu2 %v5222_v23  ;;  %2587 = vmatmul.f32.vlgmr.msra.gmra.mxu3 %v5224_v24 }
 0x312   : > { %v2368_v53 = vpop.f32.mrf.mxu0  ;;  %v2388_v28 = vpop.f32.mrf.mxu1 }
 0x313   : > { %v2369_v32 = vadd.f32 %v2368_v53, %v2339_v29  ;;  %v1737_v53 = vld [vmem:[%s4998_s27 + $0xd0] sm:$0xff]  ;;  %v1768_v29 = vld [vmem:[%s4998_s27 + $0x1c8] sm:$0xff] }
 0x315   : > { %v2389_v37 = vadd.f32 %v2388_v28, %v2369_v32  ;;  %v1738_v28 = vld [vmem:[%s4998_s27 + $0xd8] sm:$0xff]  ;;  %v1765_v32 = vld [vmem:[%s4998_s27 + $0x1b0] sm:$0xff] }
 0x317   : > { %v2591_v23 = vmul.f32 0.088388346, %v2389_v37  ;;  %v1764_v37 = vld [vmem:[%s4998_s27 + $0x1a8] sm:$0xff] }
 0x319   : > { %v2408_v30 = vpop.f32.mrf.mxu2  ;;  %v2428_v33 = vpop.f32.mrf.mxu3 }
 0x31a   : > { %v2409_v42 = vadd.f32 %v2408_v30, %v2340_v35  ;;  %v1735_v30 = vld [vmem:[%s4998_s27 + $0xc0] sm:$0xff]  ;;  %v1734_v35 = vld [vmem:[%s4998_s27 + $0xb8] sm:$0xff] }
 0x31c   : > { %v2448_v34 = vpop.f32.mrf.mxu0  ;;  %v2468_v39 = vpop.f32.mrf.mxu1  ;;  %v2429_v44 = vadd.f32 %v2428_v33, %v2409_v42  ;;  %v1766_v33 = vld [vmem:[%s4998_s27 + $0x1b8] sm:$0xff] }
 0x31d   : > { %v2449_v36 = vadd.f32 %v2448_v34, %v2341_v31  ;;  %v1736_v31 = vld [vmem:[%s4998_s27 + $0xc8] sm:$0xff]  ;;  %v1733_v34 = vld [vmem:[%s4998_s27 + $0xb0] sm:$0xff]  ;;  %v1762_v42 = vld [vmem:[%s4998_s27 + $0x198] sm:$0xff] }
 0x31e   : > { %v2592_v49 = vmul.f32 0.088388346, %v2429_v44  ;;  %v1760_v44 = vld [vmem:[%s4998_s27 + $0x188] sm:$0xff] }
 0x31f   : > { %v2469_v40 = vadd.f32 %v2468_v39, %v2449_v36  ;;  %v1763_v36 = vld [vmem:[%s4998_s27 + $0x1a0] sm:$0xff] }
 0x320   : > { %v1731_v39 = vld [vmem:[%s4998_s27 + $0xa0] sm:$0xff] }
 0x321   : > { %2612 = vmatpush.xpose.msrb.mxu0 %v2469_v40  ;;  %v1732_v40 = vld [vmem:[%s4998_s27 + $0xa8] sm:$0xff] }
 0x323   : > { %v2488_v43 = vpop.f32.mrf.mxu2  ;;  %v2508_v45 = vpop.f32.mrf.mxu3 }
 0x324   : > { %v2489_v24 = vadd.f32 %v2488_v43, %v2342_v41  ;;  %2613 = vmatmul.f32.vlgmr.msrb.gmra.mxu0 %v2591_v23  ;;  %v1761_v41 = vld [vmem:[%s4998_s27 + $0x190] sm:$0xff]  ;;  %v1730_v43 = vld [vmem:[%s4998_s27 + $0x98] sm:$0xff] }
 0x325   : > { %2706 = vmatpush.msra.mxu0 %v1741_v20  ;;  %v1729_v23 = vld [vmem:[%s4998_s27 + $0x90] sm:$0xff] }
 0x326   : > { %v2509_v46 = vadd.f32 %v2508_v45, %v2489_v24  ;;  %v1759_v24 = vld [vmem:[%s4998_s27 + $0x180] sm:$0xff]  ;;  %v1713_v20 = vld [vmem:[%s4998_s27 + $0x10] sm:$0xff] }
 0x327   : > { %2707 = vmatpush.msra.mxu0 %v1739_v22  ;;  %v1727_v45 = vld [vmem:[%s4998_s27 + $0x80] sm:$0xff] }
 0x328   : > { %2667 = vmatpush.xpose.msrb.mxu2 %v2509_v46  ;;  %v1728_v46 = vld [vmem:[%s4998_s27 + $0x88] sm:$0xff]  ;;  %v1711_v22 = vld [vmem:[%s4998_s27] sm:$0xff] }
 0x329   : > { %2708 = vmatpush.msra.mxu0 %v1737_v53 }
 0x32b   : > { %2668 = vmatmul.f32.vlgmr.msrb.gmra.mxu2 %v2592_v49  ;;  %2709 = vmatpush.msra.mxu0 %v1735_v30 }
 0x32c   : > { %2746 = vmatpush.msra.mxu2 %v1742_v21  ;;  %v1714_v21 = vld [vmem:[%s4998_s27 + $0x18] sm:$0xff] }
 0x32d   : > { %2710 = vmatpush.msra.mxu0 %v1733_v34 }
 0x32e   : > { %2747 = vmatpush.msra.mxu2 %v1740_v26 }
 0x32f   : > { %2711 = vmatpush.msra.mxu0 %v1731_v39 }
 0x330   : > { %2748 = vmatpush.msra.mxu2 %v1738_v28  ;;  %v1775_v28 = vld [vmem:[%s5000_s10] sm:$0x3] }
 0x331   : > { %2712 = vmatpush.msra.mxu0 %v1729_v23  ;;  %v2026_v23 = vld [vmem:[%s5002_s7 + $0x7c0] sm:$0xff] }
 0x332   : > { %2749 = vmatpush.msra.mxu2 %v1736_v31  ;;  %v4181_v31 = vld [vmem:[%s4973_s11] sm:$0xff] }
 0x333   : > { %2713 = vmatpush.msra.mxu0 %v1727_v45  ;;  %v2018_v45 = vld [vmem:[%s5002_s7 + $0x780] sm:$0xff] }
 0x334   : > { %2750 = vmatpush.msra.mxu2 %v1734_v35  ;;  %v2790_v35 = vperm.slane %v1775_v28, 1 }
 0x336   : > { %v2528_v51 = vpop.f32.mrf.mxu0  ;;  %v2548_v55 = vpop.f32.mrf.mxu1  ;;  %2751 = vmatpush.msra.mxu2 %v1732_v40 }
 0x337   : > { %v2529_v52 = vadd.f32 %v2528_v51, %v2343_v50  ;;  %v1757_v50 = vld [vmem:[%s4998_s27 + $0x170] sm:$0xff]  ;;  %v1758_v51 = vld [vmem:[%s4998_s27 + $0x178] sm:$0xff] }
 0x338   : > { %2752 = vmatpush.msra.mxu2 %v1730_v43  ;;  %v1899_v43 = vld [vmem:[%s5002_s7 + $0x3c8] sm:$0xff] }
 0x339   : > { %v2549_v56 = vadd.f32 %v2548_v55, %v2529_v52  ;;  %v1725_v52 = vld [vmem:[%s4998_s27 + $0x70] sm:$0xff]  ;;  %v1726_v55 = vld [vmem:[%s4998_s27 + $0x78] sm:$0xff] }
 0x33a   : > { %2753 = vmatpush.msra.mxu2 %v1728_v46  ;;  %2714 = vmatpush.msra.mxu0 %v1725_v52  ;;  %v1891_v46 = vld [vmem:[%s5002_s7 + $0x388] sm:$0xff] }
 0x33b   : > { %2647 = vmatpush.msrb.mxu1 %v2549_v56  ;;  %v1755_v56 = vld [vmem:[%s4998_s27 + $0x160] sm:$0xff]  ;;  %v1883_v52 = vld [vmem:[%s5002_s7 + $0x348] sm:$0xff] }
 0x33c   : > { %2754 = vmatpush.msra.mxu2 %v1726_v55  ;;  %v2011_v55 = vld [vmem:[%s5002_s7 + $0x748] sm:$0xff] }
 0x33d   : > { %v2568_v58 = vpop.f32.mrf.mxu2  ;;  %v2588_v47 = vpop.f32.mrf.mxu3  ;;  %2726 = vmatpush.msra.mxu1 %v1773_v18 }
 0x33e   : > { %v2569_v59 = vadd.f32 %v2568_v58, %v2344_v57  ;;  %v1756_v57 = vld [vmem:[%s4998_s27 + $0x168] sm:$0xff]  ;;  %v1723_v58 = vld [vmem:[%s4998_s27 + $0x60] sm:$0xff] }
 0x33f   : > { %2727 = vmatpush.msra.mxu1 %v1771_v60  ;;  %2715 = vmatpush.msra.mxu0 %v1723_v58  ;;  %v1743_v60 = vld [vmem:[%s4998_s27 + $0x100] sm:$0xff]  ;;  %v1875_v58 = vld [vmem:[%s5002_s7 + $0x308] sm:$0xff] }
 0x340   : > { %v2589_v48 = vadd.f32 %v2588_v47, %v2569_v59  ;;  %v1724_v59 = vld [vmem:[%s4998_s27 + $0x68] sm:$0xff]  ;;  %v1753_v47 = vld [vmem:[%s4998_s27 + $0x150] sm:$0xff] }
 0x341   : > { %2728 = vmatpush.msra.mxu1 %v1769_v25  ;;  %2755 = vmatpush.msra.mxu2 %v1724_v59  ;;  %v1712_v25 = vld [vmem:[%s4998_s27 + $0x8] sm:$0xff] }
 0x342   : > { %2701 = vmatpush.msrb.mxu3 %v2589_v48  ;;  %v1754_v48 = vld [vmem:[%s4998_s27 + $0x158] sm:$0xff]  ;;  %2716 = vmatpush.msra.mxu0 %v1721_v61  ;;  %v2003_v59 = vld [vmem:[%s5002_s7 + $0x708] sm:$0xff] }
 0x343   : > { %2729 = vmatpush.msra.mxu1 %v1767_v54  ;;  %2756 = vmatpush.msra.mxu2 %v1722_v62  ;;  %v1867_v61 = vld [vmem:[%s5002_s7 + $0x2c8] sm:$0xff] }
 0x344   : > { %2766 = vmatpush.msra.mxu3 %v1774_v19  ;;  %v1995_v62 = vld [vmem:[%s5002_s7 + $0x6c8] sm:$0xff] }
 0x345   : > { %2730 = vmatpush.msra.mxu1 %v1765_v32 }
 0x346   : > { %2767 = vmatpush.msra.mxu3 %v1772_v2  ;;  %v1744_v2 = vld [vmem:[%s4998_s27 + $0x108] sm:$0xff] }
 0x347   : > { %2731 = vmatpush.msra.mxu1 %v1763_v36  ;;  %v4182_v36 = vld [vmem:[%s4973_s11 + $0x8] sm:$0xff] }
 0x348   : > { %2768 = vmatpush.msra.mxu3 %v1770_v27 }
 0x349   : > { %2732 = vmatpush.msra.mxu1 %v1761_v41 }
 0x34a   : > { %2769 = vmatpush.msra.mxu3 %v1768_v29 }
 0x34b   : > { %2733 = vmatpush.msra.mxu1 %v1759_v24  ;;  %v2027_v24 = vld [vmem:[%s5002_s7 + $0x7c8] sm:$0xff] }
 0x34c   : > { %2770 = vmatpush.msra.mxu3 %v1766_v33  ;;  %v2789_v33 = vperm.slane %v1775_v28, 0 }
 0x34d   : > { %2734 = vmatpush.msra.mxu1 %v1757_v50  ;;  %v1882_v50 = vld [vmem:[%s5002_s7 + $0x340] sm:$0xff] }
 0x34e   : > { %2771 = vmatpush.msra.mxu3 %v1764_v37 }
 0x34f   : > { %2735 = vmatpush.msra.mxu1 %v1755_v56  ;;  %v1874_v56 = vld [vmem:[%s5002_s7 + $0x300] sm:$0xff] }
 0x350   : > { %2772 = vmatpush.msra.mxu3 %v1762_v42  ;;  %v1898_v42 = vld [vmem:[%s5002_s7 + $0x3c0] sm:$0xff] }
 0x351   : > { %2736 = vmatpush.msra.mxu1 %v1753_v47  ;;  %v1866_v47 = vld [vmem:[%s5002_s7 + $0x2c0] sm:$0xff] }
 0x352   : > { %2773 = vmatpush.msra.mxu3 %v1760_v44  ;;  %v1890_v44 = vld [vmem:[%s5002_s7 + $0x380] sm:$0xff] }
 0x353   : > { %2737 = vmatpush.msra.mxu1 %v1751_v63  ;;  %v1858_v63 = vld [vmem:[%s5002_s7 + $0x280] sm:$0xff] }
 0x354   : > { %2774 = vmatpush.msra.mxu3 %v1758_v51  ;;  %v2010_v51 = vld [vmem:[%s5002_s7 + $0x740] sm:$0xff] }
 0x356   : > { %2775 = vmatpush.msra.mxu3 %v1756_v57  ;;  %v2002_v57 = vld [vmem:[%s5002_s7 + $0x700] sm:$0xff] }
 0x358   : > { %2776 = vmatpush.msra.mxu3 %v1754_v48  ;;  %v1994_v48 = vld [vmem:[%s5002_s7 + $0x6c0] sm:$0xff] }
 0x3a1   : > { %v2614_v5 = vpop.f32.mrf.mxu0 }
 0x3a2   : > { %v2615_v6 = vadd.f32 %v2614_v5, %v2596_v0 }
 0x3a4   : > { %v2618_v7 = vsel %vm2617_vm9, %v2615_v6, -inf }
 0x3ae   : > { %v2669_v1 = vpop.f32.mrf.mxu2 }
 0x3af   : > { %v2670_v3 = vadd.f32 %v2669_v1, %v2596_v0  ;;  %v1752_v0 = vld [vmem:[%s4998_s27 + $0x148] sm:$0xff] }
 0x3b0   : > { %2777 = vmatpush.msra.mxu3 %v1752_v0  ;;  %v1986_v0 = vld [vmem:[%s5002_s7 + $0x680] sm:$0xff] }
 0x3b1   : > { %v2672_v4 = vsel %vm2617_vm9, %v2670_v3, -inf }
 0x3b2   : > { %2673 = vmax.xlane.f32.xlu1 %v2672_v4 }
 0x3ba   : > { %2619 = vmax.xlane.f32.xlu1 %v2618_v7  ;;  %v1720_v7 = vld [vmem:[%s4998_s27 + $0x48] sm:$0xff] }
 0x3bb   : > { %2757 = vmatpush.msra.mxu2 %v1720_v7  ;;  %v1979_v7 = vld [vmem:[%s5002_s7 + $0x648] sm:$0xff] }
 0x425   : > { %v2674_v8 = vpop.xlane.xlu1 %2673 }
 0x426   : > { %v2675_v9 = vsub.f32 %v2670_v3, %v2674_v8  ;;  %v1719_v3 = vld [vmem:[%s4998_s27 + $0x40] sm:$0xff]  ;;  %v1750_v8 = vld [vmem:[%s4998_s27 + $0x138] sm:$0xff] }
 0x427   : > { %2717 = vmatpush.msra.mxu0 %v1719_v3  ;;  %2778 = vmatpush.msra.mxu3 %v1750_v8  ;;  %v1987_v3 = vld [vmem:[%s5002_s7 + $0x688] sm:$0xff]  ;;  %v1842_v8 = vld [vmem:[%s5002_s7 + $0x200] sm:$0xff] }
 0x428   : > { %v2676_v10 = vmul.f32 1.442695, %v2675_v9  ;;  %v1717_v9 = vld [vmem:[%s4998_s27 + $0x30] sm:$0xff] }
 0x429   : > { %2718 = vmatpush.msra.mxu0 %v1717_v9  ;;  %v1970_v9 = vld [vmem:[%s5002_s7 + $0x600] sm:$0xff] }
 0x42a   : > { %4155 = vpow2.f32 %v2676_v10  ;;  %v1747_v10 = vld [vmem:[%s4998_s27 + $0x120] sm:$0xff] }
 0x42d   : > { %v2620_v11 = vpop.xlane.xlu1 %2619 }
 0x42e   : > { %v2621_v12 = vsub.f32 %v2615_v6, %v2620_v11  ;;  %v1749_v6 = vld [vmem:[%s4998_s27 + $0x130] sm:$0xff]  ;;  %v1718_v11 = vld [vmem:[%s4998_s27 + $0x38] sm:$0xff] }
 0x42f   : > { %2738 = vmatpush.msra.mxu1 %v1749_v6  ;;  %2758 = vmatpush.msra.mxu2 %v1718_v11  ;;  %v1851_v6 = vld [vmem:[%s5002_s7 + $0x248] sm:$0xff] }
 0x430   : > { %v5305_v13 = vpop.eup %4155  ;;  %v2622_v14 = vmul.f32 1.442695, %v2621_v12  ;;  %v1748_v12 = vld [vmem:[%s4998_s27 + $0x128] sm:$0xff] }
 0x431   : > { %v2678_v15 = vsel %vm2617_vm9, %v5305_v13, 0.0  ;;  %2739 = vmatpush.msra.mxu1 %v1747_v10  ;;  %2779 = vmatpush.msra.mxu3 %v1748_v12  ;;  %v1843_v10 = vld [vmem:[%s5002_s7 + $0x208] sm:$0xff]  ;;  %v1834_v12 = vld [vmem:[%s5002_s7 + $0x1c0] sm:$0xff] }
 0x432   : > { %4157 = vpow2.f32 %v2622_v14  ;;  %2679 = vadd.xlane.f32.xlu2 %v2678_v15  ;;  %v1745_v14 = vld [vmem:[%s4998_s27 + $0x110] sm:$0xff]  ;;  %v1716_v15 = vld [vmem:[%s4998_s27 + $0x28] sm:$0xff] }
 0x433   : > { %2740 = vmatpush.msra.mxu1 %v1745_v14  ;;  %2759 = vmatpush.msra.mxu2 %v1716_v15  ;;  %v1971_v11 = vld [vmem:[%s5002_s7 + $0x608] sm:$0xff] }
 0x434   : > { %v1835_v14 = vld [vmem:[%s5002_s7 + $0x1c8] sm:$0xff] }
 0x435   : > { %2741 = vmatpush.msra.mxu1 %v1743_v60  ;;  %2760 = vmatpush.msra.mxu2 %v1714_v21  ;;  %v1963_v15 = vld [vmem:[%s5002_s7 + $0x5c8] sm:$0xff]  ;;  %v1818_v60 = vld [vmem:[%s5002_s7 + $0x140] sm:$0xff] }
 0x436   : > { %v1946_v21 = vld [vmem:[%s5002_s7 + $0x540] sm:$0xff] }
 0x437   : > { %2761 = vmatpush.msra.mxu2 %v1712_v25  ;;  %v1810_v25 = vld [vmem:[%s5002_s7 + $0x100] sm:$0xff] }
 0x438   : > { %v5309_v16 = vpop.eup %4157 }
 0x439   : > { %v2624_v17 = vsel %vm2617_vm9, %v5309_v16, 0.0  ;;  %2891 = vmatpush.msrb.mxu2 %v1899_v43  ;;  %v1915_v43 = vld [vmem:[%s5002_s7 + $0x448] sm:$0xff] }
 0x43a   : > { %2625 = vadd.xlane.f32.xlu2 %v2624_v17  ;;  %v1746_v17 = vld [vmem:[%s4998_s27 + $0x118] sm:$0xff] }
 0x43b   : > { %2780 = vmatpush.msra.mxu3 %v1746_v17  ;;  %2892 = vmatpush.msrb.mxu2 %v1891_v46  ;;  %v1826_v17 = vld [vmem:[%s5002_s7 + $0x180] sm:$0xff] }
 0x43c   : > { %v1906_v46 = vld [vmem:[%s5002_s7 + $0x400] sm:$0xff] }
 0x43d   : > { %2781 = vmatpush.msra.mxu3 %v1744_v2  ;;  %2893 = vmatpush.msrb.mxu2 %v1883_v52  ;;  %v1819_v2 = vld [vmem:[%s5002_s7 + $0x148] sm:$0xff]  ;;  %v1900_v52 = vld [vmem:[%s5002_s7 + $0x3d0] sm:$0xff] }
 0x43f   : > { %2894 = vmatpush.msrb.mxu2 %v1875_v58  ;;  %v1892_v58 = vld [vmem:[%s5002_s7 + $0x390] sm:$0xff] }
 0x441   : > { %2895 = vmatpush.msrb.mxu2 %v1867_v61  ;;  %v1884_v61 = vld [vmem:[%s5002_s7 + $0x350] sm:$0xff] }
 0x4a5   : > { %v2680_v49 = vpop.xlane.xlu2 %2679 }
 0x4a6   : > { %4159 = vrcp.f32 %v2680_v49  ;;  %v2019_v49 = vld [vmem:[%s5002_s7 + $0x788] sm:$0xff] }
 0x4ac   : > { %v4160_v1 = vpop.eup %4159 }
 0x4ad   : > { %v2682_v4 = vmul.f32 %v4160_v1, %v5305_v13  ;;  %v2626_v5 = vpop.xlane.xlu2 %2625  ;;  %v1715_v13 = vld [vmem:[%s4998_s27 + $0x20] sm:$0xff]  ;;  %v1859_v1 = vld [vmem:[%s5002_s7 + $0x288] sm:$0xff] }
 0x4ae   : > { %4161 = vrcp.f32 %v2626_v5  ;;  %2719 = vmatpush.msra.mxu0 %v1715_v13  ;;  %v1978_v5 = vld [vmem:[%s5002_s7 + $0x640] sm:$0xff]  ;;  %2896 = vmatpush.msrb.mxu2 %v1859_v1  ;;  %v1876_v1 = vld [vmem:[%s5002_s7 + $0x310] sm:$0xff] }
 0x4af   : > { %3981 = vmatmul.msk.f32.vlgmr.msrb.gmra.mxu3 %vm2617_vm9, %v2682_v4  ;;  %v1850_v4 = vld [vmem:[%s5002_s7 + $0x240] sm:$0xff] }
 0x4b0   : > { %2720 = vmatpush.msra.mxu0 %v1713_v20  ;;  %2911 = vmatpush.msrb.mxu3 %v2027_v24  ;;  %v1962_v13 = vld [vmem:[%s5002_s7 + $0x5c0] sm:$0xff]  ;;  %v1955_v20 = vld [vmem:[%s5002_s7 + $0x588] sm:$0xff] }
 0x4b1   : > { %2897 = vmatpush.msrb.mxu2 %v1851_v6  ;;  %v1868_v6 = vld [vmem:[%s5002_s7 + $0x2d0] sm:$0xff] }
 0x4b2   : > { %2721 = vmatpush.msra.mxu0 %v1711_v22  ;;  %2912 = vmatpush.msrb.mxu3 %v2019_v49  ;;  %v1947_v22 = vld [vmem:[%s5002_s7 + $0x548] sm:$0xff] }
 0x4b3   : > { %2898 = vmatpush.msrb.mxu2 %v1843_v10  ;;  %v1779_v49 = vld [vmem:[%s5002_s7 + $0x8] sm:$0xff]  ;;  %v1860_v10 = vld [vmem:[%s5002_s7 + $0x290] sm:$0xff] }
 0x4b4   : > { %v4162_v18 = vpop.eup %4161  ;;  %2851 = vmatpush.msrb.mxu0 %v1898_v42  ;;  %2913 = vmatpush.msrb.mxu3 %v2011_v55  ;;  %v1914_v42 = vld [vmem:[%s5002_s7 + $0x440] sm:$0xff]  ;;  %v2028_v55 = vld [vmem:[%s5002_s7 + $0x7d0] sm:$0xff] }
 0x4b5   : > { %v2628_v19 = vmul.f32 %v4162_v18, %v5309_v16  ;;  %v1954_v18 = vld [vmem:[%s5002_s7 + $0x580] sm:$0xff]  ;;  %2899 = vmatpush.msrb.mxu2 %v1835_v14  ;;  %v1852_v14 = vld [vmem:[%s5002_s7 + $0x250] sm:$0xff] }
 0x4b6   : > { %2852 = vmatpush.msrb.mxu0 %v1890_v44  ;;  %2914 = vmatpush.msrb.mxu3 %v2003_v59  ;;  %v2020_v59 = vld [vmem:[%s5002_s7 + $0x790] sm:$0xff] }
 0x4b7   : > { %3980 = vmatmul.msk.f32.vlgmr.msrb.gmra.mxu1 %vm2617_vm9, %v2628_v19  ;;  %v1827_v19 = vld [vmem:[%s5002_s7 + $0x188] sm:$0xff] }
 0x4b8   : > { %2871 = vmatpush.msrb.mxu1 %v2026_v23  ;;  %2853 = vmatpush.msrb.mxu0 %v1882_v50  ;;  %v1787_v23 = vld [vmem:[%s5002_s7 + $0x48] sm:$0xff] }
 0x4b9   : > { %2915 = vmatpush.msrb.mxu3 %v1995_v62  ;;  %2900 = vmatpush.msrb.mxu2 %v1827_v19  ;;  %v2012_v62 = vld [vmem:[%s5002_s7 + $0x750] sm:$0xff] }
 0x4ba   : > { %2872 = vmatpush.msrb.mxu1 %v2018_v45  ;;  %2854 = vmatpush.msrb.mxu0 %v1874_v56  ;;  %v1778_v45 = vld [vmem:[%s5002_s7] sm:$0xff]  ;;  %v1901_v56 = vld [vmem:[%s5002_s7 + $0x3d8] sm:$0xff]  ;;  %v1844_v19 = vld [vmem:[%s5002_s7 + $0x210] sm:$0xff] }
 0x4bb   : > { %2916 = vmatpush.msrb.mxu3 %v1987_v3  ;;  %2901 = vmatpush.msrb.mxu2 %v1819_v2  ;;  %v2004_v3 = vld [vmem:[%s5002_s7 + $0x710] sm:$0xff] }
 0x4bc   : > { %2873 = vmatpush.msrb.mxu1 %v2010_v51  ;;  %2855 = vmatpush.msrb.mxu0 %v1866_v47  ;;  %v1907_v51 = vld [vmem:[%s5002_s7 + $0x408] sm:$0xff]  ;;  %v1893_v47 = vld [vmem:[%s5002_s7 + $0x398] sm:$0xff]  ;;  %v1836_v2 = vld [vmem:[%s5002_s7 + $0x1d0] sm:$0xff] }
 0x4bd   : > { %2917 = vmatpush.msrb.mxu3 %v1979_v7  ;;  %v1996_v7 = vld [vmem:[%s5002_s7 + $0x6d0] sm:$0xff] }
 0x4be   : > { %2874 = vmatpush.msrb.mxu1 %v2002_v57  ;;  %2856 = vmatpush.msrb.mxu0 %v1858_v63  ;;  %v2029_v57 = vld [vmem:[%s5002_s7 + $0x7d8] sm:$0xff] }
 0x4bf   : > { %2918 = vmatpush.msrb.mxu3 %v1971_v11  ;;  %v1885_v63 = vld [vmem:[%s5002_s7 + $0x358] sm:$0xff]  ;;  %v1988_v11 = vld [vmem:[%s5002_s7 + $0x690] sm:$0xff] }
 0x4c0   : > { %2875 = vmatpush.msrb.mxu1 %v1994_v48  ;;  %2857 = vmatpush.msrb.mxu0 %v1850_v4  ;;  %v2021_v48 = vld [vmem:[%s5002_s7 + $0x798] sm:$0xff] }
 0x4c1   : > { %2919 = vmatpush.msrb.mxu3 %v1963_v15  ;;  %v1877_v4 = vld [vmem:[%s5002_s7 + $0x318] sm:$0xff]  ;;  %v1980_v15 = vld [vmem:[%s5002_s7 + $0x650] sm:$0xff] }
 0x4c2   : > { %2876 = vmatpush.msrb.mxu1 %v1986_v0  ;;  %2858 = vmatpush.msrb.mxu0 %v1842_v8  ;;  %v2013_v0 = vld [vmem:[%s5002_s7 + $0x758] sm:$0xff] }
 0x4c3   : > { %2920 = vmatpush.msrb.mxu3 %v1955_v20  ;;  %v1869_v8 = vld [vmem:[%s5002_s7 + $0x2d8] sm:$0xff]  ;;  %v1972_v20 = vld [vmem:[%s5002_s7 + $0x610] sm:$0xff] }
 0x4c4   : > { %2877 = vmatpush.msrb.mxu1 %v1978_v5  ;;  %2859 = vmatpush.msrb.mxu0 %v1834_v12  ;;  %v2005_v5 = vld [vmem:[%s5002_s7 + $0x718] sm:$0xff] }
 0x4c5   : > { %2921 = vmatpush.msrb.mxu3 %v1947_v22  ;;  %v1861_v12 = vld [vmem:[%s5002_s7 + $0x298] sm:$0xff]  ;;  %v1964_v22 = vld [vmem:[%s5002_s7 + $0x5d0] sm:$0xff] }
 0x4c6   : > { %2878 = vmatpush.msrb.mxu1 %v1970_v9  ;;  %2860 = vmatpush.msrb.mxu0 %v1826_v17  ;;  %v1997_v9 = vld [vmem:[%s5002_s7 + $0x6d8] sm:$0xff] }
 0x4c7   : > { %v1853_v17 = vld [vmem:[%s5002_s7 + $0x258] sm:$0xff] }
 0x4c8   : > { %2879 = vmatpush.msrb.mxu1 %v1962_v13  ;;  %2861 = vmatpush.msrb.mxu0 %v1818_v60  ;;  %v1989_v13 = vld [vmem:[%s5002_s7 + $0x698] sm:$0xff] }
 0x4c9   : > { %v1845_v60 = vld [vmem:[%s5002_s7 + $0x218] sm:$0xff] }
 0x4ca   : > { %2880 = vmatpush.msrb.mxu1 %v1954_v18  ;;  %2862 = vmatpush.msrb.mxu0 %v1810_v25  ;;  %v1981_v18 = vld [vmem:[%s5002_s7 + $0x658] sm:$0xff] }
 0x4cb   : > { %v1837_v25 = vld [vmem:[%s5002_s7 + $0x1d8] sm:$0xff] }
 0x4cc   : > { %2881 = vmatpush.msrb.mxu1 %v1946_v21  ;;  %v1973_v21 = vld [vmem:[%s5002_s7 + $0x618] sm:$0xff] }
 0x532   : > { %v2703_v26 = vpop.f32.mrf.mxu3 }
 0x533   : > { %2742 = vmatmul.f32.vlgmr.msra.gmra.mxu1 %v2703_v26  ;;  %2782 = vmatmul.f32.vlgmr.msra.gmra.mxu3 %v2703_v26  ;;  %v1938_v26 = vld [vmem:[%s5002_s7 + $0x500] sm:$0xff] }
 0x534   : > { %v2649_v16 = vpop.f32.mrf.mxu1  ;;  %2882 = vmatpush.msrb.mxu1 %v1938_v26  ;;  %v1965_v26 = vld [vmem:[%s5002_s7 + $0x5d8] sm:$0xff] }
 0x535   : > { %2722 = vmatmul.f32.vlgmr.msra.gmra.mxu0 %v2649_v16  ;;  %2762 = vmatmul.f32.vlgmr.msra.gmra.mxu2 %v2649_v16  ;;  %v1811_v16 = vld [vmem:[%s5002_s7 + $0x108] sm:$0xff] }
 0x536   : > { %2902 = vmatpush.msrb.mxu2 %v1811_v16  ;;  %v1828_v16 = vld [vmem:[%s5002_s7 + $0x190] sm:$0xff] }
 0x5b0   : > { %v2743_v53 = vpop.f32.mrf.mxu1 }
 0x5b2   : > { %v2723_v27 = vpop.f32.mrf.mxu0 }
 0x5b3   : > { %v2744_v54 = vadd.f32 %v2743_v53, %v2723_v27  ;;  %v1939_v27 = vld [vmem:[%s5002_s7 + $0x508] sm:$0xff]  ;;  %v1802_v53 = vld [vmem:[%s5002_s7 + $0xc0] sm:$0xff] }
 0x5b4   : > { %2922 = vmatpush.msrb.mxu3 %v1939_v27  ;;  %2863 = vmatpush.msrb.mxu0 %v1802_v53  ;;  %v1956_v27 = vld [vmem:[%s5002_s7 + $0x590] sm:$0xff]  ;;  %v1829_v53 = vld [vmem:[%s5002_s7 + $0x198] sm:$0xff] }
 0x5b5   : > { %v2786_v32 = vadd.f32 %v4181_v31, %v2744_v54  ;;  %v1930_v54 = vld [vmem:[%s5002_s7 + $0x4c0] sm:$0xff] }
 0x5b6   : > { %v2783_v29 = vpop.f32.mrf.mxu3  ;;  %2883 = vmatpush.msrb.mxu1 %v1930_v54  ;;  %v1957_v54 = vld [vmem:[%s5002_s7 + $0x598] sm:$0xff] }
 0x5b7   : > { %v5384_v39 = vadd.f32 %v2789_v33, %v2786_v32  ;;  %v1794_v32 = vld [vmem:[%s5002_s7 + $0x80] sm:$0xff] }
 0x5b8   : > { %v2763_v30 = vpop.f32.mrf.mxu2  ;;  %v1922_v33 = vld [vmem:[%s5002_s7 + $0x480] sm:$0xff]  ;;  %2864 = vmatpush.msrb.mxu0 %v1794_v32  ;;  %v1812_v32 = vld [vmem:[%s5002_s7 + $0x110] sm:$0xff] }
 0x5b9   : > { %v2784_v34 = vadd.f32 %v2783_v29, %v2763_v30  ;;  %v1803_v29 = vld [vmem:[%s5002_s7 + $0xc8] sm:$0xff]  ;;  %2884 = vmatpush.msrb.mxu1 %v1922_v33  ;;  %v1940_v33 = vld [vmem:[%s5002_s7 + $0x510] sm:$0xff] }
 0x5ba   : > { %v1931_v30 = vld [vmem:[%s5002_s7 + $0x4c8] sm:$0xff]  ;;  %2903 = vmatpush.msrb.mxu2 %v1803_v29  ;;  %v1948_v29 = vld [vmem:[%s5002_s7 + $0x550] sm:$0xff] }
 0x5bb   : > { %v2787_v37 = vadd.f32 %v4182_v36, %v2784_v34  ;;  %v1795_v34 = vld [vmem:[%s5002_s7 + $0x88] sm:$0xff]  ;;  %2923 = vmatpush.msrb.mxu3 %v1931_v30  ;;  %2885 = vmatpush.msrb.mxu1 %v1914_v42  ;;  %v1821_v30 = vld [vmem:[%s5002_s7 + $0x158] sm:$0xff]  ;;  %v1932_v42 = vld [vmem:[%s5002_s7 + $0x4d0] sm:$0xff] }
 0x5bc   : > { %2904 = vmatpush.msrb.mxu2 %v1795_v34  ;;  %v1813_v34 = vld [vmem:[%s5002_s7 + $0x118] sm:$0xff] }
 0x5bd   : > { %v5386_v40 = vadd.f32 %v2790_v35, %v2787_v37  ;;  %v1923_v35 = vld [vmem:[%s5002_s7 + $0x488] sm:$0xff]  ;;  %2886 = vmatpush.msrb.mxu1 %v1906_v46  ;;  %v1925_v46 = vld [vmem:[%s5002_s7 + $0x498] sm:$0xff] }
 0x5be   : > { %2924 = vmatpush.msrb.mxu3 %v1923_v35  ;;  %2905 = vmatpush.msrb.mxu2 %v1787_v23  ;;  %v1941_v35 = vld [vmem:[%s5002_s7 + $0x518] sm:$0xff] }
 0x5bf   : > { %v2795_v41 = vadd.f32 %v5386_v40, %v5384_v39  ;;  %2951 = vmatpush.msra.mxu1 %v2028_v55  ;;  %v1805_v23 = vld [vmem:[%s5002_s7 + $0xd8] sm:$0xff]  ;;  %v1780_v55 = vld [vmem:[%s5002_s7 + $0x10] sm:$0xff] }
 0x5c0   : > { %2925 = vmatpush.msrb.mxu3 %v1915_v43  ;;  %2906 = vmatpush.msrb.mxu2 %v1779_v49  ;;  %v1933_v43 = vld [vmem:[%s5002_s7 + $0x4d8] sm:$0xff]  ;;  %v1788_v49 = vld [vmem:[%s5002_s7 + $0x50] sm:$0xff] }
 0x5c1   : > { %2796 = vadd.xlane.f32.xlu0 %v2795_v41  ;;  %v1786_v41 = vld [vmem:[%s5002_s7 + $0x40] sm:$0xff]  ;;  %2952 = vmatpush.msra.mxu1 %v2020_v59 }
 0x5c2   : > { %2865 = vmatpush.msrb.mxu0 %v1786_v41  ;;  %2926 = vmatpush.msrb.mxu3 %v1907_v51  ;;  %v1804_v41 = vld [vmem:[%s5002_s7 + $0xd0] sm:$0xff]  ;;  %v1789_v51 = vld [vmem:[%s5002_s7 + $0x58] sm:$0xff] }
 0x5c3   : > { %2971 = vmatpush.msra.mxu2 %v1901_v56  ;;  %2953 = vmatpush.msra.mxu1 %v2012_v62  ;;  %v1908_v56 = vld [vmem:[%s5002_s7 + $0x410] sm:$0xff] }
 0x5c4   : > { %2866 = vmatpush.msrb.mxu0 %v1778_v45  ;;  %2991 = vmatpush.msra.mxu3 %v2029_v57  ;;  %v1797_v45 = vld [vmem:[%s5002_s7 + $0x98] sm:$0xff] }
 0x5c5   : > { %2972 = vmatpush.msra.mxu2 %v1893_v47  ;;  %2954 = vmatpush.msra.mxu1 %v2004_v3  ;;  %v1781_v57 = vld [vmem:[%s5002_s7 + $0x18] sm:$0xff] }
 0x5c6   : > { %2931 = vmatpush.msra.mxu0 %v1900_v52  ;;  %2992 = vmatpush.msra.mxu3 %v2021_v48  ;;  %v1917_v52 = vld [vmem:[%s5002_s7 + $0x458] sm:$0xff] }
 0x5c7   : > { %2973 = vmatpush.msra.mxu2 %v1885_v63  ;;  %2955 = vmatpush.msra.mxu1 %v1996_v7 }
 0x5c8   : > { %2932 = vmatpush.msra.mxu0 %v1892_v58  ;;  %2993 = vmatpush.msra.mxu3 %v2013_v0  ;;  %v1909_v58 = vld [vmem:[%s5002_s7 + $0x418] sm:$0xff] }
 0x5c9   : > { %2974 = vmatpush.msra.mxu2 %v1877_v4  ;;  %2956 = vmatpush.msra.mxu1 %v1988_v11  ;;  %v1777_v4 = vld [vmem:[%s1038_s16] sm:$0x3] }
 0x5ca   : > { %2933 = vmatpush.msra.mxu0 %v1884_v61  ;;  %2994 = vmatpush.msra.mxu3 %v2005_v5 }
 0x5cb   : > { %2975 = vmatpush.msra.mxu2 %v1869_v8  ;;  %2957 = vmatpush.msra.mxu1 %v1980_v15 }
 0x5cc   : > { %2934 = vmatpush.msra.mxu0 %v1876_v1  ;;  %2995 = vmatpush.msra.mxu3 %v1997_v9  ;;  %v1776_v1 = vld [vmem:[%s1034_s14] sm:$0x3]  ;;  %v2828_v9 = vperm.slane %v1777_v4, 0  ;;  %s6191_s14 = sld [smem:[#allocation23_spill]] }
 0x5cd   : > { %2976 = vmatpush.msra.mxu2 %v1861_v12  ;;  %2958 = vmatpush.msra.mxu1 %v1972_v20  ;;  %v2822_v7 = vperm.slane %v1776_v1, 1  ;;  %v1903_v20 = vld [vmem:[%s5002_s7 + $0x3e8] sm:$0xff] }
 0x5ce   : > { %2935 = vmatpush.msra.mxu0 %v1868_v6  ;;  %2996 = vmatpush.msra.mxu3 %v1989_v13  ;;  %v2821_v6 = vperm.slane %v1776_v1, 0  ;;  %v1815_v1 = vld [vmem:[%s5002_s7 + $0x128] sm:$0xff] }
 0x5cf   : > { %2977 = vmatpush.msra.mxu2 %v1853_v17  ;;  %2959 = vmatpush.msra.mxu1 %v1964_v22  ;;  %v1886_v22 = vld [vmem:[%s5002_s7 + $0x360] sm:$0xff] }
 0x5d0   : > { %2936 = vmatpush.msra.mxu0 %v1860_v10  ;;  %2997 = vmatpush.msra.mxu3 %v1981_v18  ;;  %v2829_v10 = vperm.slane %v1777_v4, 1  ;;  %v1902_v18 = vld [vmem:[%s5002_s7 + $0x3e0] sm:$0xff] }
 0x5d1   : > { %2978 = vmatpush.msra.mxu2 %v1845_v60  ;;  %2960 = vmatpush.msra.mxu1 %v1956_v27  ;;  %v2022_v60 = vld [vmem:[%s5002_s7 + $0x7a0] sm:$0xff] }
 0x5d2   : > { %2937 = vmatpush.msra.mxu0 %v1852_v14  ;;  %2998 = vmatpush.msra.mxu3 %v1973_v21  ;;  %v1895_v21 = vld [vmem:[%s5002_s7 + $0x3a8] sm:$0xff]  ;;  %v1878_v27 = vld [vmem:[%s5002_s7 + $0x320] sm:$0xff]  ;;  %p3982_p5 = scmp.ne.s32.totalorder %s6191_s14, 1 }
 0x5d3   : > { %2979 = vmatpush.msra.mxu2 %v1837_v25  ;;  %2961 = vmatpush.msra.mxu1 %v1948_v29  ;;  %v2014_v25 = vld [vmem:[%s5002_s7 + $0x760] sm:$0xff]  ;;  %s6192_s20 = sld [smem:[#allocation49_spill]] (!%p3982_p5) }
 0x5d4   : > { %2938 = vmatpush.msra.mxu0 %v1844_v19  ;;  %2999 = vmatpush.msra.mxu3 %v1965_v26  ;;  %v2030_v19 = vld [vmem:[%s5002_s7 + $0x7e0] sm:$0xff]  ;;  %v1887_v26 = vld [vmem:[%s5002_s7 + $0x368] sm:$0xff]  ;;  %s6193_s18 = sld [smem:[#allocation50_spill]] (!%p3982_p5) }
 0x5d5   : > { %2980 = vmatpush.msra.mxu2 %v1829_v53  ;;  %2962 = vmatpush.msra.mxu1 %v1940_v33  ;;  %v2006_v53 = vld [vmem:[%s5002_s7 + $0x720] sm:$0xff] }
 0x5d6   : > { %2939 = vmatpush.msra.mxu0 %v1836_v2  ;;  %3000 = vmatpush.msra.mxu3 %v1957_v54  ;;  %v2023_v2 = vld [vmem:[%s5002_s7 + $0x7a8] sm:$0xff]  ;;  %v1870_v29 = vld [vmem:[%s5002_s7 + $0x2e0] sm:$0xff] }
 0x5d7   : > { %2981 = vmatpush.msra.mxu2 %v1821_v30  ;;  %2963 = vmatpush.msra.mxu1 %v1932_v42  ;;  %v1879_v54 = vld [vmem:[%s5002_s7 + $0x328] sm:$0xff]  ;;  %v1998_v30 = vld [vmem:[%s5002_s7 + $0x6e0] sm:$0xff] }
 0x5d8   : > { %2940 = vmatpush.msra.mxu0 %v1828_v16  ;;  %v2015_v16 = vld [vmem:[%s5002_s7 + $0x768] sm:$0xff]  ;;  %v1862_v33 = vld [vmem:[%s5002_s7 + $0x2a0] sm:$0xff] }
 0x5d9   : > { %2982 = vmatpush.msra.mxu2 %v1813_v34  ;;  %v1990_v34 = vld [vmem:[%s5002_s7 + $0x6a0] sm:$0xff] }
 0x5da   : > { %v1854_v42 = vld [vmem:[%s5002_s7 + $0x260] sm:$0xff] }
 0x5db   : > { %2983 = vmatpush.msra.mxu2 %v1805_v23  ;;  %v1982_v23 = vld [vmem:[%s5002_s7 + $0x660] sm:$0xff] }
 0x5dc   : > { %v1806_v4 = vld [vmem:[%s5002_s7 + $0xe0] sm:$0xff] }
 0x5dd   : > { %2984 = vmatpush.msra.mxu2 %v1797_v45  ;;  %v1974_v45 = vld [vmem:[%s5002_s7 + $0x620] sm:$0xff] }
 0x5df   : > { %2985 = vmatpush.msra.mxu2 %v1789_v51  ;;  %v1966_v51 = vld [vmem:[%s5002_s7 + $0x5e0] sm:$0xff] }
 0x5e1   : > { %2986 = vmatpush.msra.mxu2 %v1781_v57  ;;  %v1958_v57 = vld [vmem:[%s5002_s7 + $0x5a0] sm:$0xff] }
 0x634   : > { %v2797_v28 = vpop.xlane.xlu0 %2796 }
 0x635   : > { %v2798_v31 = vmul.f32 %v2797_v28, %v5114_v38  ;;  %v1820_v28 = vld [vmem:[%s5002_s7 + $0x150] sm:$0xff] }
 0x636   : > { %2941 = vmatpush.msra.mxu0 %v1820_v28  ;;  %v2007_v28 = vld [vmem:[%s5002_s7 + $0x728] sm:$0xff] }
 0x637   : > { %v5448_v36 = vsub.f32 %v5384_v39, %v2798_v31  ;;  %v5451_v37 = vsub.f32 %v5386_v40, %v2798_v31  ;;  %v1949_v31 = vld [vmem:[%s5002_s7 + $0x558] sm:$0xff] }
 0x638   : > { %3001 = vmatpush.msra.mxu3 %v1949_v31  ;;  %2942 = vmatpush.msra.mxu0 %v1812_v32  ;;  %v1871_v31 = vld [vmem:[%s5002_s7 + $0x2e8] sm:$0xff] }
 0x639   : > { %v2801_v24 = vmul.f32 %v5448_v36, %v5448_v36  ;;  %v2802_v44 = vmul.f32 %v5451_v37, %v5451_v37  ;;  %v1999_v32 = vld [vmem:[%s5002_s7 + $0x6e8] sm:$0xff] }
 0x63a   : > { %3002 = vmatpush.msra.mxu3 %v1941_v35  ;;  %2943 = vmatpush.msra.mxu0 %v1804_v41  ;;  %v1863_v35 = vld [vmem:[%s5002_s7 + $0x2a8] sm:$0xff] }
 0x63b   : > { %v2803_v50 = vadd.f32 %v2802_v44, %v2801_v24  ;;  %v1796_v24 = vld [vmem:[%s5002_s7 + $0x90] sm:$0xff]  ;;  %v1991_v41 = vld [vmem:[%s5002_s7 + $0x6a8] sm:$0xff] }
 0x63c   : > { %3003 = vmatpush.msra.mxu3 %v1933_v43  ;;  %v1924_v44 = vld [vmem:[%s5002_s7 + $0x490] sm:$0xff]  ;;  %2944 = vmatpush.msra.mxu0 %v1796_v24  ;;  %v1855_v43 = vld [vmem:[%s5002_s7 + $0x268] sm:$0xff] }
 0x63d   : > { %2804 = vadd.xlane.f32.xlu1 %v2803_v50  ;;  %2964 = vmatpush.msra.mxu1 %v1924_v44  ;;  %v1916_v50 = vld [vmem:[%s5002_s7 + $0x450] sm:$0xff]  ;;  %v1983_v24 = vld [vmem:[%s5002_s7 + $0x668] sm:$0xff]  ;;  %v1846_v44 = vld [vmem:[%s5002_s7 + $0x220] sm:$0xff] }
 0x63e   : > { %3004 = vmatpush.msra.mxu3 %v1925_v46  ;;  %2945 = vmatpush.msra.mxu0 %v1788_v49  ;;  %v1847_v46 = vld [vmem:[%s5002_s7 + $0x228] sm:$0xff] }
 0x63f   : > { %2965 = vmatpush.msra.mxu1 %v1916_v50  ;;  %v1975_v49 = vld [vmem:[%s5002_s7 + $0x628] sm:$0xff]  ;;  %v1838_v50 = vld [vmem:[%s5002_s7 + $0x1e0] sm:$0xff] }
 0x640   : > { %3005 = vmatpush.msra.mxu3 %v1917_v52  ;;  %2946 = vmatpush.msra.mxu0 %v1780_v55  ;;  %v1839_v52 = vld [vmem:[%s5002_s7 + $0x1e8] sm:$0xff] }
 0x641   : > { %2966 = vmatpush.msra.mxu1 %v1908_v56  ;;  %v1967_v55 = vld [vmem:[%s5002_s7 + $0x5e8] sm:$0xff]  ;;  %v1830_v56 = vld [vmem:[%s5002_s7 + $0x1a0] sm:$0xff] }
 0x642   : > { %3006 = vmatpush.msra.mxu3 %v1909_v58  ;;  %v1831_v58 = vld [vmem:[%s5002_s7 + $0x1a8] sm:$0xff] }
 0x6b0   : > { %v2805_v59 = vpop.xlane.xlu1 %2804 }
 0x6b1   : > { %v2806_v47 = vmul.f32 %v2805_v59, %v5114_v38  ;;  %v1959_v59 = vld [vmem:[%s5002_s7 + $0x5a8] sm:$0xff] }
 0x6b3   : > { %v2807_v48 = vadd.f32 1e-06, %v2806_v47  ;;  %v1822_v47 = vld [vmem:[%s5002_s7 + $0x160] sm:$0xff] }
 0x6b5   : > { %4163 = vrsqrt.f32 %v2807_v48  ;;  %vm2814_vm11 = vweird.f32 %v2807_v48 }
 0x6bb   : > { %v4164_v61 = vpop.eup %4163 }
 0x6bc   : > { %v2809_v62 = vmul.f32 %v4164_v61, %v2807_v48  ;;  %vm2815_vm10 = vweird.f32 %v4164_v61  ;;  %v1950_v48 = vld [vmem:[%s5002_s7 + $0x560] sm:$0xff] }
 0x6bd   : > { %vm2816_vm12 = vmor %vm2814_vm11, %vm2815_vm10 }
 0x6be   : > { %v2810_v63 = vmul.f32 %v4164_v61, %v2809_v62  ;;  %v1951_v62 = vld [vmem:[%s5002_s7 + $0x568] sm:$0xff] }
 0x6c0   : > { %v2811_v0 = vmul.f32 0.5, %v2810_v63  ;;  %v1814_v63 = vld [vmem:[%s5002_s7 + $0x120] sm:$0xff] }
 0x6c2   : > { %v2812_v3 = vsub.f32 1.5, %v2811_v0  ;;  %v1942_v0 = vld [vmem:[%s5002_s7 + $0x520] sm:$0xff] }
 0x6c4   : > { %v2813_v5 = vmul.f32 %v4164_v61, %v2812_v3  ;;  %v1943_v3 = vld [vmem:[%s5002_s7 + $0x528] sm:$0xff] }
 0x6c6   : > { %v2817_v8 = vsel %vm2816_vm12, %v4164_v61, %v2813_v5  ;;  %v1823_v61 = vld [vmem:[%s5002_s7 + $0x168] sm:$0xff]  ;;  %v1934_v5 = vld [vmem:[%s5002_s7 + $0x4e0] sm:$0xff] }
 0x6c7   : > { %v2818_v11 = vmul.f32 %v2817_v8, %v5448_v36  ;;  %v2819_v12 = vmul.f32 %v2817_v8, %v5451_v37  ;;  %v2031_v36 = vld [vmem:[%s5002_s7 + $0x7e8] sm:$0xff]  ;;  %v1894_v37 = vld [vmem:[%s5002_s7 + $0x3a0] sm:$0xff] }
 0x6c8   : > { %v1798_v8 = vld [vmem:[%s5002_s7 + $0xa0] sm:$0xff] }
 0x6c9   : > { %v2825_v13 = vmul.f32 %v2821_v6, %v2818_v11  ;;  %v2826_v14 = vmul.f32 %v2822_v7, %v2819_v12  ;;  %v1807_v6 = vld [vmem:[%s5002_s7 + $0xe8] sm:$0xff]  ;;  %v1790_v12 = vld [vmem:[%s5002_s7 + $0x60] sm:$0xff] }
 0x6ca   : > { %v1935_v7 = vld [vmem:[%s5002_s7 + $0x4e8] sm:$0xff] }
 0x6cb   : > { %v5542_v15 = vadd.f32 %v2828_v9, %v2825_v13  ;;  %v5544_v17 = vadd.f32 %v2829_v10, %v2826_v14  ;;  %v1926_v9 = vld [vmem:[%s5002_s7 + $0x4a0] sm:$0xff]  ;;  %v1799_v10 = vld [vmem:[%s5002_s7 + $0xa8] sm:$0xff] }
 0x6cc   : > { %v1927_v11 = vld [vmem:[%s5002_s7 + $0x4a8] sm:$0xff]  ;;  %v1918_v13 = vld [vmem:[%s5002_s7 + $0x460] sm:$0xff] }
 0x6cd   : > { %2867 = vmatmul.f32.vlgmr.msrb.gmra.mxu0 %v5542_v15  ;;  %2887 = vmatmul.f32.vlgmr.msrb.gmra.mxu1 %v5544_v17  ;;  %v1791_v14 = vld [vmem:[%s5002_s7 + $0x68] sm:$0xff] }
 0x6ce   : > { %2907 = vmatmul.f32.vlgmr.msrb.gmra.mxu2 %v5542_v15  ;;  %2927 = vmatmul.f32.vlgmr.msrb.gmra.mxu3 %v5544_v17 }
 0x6cf   : > { %3011 = vmatpush.msrb.mxu0 %v1902_v18  ;;  %3031 = vmatpush.msrb.mxu1 %v2030_v19  ;;  %v1919_v18 = vld [vmem:[%s5002_s7 + $0x468] sm:$0xff]  ;;  %v1782_v19 = vld [vmem:[%s5002_s7 + $0x20] sm:$0xff] }
 0x6d0   : > { %3051 = vmatpush.msrb.mxu2 %v1903_v20  ;;  %3071 = vmatpush.msrb.mxu3 %v2031_v36  ;;  %v1910_v20 = vld [vmem:[%s5002_s7 + $0x420] sm:$0xff]  ;;  %v1783_v36 = vld [vmem:[%s5002_s7 + $0x28] sm:$0xff] }
 0x6d1   : > { %3012 = vmatpush.msrb.mxu0 %v1894_v37  ;;  %3032 = vmatpush.msrb.mxu1 %v2022_v60  ;;  %v1911_v37 = vld [vmem:[%s5002_s7 + $0x428] sm:$0xff]  ;;  %v1904_v60 = vld [vmem:[%s5002_s7 + $0x3f0] sm:$0xff] }
 0x6d2   : > { %3052 = vmatpush.msrb.mxu2 %v1895_v21  ;;  %3072 = vmatpush.msrb.mxu3 %v2023_v2  ;;  %v2032_v21 = vld [vmem:[%s5002_s7 + $0x7f0] sm:$0xff]  ;;  %v1905_v2 = vld [vmem:[%s5002_s7 + $0x3f8] sm:$0xff] }
 0x6d3   : > { %3013 = vmatpush.msrb.mxu0 %v1886_v22  ;;  %3033 = vmatpush.msrb.mxu1 %v2014_v25  ;;  %v2033_v22 = vld [vmem:[%s5002_s7 + $0x7f8] sm:$0xff]  ;;  %v1896_v25 = vld [vmem:[%s5002_s7 + $0x3b0] sm:$0xff] }
 0x6d4   : > { %3053 = vmatpush.msrb.mxu2 %v1887_v26  ;;  %3073 = vmatpush.msrb.mxu3 %v2015_v16  ;;  %v2024_v26 = vld [vmem:[%s5002_s7 + $0x7b0] sm:$0xff]  ;;  %v1897_v16 = vld [vmem:[%s5002_s7 + $0x3b8] sm:$0xff] }
 0x6d5   : > { %3014 = vmatpush.msrb.mxu0 %v1878_v27  ;;  %3034 = vmatpush.msrb.mxu1 %v2006_v53  ;;  %v2025_v27 = vld [vmem:[%s5002_s7 + $0x7b8] sm:$0xff]  ;;  %v1888_v53 = vld [vmem:[%s5002_s7 + $0x370] sm:$0xff] }
 0x6d6   : > { %3054 = vmatpush.msrb.mxu2 %v1879_v54  ;;  %3074 = vmatpush.msrb.mxu3 %v2007_v28  ;;  %v2016_v54 = vld [vmem:[%s5002_s7 + $0x770] sm:$0xff]  ;;  %v1889_v28 = vld [vmem:[%s5002_s7 + $0x378] sm:$0xff] }
 0x6d7   : > { %2947 = vmatmul.f32.vlgmr.msra.gmra.mxu0 %v5542_v15  ;;  %2967 = vmatmul.f32.vlgmr.msra.gmra.mxu1 %v5544_v17 }
 0x6d8   : > { %2987 = vmatmul.f32.vlgmr.msra.gmra.mxu2 %v5542_v15  ;;  %3007 = vmatmul.f32.vlgmr.msra.gmra.mxu3 %v5544_v17 }
 0x6d9   : > { %3015 = vmatpush.msrb.mxu0 %v1870_v29  ;;  %3035 = vmatpush.msrb.mxu1 %v1998_v30  ;;  %v2017_v29 = vld [vmem:[%s5002_s7 + $0x778] sm:$0xff]  ;;  %v1880_v30 = vld [vmem:[%s5002_s7 + $0x330] sm:$0xff] }
 0x6da   : > { %3055 = vmatpush.msrb.mxu2 %v1871_v31  ;;  %3075 = vmatpush.msrb.mxu3 %v1999_v32  ;;  %v2008_v31 = vld [vmem:[%s5002_s7 + $0x730] sm:$0xff]  ;;  %v1881_v32 = vld [vmem:[%s5002_s7 + $0x338] sm:$0xff] }
 0x6db   : > { %3016 = vmatpush.msrb.mxu0 %v1862_v33  ;;  %3036 = vmatpush.msrb.mxu1 %v1990_v34  ;;  %v2009_v33 = vld [vmem:[%s5002_s7 + $0x738] sm:$0xff]  ;;  %v1872_v34 = vld [vmem:[%s5002_s7 + $0x2f0] sm:$0xff] }
 0x6dc   : > { %3056 = vmatpush.msrb.mxu2 %v1863_v35  ;;  %3076 = vmatpush.msrb.mxu3 %v1991_v41  ;;  %v2000_v35 = vld [vmem:[%s5002_s7 + $0x6f0] sm:$0xff]  ;;  %v1873_v41 = vld [vmem:[%s5002_s7 + $0x2f8] sm:$0xff] }
 0x6dd   : > { %3017 = vmatpush.msrb.mxu0 %v1854_v42  ;;  %3037 = vmatpush.msrb.mxu1 %v1982_v23  ;;  %v2001_v42 = vld [vmem:[%s5002_s7 + $0x6f8] sm:$0xff]  ;;  %v1864_v23 = vld [vmem:[%s5002_s7 + $0x2b0] sm:$0xff] }
 0x6de   : > { %3057 = vmatpush.msrb.mxu2 %v1855_v43  ;;  %3077 = vmatpush.msrb.mxu3 %v1983_v24  ;;  %v1992_v43 = vld [vmem:[%s5002_s7 + $0x6b0] sm:$0xff]  ;;  %v1865_v24 = vld [vmem:[%s5002_s7 + $0x2b8] sm:$0xff] }
 0x6df   : > { %3018 = vmatpush.msrb.mxu0 %v1846_v44  ;;  %3038 = vmatpush.msrb.mxu1 %v1974_v45  ;;  %v1993_v44 = vld [vmem:[%s5002_s7 + $0x6b8] sm:$0xff]  ;;  %v1856_v45 = vld [vmem:[%s5002_s7 + $0x270] sm:$0xff] }
 0x6e0   : > { %3058 = vmatpush.msrb.mxu2 %v1847_v46  ;;  %3078 = vmatpush.msrb.mxu3 %v1975_v49  ;;  %v1984_v46 = vld [vmem:[%s5002_s7 + $0x670] sm:$0xff]  ;;  %v1857_v49 = vld [vmem:[%s5002_s7 + $0x278] sm:$0xff] }
 0x6e1   : > { %3019 = vmatpush.msrb.mxu0 %v1838_v50  ;;  %3039 = vmatpush.msrb.mxu1 %v1966_v51  ;;  %v1985_v50 = vld [vmem:[%s5002_s7 + $0x678] sm:$0xff]  ;;  %v1848_v51 = vld [vmem:[%s5002_s7 + $0x230] sm:$0xff] }
 0x6e2   : > { %3059 = vmatpush.msrb.mxu2 %v1839_v52  ;;  %3079 = vmatpush.msrb.mxu3 %v1967_v55  ;;  %v1976_v52 = vld [vmem:[%s5002_s7 + $0x630] sm:$0xff]  ;;  %v1849_v55 = vld [vmem:[%s5002_s7 + $0x238] sm:$0xff] }
 0x6e3   : > { %3020 = vmatpush.msrb.mxu0 %v1830_v56  ;;  %3040 = vmatpush.msrb.mxu1 %v1958_v57  ;;  %v1977_v56 = vld [vmem:[%s5002_s7 + $0x638] sm:$0xff]  ;;  %v1840_v57 = vld [vmem:[%s5002_s7 + $0x1f0] sm:$0xff] }
 0x6e4   : > { %3060 = vmatpush.msrb.mxu2 %v1831_v58  ;;  %3080 = vmatpush.msrb.mxu3 %v1959_v59  ;;  %v1968_v58 = vld [vmem:[%s5002_s7 + $0x5f0] sm:$0xff]  ;;  %v1841_v59 = vld [vmem:[%s5002_s7 + $0x1f8] sm:$0xff] }
 0x6e5   : > { %3021 = vmatpush.msrb.mxu0 %v1822_v47  ;;  %3041 = vmatpush.msrb.mxu1 %v1950_v48  ;;  %v1969_v47 = vld [vmem:[%s5002_s7 + $0x5f8] sm:$0xff]  ;;  %v1832_v48 = vld [vmem:[%s5002_s7 + $0x1b0] sm:$0xff] }
 0x6e6   : > { %3061 = vmatpush.msrb.mxu2 %v1823_v61  ;;  %3081 = vmatpush.msrb.mxu3 %v1951_v62  ;;  %v1960_v61 = vld [vmem:[%s5002_s7 + $0x5b0] sm:$0xff]  ;;  %v1833_v62 = vld [vmem:[%s5002_s7 + $0x1b8] sm:$0xff] }
 0x6e7   : > { %3022 = vmatpush.msrb.mxu0 %v1814_v63  ;;  %3042 = vmatpush.msrb.mxu1 %v1942_v0  ;;  %v1961_v63 = vld [vmem:[%s5002_s7 + $0x5b8] sm:$0xff]  ;;  %v1824_v0 = vld [vmem:[%s5002_s7 + $0x170] sm:$0xff] }
 0x6e8   : > { %3062 = vmatpush.msrb.mxu2 %v1815_v1  ;;  %3082 = vmatpush.msrb.mxu3 %v1943_v3  ;;  %v1952_v1 = vld [vmem:[%s5002_s7 + $0x570] sm:$0xff]  ;;  %v1825_v3 = vld [vmem:[%s5002_s7 + $0x178] sm:$0xff] }
 0x6e9   : > { %3023 = vmatpush.msrb.mxu0 %v1806_v4  ;;  %3043 = vmatpush.msrb.mxu1 %v1934_v5  ;;  %v1953_v4 = vld [vmem:[%s5002_s7 + $0x578] sm:$0xff]  ;;  %v1816_v5 = vld [vmem:[%s5002_s7 + $0x130] sm:$0xff] }
 0x6ea   : > { %3063 = vmatpush.msrb.mxu2 %v1807_v6  ;;  %3083 = vmatpush.msrb.mxu3 %v1935_v7  ;;  %v1944_v6 = vld [vmem:[%s5002_s7 + $0x530] sm:$0xff]  ;;  %v1817_v7 = vld [vmem:[%s5002_s7 + $0x138] sm:$0xff] }
 0x6eb   : > { %3024 = vmatpush.msrb.mxu0 %v1798_v8  ;;  %3044 = vmatpush.msrb.mxu1 %v1926_v9  ;;  %v1945_v8 = vld [vmem:[%s5002_s7 + $0x538] sm:$0xff]  ;;  %v1808_v9 = vld [vmem:[%s5002_s7 + $0xf0] sm:$0xff] }
 0x6ec   : > { %3064 = vmatpush.msrb.mxu2 %v1799_v10  ;;  %3084 = vmatpush.msrb.mxu3 %v1927_v11  ;;  %v1936_v10 = vld [vmem:[%s5002_s7 + $0x4f0] sm:$0xff]  ;;  %v1809_v11 = vld [vmem:[%s5002_s7 + $0xf8] sm:$0xff] }
 0x6ed   : > { %3025 = vmatpush.msrb.mxu0 %v1790_v12  ;;  %3045 = vmatpush.msrb.mxu1 %v1918_v13  ;;  %v1937_v12 = vld [vmem:[%s5002_s7 + $0x4f8] sm:$0xff]  ;;  %v1800_v13 = vld [vmem:[%s5002_s7 + $0xb0] sm:$0xff] }
 0x6ee   : > { %3065 = vmatpush.msrb.mxu2 %v1791_v14  ;;  %3085 = vmatpush.msrb.mxu3 %v1919_v18  ;;  %v1928_v14 = vld [vmem:[%s5002_s7 + $0x4b0] sm:$0xff]  ;;  %v1801_v18 = vld [vmem:[%s5002_s7 + $0xb8] sm:$0xff] }
 0x6ef   : > { %3026 = vmatpush.msrb.mxu0 %v1782_v19  ;;  %3046 = vmatpush.msrb.mxu1 %v1910_v20  ;;  %v1929_v19 = vld [vmem:[%s5002_s7 + $0x4b8] sm:$0xff]  ;;  %v1792_v20 = vld [vmem:[%s5002_s7 + $0x70] sm:$0xff] }
 0x6f0   : > { %3066 = vmatpush.msrb.mxu2 %v1783_v36  ;;  %3086 = vmatpush.msrb.mxu3 %v1911_v37  ;;  %v1920_v36 = vld [vmem:[%s5002_s7 + $0x470] sm:$0xff]  ;;  %v1793_v37 = vld [vmem:[%s5002_s7 + $0x78] sm:$0xff] }
 0x6f1   : > { %3027 = vmatmul.f32.vlgmr.msrb.gmra.mxu0 %v5542_v15  ;;  %3047 = vmatmul.f32.vlgmr.msrb.gmra.mxu1 %v5544_v17 }
 0x6f2   : > { %3067 = vmatmul.f32.vlgmr.msrb.gmra.mxu2 %v5542_v15  ;;  %3087 = vmatmul.f32.vlgmr.msrb.gmra.mxu3 %v5544_v17 }
 0x6f3   : > { %3091 = vmatpush.msra.mxu0 %v1904_v60  ;;  %3111 = vmatpush.msra.mxu1 %v2032_v21  ;;  %v1921_v60 = vld [vmem:[%s5002_s7 + $0x478] sm:$0xff]  ;;  %v1784_v21 = vld [vmem:[%s5002_s7 + $0x30] sm:$0xff] }
 0x6f4   : > { %3131 = vmatpush.msra.mxu2 %v1905_v2  ;;  %3151 = vmatpush.msra.mxu3 %v2033_v22  ;;  %v1912_v2 = vld [vmem:[%s5002_s7 + $0x430] sm:$0xff]  ;;  %v1785_v22 = vld [vmem:[%s5002_s7 + $0x38] sm:$0xff] }
 0x6f5   : > { %3092 = vmatpush.msra.mxu0 %v1896_v25  ;;  %3112 = vmatpush.msra.mxu1 %v2024_v26  ;;  %v1913_v25 = vld [vmem:[%s5002_s7 + $0x438] sm:$0xff]  ;;  %v2065_v26 = vld [vmem:[%s5006_s24 + $0xf0] sm:$0xff] }
 0x6f6   : > { %3132 = vmatpush.msra.mxu2 %v1897_v16  ;;  %3152 = vmatpush.msra.mxu3 %v2025_v27  ;;  %v2097_v16 = vld [vmem:[%s5006_s24 + $0x1f0] sm:$0xff] }
 0x6f7   : > { %3093 = vmatpush.msra.mxu0 %v1888_v53  ;;  %3113 = vmatpush.msra.mxu1 %v2016_v54  ;;  %v2129_v27 = vld [vmem:[%s5006_s24 + $0x2f0] sm:$0xff]  ;;  %v2063_v53 = vld [vmem:[%s5006_s24 + $0xe0] sm:$0xff] }
 0x6f8   : > { %3133 = vmatpush.msra.mxu2 %v1889_v28  ;;  %3153 = vmatpush.msra.mxu3 %v2017_v29  ;;  %v2095_v54 = vld [vmem:[%s5006_s24 + $0x1e0] sm:$0xff]  ;;  %v2061_v29 = vld [vmem:[%s5006_s24 + $0xd0] sm:$0xff] }
 0x6f9   : > { %3094 = vmatpush.msra.mxu0 %v1880_v30  ;;  %3114 = vmatpush.msra.mxu1 %v2008_v31  ;;  %v2127_v28 = vld [vmem:[%s5006_s24 + $0x2e0] sm:$0xff]  ;;  %v2093_v30 = vld [vmem:[%s5006_s24 + $0x1d0] sm:$0xff] }
 0x6fa   : > { %3134 = vmatpush.msra.mxu2 %v1881_v32  ;;  %3154 = vmatpush.msra.mxu3 %v2009_v33  ;;  %v2059_v31 = vld [vmem:[%s5006_s24 + $0xc0] sm:$0xff]  ;;  %v2089_v32 = vld [vmem:[%s5006_s24 + $0x1b0] sm:$0xff] }
 0x6fb   : > { %3095 = vmatpush.msra.mxu0 %v1872_v34  ;;  %3115 = vmatpush.msra.mxu1 %v2000_v35  ;;  %v2055_v33 = vld [vmem:[%s5006_s24 + $0xa0] sm:$0xff]  ;;  %v2053_v35 = vld [vmem:[%s5006_s24 + $0x90] sm:$0xff] }
 0x6fc   : > { %3135 = vmatpush.msra.mxu2 %v1873_v41  ;;  %3155 = vmatpush.msra.mxu3 %v2001_v42  ;;  %v2087_v34 = vld [vmem:[%s5006_s24 + $0x1a0] sm:$0xff]  ;;  %v2085_v41 = vld [vmem:[%s5006_s24 + $0x190] sm:$0xff] }
 0x6fd   : > { %3096 = vmatpush.msra.mxu0 %v1864_v23  ;;  %3116 = vmatpush.msra.mxu1 %v1992_v43  ;;  %v2051_v42 = vld [vmem:[%s5006_s24 + $0x80] sm:$0xff]  ;;  %v2049_v43 = vld [vmem:[%s5006_s24 + $0x70] sm:$0xff] }
 0x6fe   : > { %3136 = vmatpush.msra.mxu2 %v1865_v24  ;;  %3156 = vmatpush.msra.mxu3 %v1993_v44  ;;  %v2083_v23 = vld [vmem:[%s5006_s24 + $0x180] sm:$0xff]  ;;  %v2081_v24 = vld [vmem:[%s5006_s24 + $0x170] sm:$0xff] }
 0x6ff   : > { %3097 = vmatpush.msra.mxu0 %v1856_v45  ;;  %3117 = vmatpush.msra.mxu1 %v1984_v46  ;;  %v2047_v44 = vld [vmem:[%s5006_s24 + $0x60] sm:$0xff]  ;;  %v2045_v46 = vld [vmem:[%s5006_s24 + $0x50] sm:$0xff] }
 0x700   : > { %3137 = vmatpush.msra.mxu2 %v1857_v49  ;;  %3157 = vmatpush.msra.mxu3 %v1985_v50  ;;  %v2079_v45 = vld [vmem:[%s5006_s24 + $0x160] sm:$0xff]  ;;  %v2077_v49 = vld [vmem:[%s5006_s24 + $0x150] sm:$0xff] }
 0x701   : > { %3098 = vmatpush.msra.mxu0 %v1848_v51  ;;  %3118 = vmatpush.msra.mxu1 %v1976_v52  ;;  %v2043_v50 = vld [vmem:[%s5006_s24 + $0x40] sm:$0xff]  ;;  %v2041_v52 = vld [vmem:[%s5006_s24 + $0x30] sm:$0xff] }
 0x702   : > { %3138 = vmatpush.msra.mxu2 %v1849_v55  ;;  %3158 = vmatpush.msra.mxu3 %v1977_v56  ;;  %v2075_v51 = vld [vmem:[%s5006_s24 + $0x140] sm:$0xff]  ;;  %v2073_v55 = vld [vmem:[%s5006_s24 + $0x130] sm:$0xff] }
 0x703   : > { %3099 = vmatpush.msra.mxu0 %v1840_v57  ;;  %3119 = vmatpush.msra.mxu1 %v1968_v58  ;;  %v2039_v56 = vld [vmem:[%s5006_s24 + $0x20] sm:$0xff]  ;;  %v2037_v58 = vld [vmem:[%s5006_s24 + $0x10] sm:$0xff] }
 0x704   : > { %3139 = vmatpush.msra.mxu2 %v1841_v59  ;;  %3159 = vmatpush.msra.mxu3 %v1969_v47  ;;  %v2071_v57 = vld [vmem:[%s5006_s24 + $0x120] sm:$0xff]  ;;  %v2193_v47 = vld [vmem:[%s5006_s24 + $0x4f0] sm:$0xff] }
 0x705   : > { %3100 = vmatpush.msra.mxu0 %v1832_v48  ;;  %3120 = vmatpush.msra.mxu1 %v1960_v61  ;;  %v2035_v59 = vld [vmem:[%s5006_s24] sm:$0xff]  ;;  %v2069_v48 = vld [vmem:[%s5006_s24 + $0x110] sm:$0xff] }
 0x706   : > { %3140 = vmatpush.msra.mxu2 %v1833_v62  ;;  %3160 = vmatpush.msra.mxu3 %v1961_v63  ;;  %v2191_v61 = vld [vmem:[%s5006_s24 + $0x4e0] sm:$0xff]  ;;  %v2125_v62 = vld [vmem:[%s5006_s24 + $0x2d0] sm:$0xff] }
 0x707   : > { %3101 = vmatpush.msra.mxu0 %v1824_v0  ;;  %3121 = vmatpush.msra.mxu1 %v1952_v1  ;;  %v2067_v63 = vld [vmem:[%s5006_s24 + $0x100] sm:$0xff]  ;;  %v2189_v0 = vld [vmem:[%s5006_s24 + $0x4d0] sm:$0xff] }
 0x708   : > { %3141 = vmatpush.msra.mxu2 %v1825_v3  ;;  %3161 = vmatpush.msra.mxu3 %v1953_v4  ;;  %v2123_v1 = vld [vmem:[%s5006_s24 + $0x2c0] sm:$0xff]  ;;  %v2161_v3 = vld [vmem:[%s5006_s24 + $0x3f0] sm:$0xff] }
 0x709   : > { %3102 = vmatpush.msra.mxu0 %v1816_v5  ;;  %3122 = vmatpush.msra.mxu1 %v1944_v6  ;;  %v2225_v4 = vld [vmem:[%s5006_s24 + $0x5f0] sm:$0xff]  ;;  %v2187_v5 = vld [vmem:[%s5006_s24 + $0x4c0] sm:$0xff] }
 0x70a   : > { %3142 = vmatpush.msra.mxu2 %v1817_v7  ;;  %3162 = vmatpush.msra.mxu3 %v1945_v8  ;;  %v2121_v6 = vld [vmem:[%s5006_s24 + $0x2b0] sm:$0xff]  ;;  %v2159_v7 = vld [vmem:[%s5006_s24 + $0x3e0] sm:$0xff] }
 0x70b   : > { %3103 = vmatpush.msra.mxu0 %v1808_v9  ;;  %3123 = vmatpush.msra.mxu1 %v1936_v10  ;;  %v2223_v8 = vld [vmem:[%s5006_s24 + $0x5e0] sm:$0xff]  ;;  %v2185_v9 = vld [vmem:[%s5006_s24 + $0x4b0] sm:$0xff] }
 0x70c   : > { %3143 = vmatpush.msra.mxu2 %v1809_v11  ;;  %3163 = vmatpush.msra.mxu3 %v1937_v12  ;;  %v2119_v10 = vld [vmem:[%s5006_s24 + $0x2a0] sm:$0xff]  ;;  %v2157_v11 = vld [vmem:[%s5006_s24 + $0x3d0] sm:$0xff] }
 0x70d   : > { %3104 = vmatpush.msra.mxu0 %v1800_v13  ;;  %3124 = vmatpush.msra.mxu1 %v1928_v14  ;;  %v2221_v12 = vld [vmem:[%s5006_s24 + $0x5d0] sm:$0xff]  ;;  %v2183_v13 = vld [vmem:[%s5006_s24 + $0x4a0] sm:$0xff] }
 0x70e   : > { %3144 = vmatpush.msra.mxu2 %v1801_v18  ;;  %3164 = vmatpush.msra.mxu3 %v1929_v19  ;;  %v2117_v14 = vld [vmem:[%s5006_s24 + $0x290] sm:$0xff]  ;;  %v2155_v18 = vld [vmem:[%s5006_s24 + $0x3c0] sm:$0xff] }
 0x70f   : > { %3105 = vmatpush.msra.mxu0 %v1792_v20  ;;  %3125 = vmatpush.msra.mxu1 %v1920_v36  ;;  %v2219_v19 = vld [vmem:[%s5006_s24 + $0x5c0] sm:$0xff]  ;;  %v2181_v20 = vld [vmem:[%s5006_s24 + $0x490] sm:$0xff] }
 0x710   : > { %3145 = vmatpush.msra.mxu2 %v1793_v37  ;;  %3165 = vmatpush.msra.mxu3 %v1921_v60  ;;  %v2115_v36 = vld [vmem:[%s5006_s24 + $0x280] sm:$0xff]  ;;  %v2153_v37 = vld [vmem:[%s5006_s24 + $0x3b0] sm:$0xff] }
 0x711   : > { %3106 = vmatpush.msra.mxu0 %v1784_v21  ;;  %3126 = vmatpush.msra.mxu1 %v1912_v2  ;;  %v2217_v60 = vld [vmem:[%s5006_s24 + $0x5b0] sm:$0xff]  ;;  %v2179_v21 = vld [vmem:[%s5006_s24 + $0x480] sm:$0xff] }
 0x712   : > { %3146 = vmatpush.msra.mxu2 %v1785_v22  ;;  %3166 = vmatpush.msra.mxu3 %v1913_v25  ;;  %v2113_v2 = vld [vmem:[%s5006_s24 + $0x270] sm:$0xff]  ;;  %v2151_v22 = vld [vmem:[%s5006_s24 + $0x3a0] sm:$0xff] }
 0x713   : > { %3107 = vmatmul.f32.vlgmr.msra.gmra.mxu0 %v5542_v15  ;;  %3127 = vmatmul.f32.vlgmr.msra.gmra.mxu1 %v5544_v17  ;;  %v2215_v25 = vld [vmem:[%s5006_s24 + $0x5a0] sm:$0xff] }
 0x714   : > { %3147 = vmatmul.f32.vlgmr.msra.gmra.mxu2 %v5542_v15  ;;  %3167 = vmatmul.f32.vlgmr.msra.gmra.mxu3 %v5544_v17  ;;  %v2091_v15 = vld [vmem:[%s5006_s24 + $0x1c0] sm:$0xff]  ;;  %v2057_v17 = vld [vmem:[%s5006_s24 + $0xb0] sm:$0xff] }
 0x715   : > { %3248 = vmatpush.msrb.mxu0 %v2065_v26  ;;  %3268 = vmatpush.msrb.mxu1 %v2097_v16  ;;  %v2177_v26 = vld [vmem:[%s5006_s24 + $0x470] sm:$0xff]  ;;  %v2111_v16 = vld [vmem:[%s5006_s24 + $0x260] sm:$0xff] }
 0x716   : > { %3288 = vmatpush.msrb.mxu2 %v2129_v27  ;;  %3308 = vmatpush.msrb.mxu3 %v2161_v3  ;;  %v2149_v27 = vld [vmem:[%s5006_s24 + $0x390] sm:$0xff]  ;;  %v2163_v3 = vld [vmem:[%s5006_s24 + $0x400] sm:$0xff] }
 0x717   : > { %3249 = vmatpush.msrb.mxu0 %v2063_v53  ;;  %3269 = vmatpush.msrb.mxu1 %v2095_v54  ;;  %v2213_v53 = vld [vmem:[%s5006_s24 + $0x590] sm:$0xff]  ;;  %v2175_v54 = vld [vmem:[%s5006_s24 + $0x460] sm:$0xff] }
 0x718   : > { %3289 = vmatpush.msrb.mxu2 %v2127_v28  ;;  %3309 = vmatpush.msrb.mxu3 %v2159_v7  ;;  %v2109_v28 = vld [vmem:[%s5006_s24 + $0x250] sm:$0xff] }
 0x719   : > { %3250 = vmatpush.msrb.mxu0 %v2061_v29  ;;  %3270 = vmatpush.msrb.mxu1 %v2093_v30  ;;  %v2147_v29 = vld [vmem:[%s5006_s24 + $0x380] sm:$0xff]  ;;  %v5759_v30 = vld [vmem:[%s5004_s12] sm:$0xff] }
 0x71a   : > { %3290 = vmatpush.msrb.mxu2 %v2125_v62  ;;  %3310 = vmatpush.msrb.mxu3 %v2157_v11  ;;  %v2836_v62 = vperm.slane %v5759_v30, 1  ;;  %v2837_v7 = vperm.slane %v5759_v30, 2  ;;  %v2253_v11 = vld [vmem:[%s5006_s24 + $0x6d0] sm:$0xff] }
 0x71b   : > { %3251 = vmatpush.msrb.mxu0 %v2059_v31  ;;  %3271 = vmatpush.msrb.mxu1 %v2091_v15  ;;  %v2211_v31 = vld [vmem:[%s5006_s24 + $0x580] sm:$0xff]  ;;  %v2173_v15 = vld [vmem:[%s5006_s24 + $0x450] sm:$0xff] }
 0x71c   : > { %3291 = vmatpush.msrb.mxu2 %v2123_v1  ;;  %3311 = vmatpush.msrb.mxu3 %v2155_v18  ;;  %v2195_v18 = vld [vmem:[%s5006_s24 + $0x500] sm:$0xff] }
 0x71d   : > { %3252 = vmatpush.msrb.mxu0 %v2057_v17  ;;  %3272 = vmatpush.msrb.mxu1 %v2089_v32  ;;  %v2107_v17 = vld [vmem:[%s5006_s24 + $0x240] sm:$0xff]  ;;  %v2145_v32 = vld [vmem:[%s5006_s24 + $0x370] sm:$0xff] }
 0x71e   : > { %3292 = vmatpush.msrb.mxu2 %v2121_v6  ;;  %3312 = vmatpush.msrb.mxu3 %v2153_v37  ;;  %v2289_v37 = vld [vmem:[%s5006_s24 + $0x7f0] sm:$0xff] }
 0x71f   : > { %3253 = vmatpush.msrb.mxu0 %v2055_v33  ;;  %3273 = vmatpush.msrb.mxu1 %v2087_v34  ;;  %v2209_v33 = vld [vmem:[%s5006_s24 + $0x570] sm:$0xff]  ;;  %v2835_v34 = vperm.slane %v5759_v30, 0 }
 0x720   : > { %3293 = vmatpush.msrb.mxu2 %v2119_v10  ;;  %3313 = vmatpush.msrb.mxu3 %v2151_v22 }
 0x721   : > { %3254 = vmatpush.msrb.mxu0 %v2053_v35  ;;  %3274 = vmatpush.msrb.mxu1 %v2085_v41  ;;  %v2171_v35 = vld [vmem:[%s5006_s24 + $0x440] sm:$0xff]  ;;  %v2105_v41 = vld [vmem:[%s5006_s24 + $0x230] sm:$0xff] }
 0x722   : > { %3294 = vmatpush.msrb.mxu2 %v2117_v14  ;;  %3314 = vmatpush.msrb.mxu3 %v2149_v27  ;;  %v2131_v14 = vld [vmem:[%s5006_s24 + $0x300] sm:$0xff] }
 0x723   : > { %3255 = vmatpush.msrb.mxu0 %v2051_v42  ;;  %3275 = vmatpush.msrb.mxu1 %v2083_v23  ;;  %v2143_v42 = vld [vmem:[%s5006_s24 + $0x360] sm:$0xff] }
 0x724   : > { %3295 = vmatpush.msrb.mxu2 %v2115_v36  ;;  %3315 = vmatpush.msrb.mxu3 %v2147_v29  ;;  %v2207_v23 = vld [vmem:[%s5006_s24 + $0x560] sm:$0xff]  ;;  %v2285_v29 = vld [vmem:[%s5006_s24 + $0x7d0] sm:$0xff] }
 0x725   : > { %3256 = vmatpush.msrb.mxu0 %v2049_v43  ;;  %3276 = vmatpush.msrb.mxu1 %v2081_v24  ;;  %v2169_v43 = vld [vmem:[%s5006_s24 + $0x430] sm:$0xff]  ;;  %v2103_v24 = vld [vmem:[%s5006_s24 + $0x220] sm:$0xff] }
 0x726   : > { %3296 = vmatpush.msrb.mxu2 %v2113_v2  ;;  %3316 = vmatpush.msrb.mxu3 %v2145_v32  ;;  %v2251_v36 = vld [vmem:[%s5006_s24 + $0x6c0] sm:$0xff] }
 0x727   : > { %3257 = vmatpush.msrb.mxu0 %v2047_v44  ;;  %3277 = vmatpush.msrb.mxu1 %v2079_v45  ;;  %v2141_v44 = vld [vmem:[%s5006_s24 + $0x350] sm:$0xff]  ;;  %v2283_v32 = vld [vmem:[%s5006_s24 + $0x7c0] sm:$0xff] }
 0x728   : > { %3297 = vmatpush.msrb.mxu2 %v2111_v16  ;;  %3317 = vmatpush.msrb.mxu3 %v2143_v42  ;;  %v2243_v42 = vld [vmem:[%s5006_s24 + $0x680] sm:$0xff] }
 0x729   : > { %3258 = vmatpush.msrb.mxu0 %v2045_v46  ;;  %3278 = vmatpush.msrb.mxu1 %v2077_v49  ;;  %v2205_v46 = vld [vmem:[%s5006_s24 + $0x550] sm:$0xff] }
 0x72a   : > { %3298 = vmatpush.msrb.mxu2 %v2109_v28  ;;  %v2101_v49 = vld [vmem:[%s5006_s24 + $0x210] sm:$0xff]  ;;  %3318 = vmatpush.msrb.mxu3 %v2141_v44  ;;  %v2247_v28 = vld [vmem:[%s5006_s24 + $0x6a0] sm:$0xff] }
 0x72b   : > { %3259 = vmatpush.msrb.mxu0 %v2043_v50  ;;  %3279 = vmatpush.msrb.mxu1 %v2075_v51  ;;  %v2139_v50 = vld [vmem:[%s5006_s24 + $0x340] sm:$0xff] }
 0x72c   : > { %3299 = vmatpush.msrb.mxu2 %v2107_v17  ;;  %3319 = vmatpush.msrb.mxu3 %v2139_v50  ;;  %v2245_v17 = vld [vmem:[%s5006_s24 + $0x690] sm:$0xff] }
 0x72d   : > { %3260 = vmatpush.msrb.mxu0 %v2041_v52  ;;  %3280 = vmatpush.msrb.mxu1 %v2073_v55  ;;  %v2167_v52 = vld [vmem:[%s5006_s24 + $0x420] sm:$0xff] }
 0x72e   : > { %3300 = vmatpush.msrb.mxu2 %v2105_v41  ;;  %v2203_v55 = vld [vmem:[%s5006_s24 + $0x540] sm:$0xff] }
 0x72f   : > { %3261 = vmatpush.msrb.mxu0 %v2039_v56  ;;  %3281 = vmatpush.msrb.mxu1 %v2071_v57  ;;  %v2099_v56 = vld [vmem:[%s5006_s24 + $0x200] sm:$0xff] }
 0x730   : > { %3301 = vmatpush.msrb.mxu2 %v2103_v24 }
 0x731   : > { %3262 = vmatpush.msrb.mxu0 %v2037_v58  ;;  %3282 = vmatpush.msrb.mxu1 %v2069_v48  ;;  %v2137_v58 = vld [vmem:[%s5006_s24 + $0x330] sm:$0xff] }
 0x732   : > { %3302 = vmatpush.msrb.mxu2 %v2101_v49  ;;  %v2165_v48 = vld [vmem:[%s5006_s24 + $0x410] sm:$0xff]  ;;  %3320 = vmatpush.msrb.mxu3 %v2137_v58  ;;  %v2279_v49 = vld [vmem:[%s5006_s24 + $0x7a0] sm:$0xff] }
 0x733   : > { %3263 = vmatpush.msrb.mxu0 %v2035_v59  ;;  %3283 = vmatpush.msrb.mxu1 %v2067_v63  ;;  %v2201_v59 = vld [vmem:[%s5006_s24 + $0x530] sm:$0xff]  ;;  %v2135_v63 = vld [vmem:[%s5006_s24 + $0x320] sm:$0xff] }
 0x734   : > { %3303 = vmatpush.msrb.mxu2 %v2099_v56  ;;  %3321 = vmatpush.msrb.mxu3 %v2135_v63  ;;  %v2239_v56 = vld [vmem:[%s5006_s24 + $0x660] sm:$0xff] }
 0x735   : > { %3328 = vmatpush.msra.mxu0 %v2193_v47  ;;  %3348 = vmatpush.msra.mxu1 %v2225_v4  ;;  %v2255_v4 = vld [vmem:[%s5006_s24 + $0x6e0] sm:$0xff] }
 0x737   : > { %3329 = vmatpush.msra.mxu0 %v2191_v61  ;;  %3349 = vmatpush.msra.mxu1 %v2223_v8  ;;  %v2257_v61 = vld [vmem:[%s5006_s24 + $0x6f0] sm:$0xff] }
 0x738   : > { %3368 = vmatpush.msra.mxu2 %v2257_v61  ;;  %v2133_v8 = vld [vmem:[%s5006_s24 + $0x310] sm:$0xff] }
 0x739   : > { %3330 = vmatpush.msra.mxu0 %v2189_v0  ;;  %3350 = vmatpush.msra.mxu1 %v2221_v12  ;;  %v2199_v0 = vld [vmem:[%s5006_s24 + $0x520] sm:$0xff]  ;;  %v2237_v61 = vld [vmem:[%s5006_s24 + $0x650] sm:$0xff] }
 0x73a   : > { %3369 = vmatpush.msra.mxu2 %v2255_v4  ;;  %3322 = vmatpush.msrb.mxu3 %v2133_v8  ;;  %v2273_v4 = vld [vmem:[%s5006_s24 + $0x770] sm:$0xff]  ;;  %v2064_v8 = vld [vmem:[%s5006_s24 + $0xe8] sm:$0xff] }
 0x73b   : > { %3331 = vmatpush.msra.mxu0 %v2187_v5  ;;  %3351 = vmatpush.msra.mxu1 %v2219_v19 }
 0x73c   : > { %3370 = vmatpush.msra.mxu2 %v2253_v11  ;;  %3323 = vmatpush.msrb.mxu3 %v2131_v14 }
 0x73d   : > { %3332 = vmatpush.msra.mxu0 %v2185_v9  ;;  %3352 = vmatpush.msra.mxu1 %v2217_v60  ;;  %v2197_v9 = vld [vmem:[%s5006_s24 + $0x510] sm:$0xff] }
 0x73e   : > { %3371 = vmatpush.msra.mxu2 %v2251_v36  ;;  %3388 = vmatpush.msra.mxu3 %v2289_v37  ;;  %v2060_v36 = vld [vmem:[%s5006_s24 + $0xc8] sm:$0xff] }
 0x73f   : > { %3333 = vmatpush.msra.mxu0 %v2183_v13  ;;  %3353 = vmatpush.msra.mxu1 %v2215_v25  ;;  %v2249_v25 = vld [vmem:[%s5006_s24 + $0x6b0] sm:$0xff] }
 0x740   : > { %3372 = vmatpush.msra.mxu2 %v2249_v25 }
 0x741   : > { %3334 = vmatpush.msra.mxu0 %v2181_v20  ;;  %3354 = vmatpush.msra.mxu1 %v2213_v53 }
 0x742   : > { %3373 = vmatpush.msra.mxu2 %v2247_v28  ;;  %v2056_v28 = vld [vmem:[%s5006_s24 + $0xa8] sm:$0xff] }
 0x743   : > { %3335 = vmatpush.msra.mxu0 %v2179_v21  ;;  %3355 = vmatpush.msra.mxu1 %v2211_v31 }
 0x744   : > { %3374 = vmatpush.msra.mxu2 %v2245_v17  ;;  %v2130_v17 = vld [vmem:[%s5006_s24 + $0x2f8] sm:$0xff] }
 0x745   : > { %3336 = vmatpush.msra.mxu0 %v2177_v26  ;;  %3356 = vmatpush.msra.mxu1 %v2209_v33  ;;  %v2287_v26 = vld [vmem:[%s5006_s24 + $0x7e0] sm:$0xff] }
 0x746   : > { %3389 = vmatpush.msra.mxu3 %v2287_v26  ;;  %3375 = vmatpush.msra.mxu2 %v2243_v42  ;;  %v2058_v26 = vld [vmem:[%s5006_s24 + $0xb8] sm:$0xff] }
 0x747   : > { %3337 = vmatpush.msra.mxu0 %v2175_v54  ;;  %3357 = vmatpush.msra.mxu1 %v2207_v23  ;;  %v2838_v54 = vperm.slane %v5759_v30, 3  ;;  %v2281_v23 = vld [vmem:[%s5006_s24 + $0x7b0] sm:$0xff] }
 0x748   : > { %3390 = vmatpush.msra.mxu3 %v2285_v29  ;;  %v2265_v29 = vld [vmem:[%s5006_s24 + $0x730] sm:$0xff] }
 0x749   : > { %3338 = vmatpush.msra.mxu0 %v2173_v15  ;;  %3358 = vmatpush.msra.mxu1 %v2205_v46  ;;  %v2241_v46 = vld [vmem:[%s5006_s24 + $0x670] sm:$0xff] }
 0x74a   : > { %v2868_v45 = vpop.f32.mrf.mxu0  ;;  %v2888_v57 = vpop.f32.mrf.mxu1  ;;  %3391 = vmatpush.msra.mxu3 %v2283_v32  ;;  %3376 = vmatpush.msra.mxu2 %v2241_v46 }
 0x74b   : > { %3339 = vmatpush.msra.mxu0 %v2171_v35  ;;  %v2869_v51 = vadd.f32 %v2868_v45, %v2835_v34  ;;  %3359 = vmatpush.msra.mxu1 %v2203_v55 }
 0x74c   : > { %3392 = vmatpush.msra.mxu3 %v2281_v23  ;;  %3377 = vmatpush.msra.mxu2 %v2239_v56  ;;  %v2128_v23 = vld [vmem:[%s5006_s24 + $0x2e8] sm:$0xff] }
 0x74d   : > { %3340 = vmatpush.msra.mxu0 %v2169_v43  ;;  %v5782_v47 = vadd.f32 %v2888_v57, %v2869_v51  ;;  %3360 = vmatpush.msra.mxu1 %v2201_v59  ;;  %v2277_v57 = vld [vmem:[%s5006_s24 + $0x790] sm:$0xff] }
 0x74e   : > { %3393 = vmatpush.msra.mxu3 %v2279_v49  ;;  %3378 = vmatpush.msra.mxu2 %v2237_v61  ;;  %v2048_v61 = vld [vmem:[%s5006_s24 + $0x68] sm:$0xff] }
 0x74f   : > { %3341 = vmatpush.msra.mxu0 %v2167_v52  ;;  %v3171_v1 = vmul.f32 %v5782_v47, %v5782_v47  ;;  %3361 = vmatpush.msra.mxu1 %v2199_v0 }
 0x750   : > { %3394 = vmatpush.msra.mxu3 %v2277_v57 }
 0x751   : > { %3342 = vmatpush.msra.mxu0 %v2165_v48  ;;  %v3179_v5 = vmul.f32 %v3171_v1, %v5782_v47  ;;  %v2908_v6 = vpop.f32.mrf.mxu2  ;;  %v2928_v13 = vpop.f32.mrf.mxu3  ;;  %3362 = vmatpush.msra.mxu1 %v2197_v9  ;;  %v2066_v1 = vld [vmem:[%s5006_s24 + $0xf8] sm:$0xff] }
 0x752   : > { %v2909_v10 = vadd.f32 %v2908_v6, %v2836_v62  ;;  %v2275_v62 = vld [vmem:[%s5006_s24 + $0x780] sm:$0xff] }
 0x753   : > { %3343 = vmatpush.msra.mxu0 %v2163_v3  ;;  %v3187_v12 = vmul.f32 0.044715, %v3179_v5  ;;  %3363 = vmatpush.msra.mxu1 %v2195_v18  ;;  %v2235_v3 = vld [vmem:[%s5006_s24 + $0x640] sm:$0xff]  ;;  %v2233_v5 = vld [vmem:[%s5006_s24 + $0x630] sm:$0xff] }
 0x754   : > { %v5800_v19 = vadd.f32 %v2928_v13, %v2909_v10  ;;  %v2948_v20 = vpop.f32.mrf.mxu0  ;;  %v2968_v22 = vpop.f32.mrf.mxu1  ;;  %3395 = vmatpush.msra.mxu3 %v2275_v62  ;;  %3379 = vmatpush.msra.mxu2 %v2235_v3  ;;  %v2231_v10 = vld [vmem:[%s5006_s24 + $0x620] sm:$0xff]  ;;  %v2269_v13 = vld [vmem:[%s5006_s24 + $0x750] sm:$0xff]  ;;  %v2124_v62 = vld [vmem:[%s5006_s24 + $0x2c8] sm:$0xff] }
 0x755   : > { %v3195_v60 = vadd.f32 %v3187_v12, %v5782_v47  ;;  %v2949_v21 = vadd.f32 %v2948_v20, %v2837_v7  ;;  %v2062_v12 = vld [vmem:[%s5006_s24 + $0xd8] sm:$0xff]  ;;  %v2229_v20 = vld [vmem:[%s5006_s24 + $0x610] sm:$0xff] }
 0x756   : > { %v3172_v2 = vmul.f32 %v5800_v19, %v5800_v19  ;;  %3396 = vmatpush.msra.mxu3 %v2273_v4  ;;  %3380 = vmatpush.msra.mxu2 %v2233_v5  ;;  %v2162_v3 = vld [vmem:[%s5006_s24 + $0x3f8] sm:$0xff] }
 0x757   : > { %v3203_v16 = vmul.f32 0.7978846, %v3195_v60  ;;  %v5809_v27 = vadd.f32 %v2968_v22, %v2949_v21  ;;  %v2839_v60 = vperm.slane %v5759_v30, 4  ;;  %v2267_v22 = vld [vmem:[%s5006_s24 + $0x740] sm:$0xff]  ;;  %v2046_v5 = vld [vmem:[%s5006_s24 + $0x58] sm:$0xff] }
 0x758   : > { %v3180_v53 = vmul.f32 %v3172_v2, %v5800_v19  ;;  %3381 = vmatpush.msra.mxu2 %v2231_v10  ;;  %v2098_v2 = vld [vmem:[%s5006_s24 + $0x1f8] sm:$0xff]  ;;  %v2044_v10 = vld [vmem:[%s5006_s24 + $0x48] sm:$0xff] }
 0x759   : > { %4165 = vtanh.f32 %v3203_v16  ;;  %v3173_v31 = vmul.f32 %v5809_v27, %v5809_v27  ;;  %v2227_v16 = vld [vmem:[%s5006_s24 + $0x600] sm:$0xff] }
 0x75a   : > { %v3188_v15 = vmul.f32 0.044715, %v3180_v53  ;;  %3382 = vmatpush.msra.mxu2 %v2229_v20  ;;  %v2096_v53 = vld [vmem:[%s5006_s24 + $0x1e8] sm:$0xff]  ;;  %v2042_v20 = vld [vmem:[%s5006_s24 + $0x38] sm:$0xff] }
 0x75b   : > { %v3181_v33 = vmul.f32 %v3173_v31, %v5809_v27  ;;  %v2988_v34 = vpop.f32.mrf.mxu2  ;;  %v3008_v24 = vpop.f32.mrf.mxu3 }
 0x75c   : > { %v3196_v35 = vadd.f32 %v3188_v15, %v5800_v19  ;;  %v2989_v41 = vadd.f32 %v2988_v34, %v2838_v54  ;;  %v2094_v15 = vld [vmem:[%s5006_s24 + $0x1d8] sm:$0xff]  ;;  %3383 = vmatpush.msra.mxu2 %v2227_v16 }
 0x75d   : > { %v3189_v43 = vmul.f32 0.044715, %v3181_v33  ;;  %v2054_v34 = vld [vmem:[%s5006_s24 + $0x98] sm:$0xff] }
 0x75e   : > { %v3204_v44 = vmul.f32 0.7978846, %v3196_v35  ;;  %v5823_v45 = vadd.f32 %v3008_v24, %v2989_v41  ;;  %v2092_v41 = vld [vmem:[%s5006_s24 + $0x1c8] sm:$0xff]  ;;  %v2154_v16 = vld [vmem:[%s5006_s24 + $0x3b8] sm:$0xff] }
 0x75f   : > { %v4166_v50 = vpop.eup %4165  ;;  %v3197_v51 = vadd.f32 %v3189_v43, %v5809_v27  ;;  %v2840_v43 = vperm.slane %v5759_v30, 5  ;;  %v2052_v24 = vld [vmem:[%s5006_s24 + $0x88] sm:$0xff] }
 0x760   : > { %4167 = vtanh.f32 %v3204_v44  ;;  %v3174_v52 = vmul.f32 %v5823_v45, %v5823_v45  ;;  %v3219_v55 = vadd.f32 1.0, %v4166_v50  ;;  %v2261_v44 = vld [vmem:[%s5006_s24 + $0x710] sm:$0xff]  ;;  %v2090_v50 = vld [vmem:[%s5006_s24 + $0x1b8] sm:$0xff] }
 0x761   : > { %v3205_v58 = vmul.f32 0.7978846, %v3197_v51  ;;  %v2126_v51 = vld [vmem:[%s5006_s24 + $0x2d8] sm:$0xff] }
 0x762   : > { %v3182_v59 = vmul.f32 %v3174_v52, %v5823_v45  ;;  %v3227_v48 = vmul.f32 0.5, %v3219_v55  ;;  %v2050_v52 = vld [vmem:[%s5006_s24 + $0x78] sm:$0xff] }
 0x763   : > { %4169 = vtanh.f32 %v3205_v58  ;;  %v2088_v58 = vld [vmem:[%s5006_s24 + $0x1a8] sm:$0xff] }
 0x764   : > { %v3190_v63 = vmul.f32 0.044715, %v3182_v59  ;;  %v5836_v0 = vmul.f32 %v3227_v48, %v5782_v47  ;;  %v2271_v47 = vld [vmem:[%s5006_s24 + $0x760] sm:$0xff] }
 0x765   : > { %3397 = vmatpush.msra.mxu3 %v2271_v47  ;;  %v2259_v59 = vld [vmem:[%s5006_s24 + $0x700] sm:$0xff]  ;;  %v2160_v47 = vld [vmem:[%s5006_s24 + $0x3e8] sm:$0xff] }
 0x766   : > { %v4168_v6 = vpop.eup %4167  ;;  %v3198_v7 = vadd.f32 %v3190_v63, %v5823_v45  ;;  %3264 = vmatmul.f32.vlgmr.msrb.gmra.mxu0 %v5836_v0 }
 0x767   : > { %3408 = vmatpush.msrb.mxu0 %v2066_v1  ;;  %v3220_v9 = vadd.f32 1.0, %v4168_v6  ;;  %3398 = vmatpush.msra.mxu3 %v2269_v13  ;;  %v2122_v6 = vld [vmem:[%s5006_s24 + $0x2b8] sm:$0xff] }
 0x768   : > { %v3206_v11 = vmul.f32 0.7978846, %v3198_v7  ;;  %v2082_v13 = vld [vmem:[%s5006_s24 + $0x178] sm:$0xff] }
 0x769   : > { %v4170_v14 = vpop.eup %4169  ;;  %3409 = vmatpush.msrb.mxu0 %v2064_v8  ;;  %v3228_v18 = vmul.f32 0.5, %v3220_v9  ;;  %3399 = vmatpush.msra.mxu3 %v2267_v22  ;;  %v2084_v8 = vld [vmem:[%s5006_s24 + $0x188] sm:$0xff] }
 0x76a   : > { %4171 = vtanh.f32 %v3206_v11  ;;  %v3221_v37 = vadd.f32 1.0, %v4170_v14  ;;  %v2120_v11 = vld [vmem:[%s5006_s24 + $0x2a8] sm:$0xff]  ;;  %v2158_v14 = vld [vmem:[%s5006_s24 + $0x3d8] sm:$0xff] }
 0x76b   : > { %3410 = vmatpush.msrb.mxu0 %v2062_v12  ;;  %v5853_v21 = vmul.f32 %v3228_v18, %v5800_v19  ;;  %3400 = vmatpush.msra.mxu3 %v2265_v29  ;;  %v2040_v22 = vld [vmem:[%s5006_s24 + $0x28] sm:$0xff] }
 0x76c   : > { %v3229_v25 = vmul.f32 0.5, %v3221_v37  ;;  %v2080_v37 = vld [vmem:[%s5006_s24 + $0x168] sm:$0xff] }
 0x76d   : > { %3284 = vmatmul.f32.vlgmr.msrb.gmra.mxu1 %v5853_v21  ;;  %3411 = vmatpush.msrb.mxu0 %v2060_v36  ;;  %v2118_v36 = vld [vmem:[%s5006_s24 + $0x298] sm:$0xff]  ;;  %v2076_v29 = vld [vmem:[%s5006_s24 + $0x148] sm:$0xff] }
 0x76e   : > { %v3028_v54 = vpop.f32.mrf.mxu0  ;;  %3428 = vmatpush.msrb.mxu1 %v2098_v2  ;;  %v5862_v19 = vmul.f32 %v3229_v25, %v5809_v27  ;;  %v3048_v33 = vpop.f32.mrf.mxu1  ;;  %v2263_v27 = vld [vmem:[%s5006_s24 + $0x720] sm:$0xff]  ;;  %v2116_v25 = vld [vmem:[%s5006_s24 + $0x288] sm:$0xff] }
 0x76f   : > { %v3029_v31 = vadd.f32 %v3028_v54, %v2839_v60  ;;  %3412 = vmatpush.msrb.mxu0 %v2058_v26  ;;  %3401 = vmatpush.msra.mxu3 %v2263_v27  ;;  %v2156_v60 = vld [vmem:[%s5006_s24 + $0x3c8] sm:$0xff]  ;;  %v2078_v26 = vld [vmem:[%s5006_s24 + $0x158] sm:$0xff] }
 0x770   : > { %v4172_v32 = vpop.eup %4171  ;;  %3304 = vmatmul.f32.vlgmr.msrb.gmra.mxu2 %v5862_v19  ;;  %3429 = vmatpush.msrb.mxu1 %v2096_v53  ;;  %v2038_v54 = vld [vmem:[%s5006_s24 + $0x18] sm:$0xff] }
 0x771   : > { %v5871_v35 = vadd.f32 %v3048_v33, %v3029_v31  ;;  %3413 = vmatpush.msrb.mxu0 %v2056_v28  ;;  %v3222_v42 = vadd.f32 1.0, %v4172_v32  ;;  %3448 = vmatpush.msrb.mxu2 %v2130_v17  ;;  %v2114_v28 = vld [vmem:[%s5006_s24 + $0x278] sm:$0xff]  ;;  %v2152_v31 = vld [vmem:[%s5006_s24 + $0x3a8] sm:$0xff] }
 0x772   : > { %3430 = vmatpush.msrb.mxu1 %v2094_v15  ;;  %3402 = vmatpush.msra.mxu3 %v2261_v44  ;;  %v2036_v17 = vld [vmem:[%s5006_s24 + $0x8] sm:$0xff]  ;;  %v2150_v27 = vld [vmem:[%s5006_s24 + $0x398] sm:$0xff] }
 0x773   : > { %v3175_v46 = vmul.f32 %v5871_v35, %v5871_v35  ;;  %3414 = vmatpush.msrb.mxu0 %v2054_v34  ;;  %v3230_v49 = vmul.f32 0.5, %v3222_v42  ;;  %3449 = vmatpush.msrb.mxu2 %v2128_v23  ;;  %v2112_v32 = vld [vmem:[%s5006_s24 + $0x268] sm:$0xff]  ;;  %v2074_v34 = vld [vmem:[%s5006_s24 + $0x138] sm:$0xff] }
 0x774   : > { %3431 = vmatpush.msrb.mxu1 %v2092_v41  ;;  %3403 = vmatpush.msra.mxu3 %v2259_v59  ;;  %v2110_v42 = vld [vmem:[%s5006_s24 + $0x258] sm:$0xff]  ;;  %v2072_v23 = vld [vmem:[%s5006_s24 + $0x128] sm:$0xff] }
 0x775   : > { %v3183_v55 = vmul.f32 %v3175_v46, %v5871_v35  ;;  %v3068_v56 = vpop.f32.mrf.mxu2  ;;  %v5885_v57 = vmul.f32 %v3230_v49, %v5823_v45  ;;  %3415 = vmatpush.msrb.mxu0 %v2052_v24  ;;  %3450 = vmatpush.msrb.mxu2 %v2126_v51  ;;  %v3088_v1 = vpop.f32.mrf.mxu3  ;;  %v2086_v45 = vld [vmem:[%s5006_s24 + $0x198] sm:$0xff]  ;;  %v2108_v44 = vld [vmem:[%s5006_s24 + $0x248] sm:$0xff] }
 0x776   : > { %v3069_v48 = vadd.f32 %v3068_v56, %v2840_v43  ;;  %3432 = vmatpush.msrb.mxu1 %v2090_v50  ;;  %v2148_v43 = vld [vmem:[%s5006_s24 + $0x388] sm:$0xff]  ;;  %v2070_v46 = vld [vmem:[%s5006_s24 + $0x118] sm:$0xff] }
 0x777   : > { %v3191_v63 = vmul.f32 0.044715, %v3183_v55  ;;  %3324 = vmatmul.f32.vlgmr.msrb.gmra.mxu3 %v5885_v57  ;;  %3416 = vmatpush.msrb.mxu0 %v2050_v52  ;;  %v2194_v50 = vld [vmem:[%s5006_s24 + $0x4f8] sm:$0xff]  ;;  %v2068_v52 = vld [vmem:[%s5006_s24 + $0x108] sm:$0xff] }
 0x778   : > { %v5894_v4 = vadd.f32 %v3088_v1, %v3069_v48  ;;  %3433 = vmatpush.msrb.mxu1 %v2088_v58  ;;  %3451 = vmatpush.msrb.mxu2 %v2124_v62  ;;  %v2146_v51 = vld [vmem:[%s5006_s24 + $0x378] sm:$0xff]  ;;  %v2192_v58 = vld [vmem:[%s5006_s24 + $0x4e8] sm:$0xff] }
 0x779   : > { %v3199_v7 = vadd.f32 %v3191_v63, %v5871_v35  ;;  %3417 = vmatpush.msrb.mxu0 %v2048_v61  ;;  %3468 = vmatpush.msrb.mxu3 %v2162_v3  ;;  %v2106_v55 = vld [vmem:[%s5006_s24 + $0x238] sm:$0xff]  ;;  %v2144_v59 = vld [vmem:[%s5006_s24 + $0x368] sm:$0xff]  ;;  %v2841_v63 = vperm.slane %v5759_v30, 6 }
 0x77a   : > { %v3176_v9 = vmul.f32 %v5894_v4, %v5894_v4  ;;  %3434 = vmatpush.msrb.mxu1 %v2086_v45  ;;  %3452 = vmatpush.msrb.mxu2 %v2122_v6  ;;  %v2104_v48 = vld [vmem:[%s5006_s24 + $0x228] sm:$0xff]  ;;  %v2190_v61 = vld [vmem:[%s5006_s24 + $0x4d8] sm:$0xff] }
 0x77b   : > { %v3207_v12 = vmul.f32 0.7978846, %v3199_v7  ;;  %3418 = vmatpush.msrb.mxu0 %v2046_v5  ;;  %3469 = vmatpush.msrb.mxu3 %v2160_v47  ;;  %v2142_v62 = vld [vmem:[%s5006_s24 + $0x358] sm:$0xff]  ;;  %v2188_v3 = vld [vmem:[%s5006_s24 + $0x4c8] sm:$0xff] }
 0x77c   : > { %v3184_v18 = vmul.f32 %v3176_v9, %v5894_v4  ;;  %3435 = vmatpush.msrb.mxu1 %v2084_v8  ;;  %3453 = vmatpush.msrb.mxu2 %v2120_v11  ;;  %v2102_v45 = vld [vmem:[%s5006_s24 + $0x218] sm:$0xff]  ;;  %v2140_v47 = vld [vmem:[%s5006_s24 + $0x348] sm:$0xff] }
 0x77d   : > { %4173 = vtanh.f32 %v3207_v12  ;;  %3419 = vmatpush.msrb.mxu0 %v2044_v10  ;;  %3470 = vmatpush.msrb.mxu3 %v2158_v14  ;;  %v2226_v6 = vld [vmem:[%s5006_s24 + $0x5f8] sm:$0xff]  ;;  %v2224_v10 = vld [vmem:[%s5006_s24 + $0x5e8] sm:$0xff] }
 0x77e   : > { %v3192_v2 = vmul.f32 0.044715, %v3184_v18  ;;  %3436 = vmatpush.msrb.mxu1 %v2082_v13  ;;  %3454 = vmatpush.msrb.mxu2 %v2118_v36  ;;  %v2186_v8 = vld [vmem:[%s5006_s24 + $0x4b8] sm:$0xff]  ;;  %v2100_v11 = vld [vmem:[%s5006_s24 + $0x208] sm:$0xff] }
 0x77f   : > { %3420 = vmatpush.msrb.mxu0 %v2042_v20  ;;  %3471 = vmatpush.msrb.mxu3 %v2156_v60  ;;  %v2138_v13 = vld [vmem:[%s5006_s24 + $0x338] sm:$0xff]  ;;  %v2842_v20 = vperm.slane %v5759_v30, 7  ;;  %v2220_v60 = vld [vmem:[%s5006_s24 + $0x5c8] sm:$0xff] }
 0x780   : > { %v3200_v53 = vadd.f32 %v3192_v2, %v5894_v4  ;;  %3437 = vmatpush.msrb.mxu1 %v2080_v37  ;;  %3455 = vmatpush.msrb.mxu2 %v2116_v25  ;;  %v2222_v18 = vld [vmem:[%s5006_s24 + $0x5d8] sm:$0xff]  ;;  %v2136_v37 = vld [vmem:[%s5006_s24 + $0x328] sm:$0xff] }
 0x781   : > { %3421 = vmatpush.msrb.mxu0 %v2040_v22  ;;  %3472 = vmatpush.msrb.mxu3 %v2154_v16  ;;  %v2182_v36 = vld [vmem:[%s5006_s24 + $0x498] sm:$0xff]  ;;  %v2180_v2 = vld [vmem:[%s5006_s24 + $0x488] sm:$0xff] }
 0x782   : > { %v3208_v15 = vmul.f32 0.7978846, %v3200_v53  ;;  %3438 = vmatpush.msrb.mxu1 %v2078_v26  ;;  %3456 = vmatpush.msrb.mxu2 %v2114_v28  ;;  %v2218_v30 = vld [vmem:[%s5006_s24 + $0x5b8] sm:$0xff] }
 0x783   : > { %v4174_v33 = vpop.eup %4173  ;;  %3422 = vmatpush.msrb.mxu0 %v2038_v54  ;;  %3473 = vmatpush.msrb.mxu3 %v2152_v31  ;;  %v2134_v26 = vld [vmem:[%s5006_s24 + $0x318] sm:$0xff]  ;;  %v2132_v31 = vld [vmem:[%s5006_s24 + $0x308] sm:$0xff] }
 0x784   : > { %4175 = vtanh.f32 %v3208_v15  ;;  %3439 = vmatpush.msrb.mxu1 %v2076_v29  ;;  %v3223_v41 = vadd.f32 1.0, %v4174_v33  ;;  %3457 = vmatpush.msrb.mxu2 %v2112_v32  ;;  %v2178_v53 = vld [vmem:[%s5006_s24 + $0x478] sm:$0xff]  ;;  %v2216_v29 = vld [vmem:[%s5006_s24 + $0x5a8] sm:$0xff] }
 0x785   : > { %3423 = vmatpush.msrb.mxu0 %v2036_v17  ;;  %3474 = vmatpush.msrb.mxu3 %v2150_v27  ;;  %v2176_v17 = vld [vmem:[%s5006_s24 + $0x468] sm:$0xff]  ;;  %v2214_v33 = vld [vmem:[%s5006_s24 + $0x598] sm:$0xff] }
 0x786   : > { %3440 = vmatpush.msrb.mxu1 %v2074_v34  ;;  %v3231_v24 = vmul.f32 0.5, %v3223_v41  ;;  %3458 = vmatpush.msrb.mxu2 %v2110_v42  ;;  %v2212_v41 = vld [vmem:[%s5006_s24 + $0x588] sm:$0xff] }
 0x787   : > { %3475 = vmatpush.msrb.mxu3 %v2148_v43  ;;  %v2210_v43 = vld [vmem:[%s5006_s24 + $0x578] sm:$0xff] }
 0x788   : > { %v5931_v49 = vmul.f32 %v3231_v24, %v5871_v35  ;;  %3441 = vmatpush.msrb.mxu1 %v2072_v23  ;;  %3459 = vmatpush.msrb.mxu2 %v2108_v44  ;;  %v2172_v23 = vld [vmem:[%s5006_s24 + $0x448] sm:$0xff]  ;;  %v2170_v44 = vld [vmem:[%s5006_s24 + $0x438] sm:$0xff] }
 0x789   : > { %3476 = vmatpush.msrb.mxu3 %v2146_v51  ;;  %v2168_v51 = vld [vmem:[%s5006_s24 + $0x428] sm:$0xff] }
 0x78a   : > { %v4176_v56 = vpop.eup %4175  ;;  %3344 = vmatmul.f32.vlgmr.msra.gmra.mxu0 %v5931_v49  ;;  %3442 = vmatpush.msrb.mxu1 %v2070_v46  ;;  %v2208_v46 = vld [vmem:[%s5006_s24 + $0x568] sm:$0xff] }
 0x78b   : > { %3488 = vmatpush.msra.mxu0 %v2194_v50  ;;  %v3224_v35 = vadd.f32 1.0, %v4176_v56  ;;  %3460 = vmatpush.msrb.mxu2 %v2106_v55  ;;  %v2166_v56 = vld [vmem:[%s5006_s24 + $0x418] sm:$0xff] }
 0x78c   : > { %3443 = vmatpush.msrb.mxu1 %v2068_v52  ;;  %3477 = vmatpush.msrb.mxu3 %v2144_v59  ;;  %v2206_v52 = vld [vmem:[%s5006_s24 + $0x558] sm:$0xff]  ;;  %v2204_v59 = vld [vmem:[%s5006_s24 + $0x548] sm:$0xff] }
 0x78d   : > { %3489 = vmatpush.msra.mxu0 %v2192_v58  ;;  %v3232_v1 = vmul.f32 0.5, %v3224_v35  ;;  %3461 = vmatpush.msrb.mxu2 %v2104_v48  ;;  %v2164_v35 = vld [vmem:[%s5006_s24 + $0x408] sm:$0xff] }
 0x78e   : > { %3478 = vmatpush.msrb.mxu3 %v2142_v62 }
 0x78f   : > { %3490 = vmatpush.msra.mxu0 %v2190_v61  ;;  %v5947_v5 = vmul.f32 %v3232_v1, %v5894_v4  ;;  %3462 = vmatpush.msrb.mxu2 %v2102_v45  ;;  %v2184_v4 = vld [vmem:[%s5006_s24 + $0x4a8] sm:$0xff]  ;;  %v2202_v61 = vld [vmem:[%s5006_s24 + $0x538] sm:$0xff] }
 0x790   : > { %v3108_v7 = vpop.f32.mrf.mxu0  ;;  %v3128_v12 = vpop.f32.mrf.mxu1  ;;  %3479 = vmatpush.msrb.mxu3 %v2140_v47  ;;  %v2258_v45 = vld [vmem:[%s5006_s24 + $0x6f8] sm:$0xff] }
 0x791   : > { %v3109_v9 = vadd.f32 %v3108_v7, %v2841_v63  ;;  %3364 = vmatmul.f32.vlgmr.msra.gmra.mxu1 %v5947_v5  ;;  %3491 = vmatpush.msra.mxu0 %v2188_v3  ;;  %v2200_v63 = vld [vmem:[%s5006_s24 + $0x528] sm:$0xff]  ;;  %v2198_v3 = vld [vmem:[%s5006_s24 + $0x518] sm:$0xff] }
 0x792   : > { %3508 = vmatpush.msra.mxu1 %v2226_v6  ;;  %3424 = vmatmul.f32.vlgmr.msrb.gmra.mxu0 %v5836_v0  ;;  %v2256_v7 = vld [vmem:[%s5006_s24 + $0x6e8] sm:$0xff] }
 0x793   : > { %v5958_v14 = vadd.f32 %v3128_v12, %v3109_v9  ;;  %3492 = vmatpush.msra.mxu0 %v2186_v8  ;;  %3463 = vmatpush.msrb.mxu2 %v2100_v11  ;;  %v2196_v8 = vld [vmem:[%s5006_s24 + $0x508] sm:$0xff]  ;;  %v2254_v9 = vld [vmem:[%s5006_s24 + $0x6d8] sm:$0xff] }
 0x794   : > { %3509 = vmatpush.msra.mxu1 %v2224_v10  ;;  %3480 = vmatpush.msrb.mxu3 %v2138_v13  ;;  %v2290_v12 = vld [vmem:[%s5006_s24 + $0x7f8] sm:$0xff]  ;;  %v2288_v13 = vld [vmem:[%s5006_s24 + $0x7e8] sm:$0xff] }
 0x795   : > { %v3177_v0 = vmul.f32 %v5958_v14, %v5958_v14  ;;  %3493 = vmatpush.msra.mxu0 %v2184_v4  ;;  %v2250_v4 = vld [vmem:[%s5006_s24 + $0x6b8] sm:$0xff] }
 0x796   : > { %3510 = vmatpush.msra.mxu1 %v2222_v18  ;;  %3481 = vmatpush.msrb.mxu3 %v2136_v37  ;;  %v2286_v18 = vld [vmem:[%s5006_s24 + $0x7d8] sm:$0xff] }
 0x797   : > { %v3185_v22 = vmul.f32 %v3177_v0, %v5958_v14  ;;  %v3148_v25 = vpop.f32.mrf.mxu2  ;;  %3494 = vmatpush.msra.mxu0 %v2182_v36  ;;  %v3168_v28 = vpop.f32.mrf.mxu3  ;;  %v2244_v36 = vld [vmem:[%s5006_s24 + $0x688] sm:$0xff]  ;;  %v2282_v37 = vld [vmem:[%s5006_s24 + $0x7b8] sm:$0xff] }
 0x798   : > { %v3149_v16 = vadd.f32 %v3148_v25, %v2842_v20  ;;  %3511 = vmatpush.msra.mxu1 %v2220_v60  ;;  %3482 = vmatpush.msrb.mxu3 %v2134_v26  ;;  %v2246_v20 = vld [vmem:[%s5006_s24 + $0x698] sm:$0xff]  ;;  %v2280_v0 = vld [vmem:[%s5006_s24 + $0x7a8] sm:$0xff] }
 0x799   : > { %v3193_v54 = vmul.f32 0.044715, %v3185_v22  ;;  %3444 = vmatmul.f32.vlgmr.msrb.gmra.mxu1 %v5853_v21  ;;  %3495 = vmatpush.msra.mxu0 %v2180_v2  ;;  %v2174_v21 = vld [vmem:[%s5006_s24 + $0x458] sm:$0xff]  ;;  %v2240_v60 = vld [vmem:[%s5006_s24 + $0x668] sm:$0xff] }
 0x79a   : > { %v5975_v15 = vadd.f32 %v3168_v28, %v3149_v16  ;;  %3512 = vmatpush.msra.mxu1 %v2218_v30  ;;  %3483 = vmatpush.msrb.mxu3 %v2132_v31  ;;  %v2278_v2 = vld [vmem:[%s5006_s24 + $0x798] sm:$0xff]  ;;  %v2276_v25 = vld [vmem:[%s5006_s24 + $0x788] sm:$0xff] }
 0x79b   : > { %v3201_v32 = vadd.f32 %v3193_v54, %v5958_v14  ;;  %3496 = vmatpush.msra.mxu0 %v2178_v53  ;;  %v2238_v22 = vld [vmem:[%s5006_s24 + $0x658] sm:$0xff]  ;;  %v2236_v30 = vld [vmem:[%s5006_s24 + $0x648] sm:$0xff] }
 0x79c   : > { %v3178_v34 = vmul.f32 %v5975_v15, %v5975_v15  ;;  %3513 = vmatpush.msra.mxu1 %v2216_v29  ;;  %v2234_v26 = vld [vmem:[%s5006_s24 + $0x638] sm:$0xff]  ;;  %v2272_v16 = vld [vmem:[%s5006_s24 + $0x768] sm:$0xff] }
 0x79d   : > { %v3209_v27 = vmul.f32 0.7978846, %v3201_v32  ;;  %3497 = vmatpush.msra.mxu0 %v2176_v17  ;;  %v2232_v53 = vld [vmem:[%s5006_s24 + $0x628] sm:$0xff]  ;;  %v2270_v54 = vld [vmem:[%s5006_s24 + $0x758] sm:$0xff] }
 0x79e   : > { %v3186_v42 = vmul.f32 %v3178_v34, %v5975_v15  ;;  %3514 = vmatpush.msra.mxu1 %v2214_v33  ;;  %v2230_v28 = vld [vmem:[%s5006_s24 + $0x618] sm:$0xff]  ;;  %v2268_v29 = vld [vmem:[%s5006_s24 + $0x748] sm:$0xff]  ;;  %v2291_v34 = vld [vmem:[%s5008_s0] sm:$0x3] }
 0x79f   : > { %4177 = vtanh.f32 %v3209_v27  ;;  %3498 = vmatpush.msra.mxu0 %v2174_v21  ;;  %v2228_v31 = vld [vmem:[%s5006_s24 + $0x608] sm:$0xff]  ;;  %v2262_v32 = vld [vmem:[%s5006_s24 + $0x718] sm:$0xff]  ;;  %v3244_v21 = vperm.slane %v2291_v34, 0 }
 0x7a0   : > { %v3194_v24 = vmul.f32 0.044715, %v3186_v42  ;;  %3515 = vmatpush.msra.mxu1 %v2212_v41  ;;  %v2264_v17 = vld [vmem:[%s5006_s24 + $0x728] sm:$0xff] }
 0x7a1   : > { %3499 = vmatpush.msra.mxu0 %v2172_v23  ;;  %v2260_v33 = vld [vmem:[%s5006_s24 + $0x708] sm:$0xff] }
 0x7a2   : > { %v3202_v50 = vadd.f32 %v3194_v24, %v5975_v15  ;;  %3516 = vmatpush.msra.mxu1 %v2210_v43 }
 0x7a3   : > { %3500 = vmatpush.msra.mxu0 %v2170_v44 }
 0x7a4   : > { %v3210_v55 = vmul.f32 0.7978846, %v3202_v50  ;;  %3517 = vmatpush.msra.mxu1 %v2208_v46 }
 0x7a5   : > { %v4178_v58 = vpop.eup %4177  ;;  %3501 = vmatpush.msra.mxu0 %v2168_v51 }
 0x7a6   : > { %4179 = vtanh.f32 %v3210_v55  ;;  %3518 = vmatpush.msra.mxu1 %v2206_v52  ;;  %v3225_v48 = vadd.f32 1.0, %v4178_v58 }
 0x7a7   : > { %3502 = vmatpush.msra.mxu0 %v2166_v56 }
 0x7a8   : > { %3519 = vmatpush.msra.mxu1 %v2204_v59  ;;  %v3233_v62 = vmul.f32 0.5, %v3225_v48 }
 0x7a9   : > { %3503 = vmatpush.msra.mxu0 %v2164_v35 }
 0x7aa   : > { %3520 = vmatpush.msra.mxu1 %v2202_v61  ;;  %v5998_v1 = vmul.f32 %v3233_v62, %v5958_v14  ;;  %3504 = vmatmul.f32.vlgmr.msra.gmra.mxu0 %v5931_v49  ;;  %v2252_v49 = vld [vmem:[%s5006_s24 + $0x6c8] sm:$0xff]  ;;  %v3245_v61 = vperm.slane %v2291_v34, 1 }
 0x7ab   : > { %v2248_v14 = vld [vmem:[%s5006_s24 + $0x6a8] sm:$0xff] }
 0x7ac   : > { %v4180_v6 = vpop.eup %4179  ;;  %3384 = vmatmul.f32.vlgmr.msra.gmra.mxu2 %v5998_v1  ;;  %3521 = vmatpush.msra.mxu1 %v2200_v63 }
 0x7ad   : > { %3528 = vmatpush.msra.mxu2 %v2258_v45  ;;  %v3226_v47 = vadd.f32 1.0, %v4180_v6 }
 0x7ae   : > { %3522 = vmatpush.msra.mxu1 %v2198_v3 }
 0x7af   : > { %3529 = vmatpush.msra.mxu2 %v2256_v7  ;;  %v3234_v10 = vmul.f32 0.5, %v3226_v47 }
 0x7b0   : > { %3523 = vmatpush.msra.mxu1 %v2196_v8 }
 0x7b1   : > { %3530 = vmatpush.msra.mxu2 %v2254_v9  ;;  %v3242_v11 = vmul.f32 %v3234_v10, %v5975_v15  ;;  %3524 = vmatmul.f32.vlgmr.msra.gmra.mxu1 %v5947_v5  ;;  %v2284_v5 = vld [vmem:[%s5006_s24 + $0x7c8] sm:$0xff]  ;;  %v2266_v15 = vld [vmem:[%s5006_s24 + $0x738] sm:$0xff] }
 0x7b3   : > { %3404 = vmatmul.f32.vlgmr.msra.gmra.mxu3 %v3242_v11  ;;  %3531 = vmatpush.msra.mxu2 %v2252_v49 }
 0x7b4   : > { %3548 = vmatpush.msra.mxu3 %v2290_v12  ;;  %3464 = vmatmul.f32.vlgmr.msrb.gmra.mxu2 %v5862_v19  ;;  %v2242_v19 = vld [vmem:[%s5006_s24 + $0x678] sm:$0xff] }
 0x7b5   : > { %3532 = vmatpush.msra.mxu2 %v2250_v4 }
 0x7b6   : > { %3549 = vmatpush.msra.mxu3 %v2288_v13 }
 0x7b7   : > { %3533 = vmatpush.msra.mxu2 %v2248_v14 }
 0x7b8   : > { %3550 = vmatpush.msra.mxu3 %v2286_v18 }
 0x7b9   : > { %3534 = vmatpush.msra.mxu2 %v2246_v20 }
 0x7ba   : > { %3551 = vmatpush.msra.mxu3 %v2284_v5 }
 0x7bb   : > { %3484 = vmatmul.f32.vlgmr.msrb.gmra.mxu3 %v5885_v57  ;;  %3535 = vmatpush.msra.mxu2 %v2244_v36  ;;  %v2274_v57 = vld [vmem:[%s5006_s24 + $0x778] sm:$0xff] }
 0x7bc   : > { %3552 = vmatpush.msra.mxu3 %v2282_v37 }
 0x7bd   : > { %3536 = vmatpush.msra.mxu2 %v2242_v19 }
 0x7be   : > { %3553 = vmatpush.msra.mxu3 %v2280_v0 }
 0x7bf   : > { %3537 = vmatpush.msra.mxu2 %v2240_v60 }
 0x7c0   : > { %3554 = vmatpush.msra.mxu3 %v2278_v2 }
 0x7c1   : > { %3538 = vmatpush.msra.mxu2 %v2238_v22 }
 0x7c2   : > { %3555 = vmatpush.msra.mxu3 %v2276_v25 }
 0x7c3   : > { %3539 = vmatpush.msra.mxu2 %v2236_v30 }
 0x7c4   : > { %3556 = vmatpush.msra.mxu3 %v2274_v57 }
 0x7c5   : > { %3540 = vmatpush.msra.mxu2 %v2234_v26 }
 0x7c6   : > { %3557 = vmatpush.msra.mxu3 %v2272_v16 }
 0x7c7   : > { %3541 = vmatpush.msra.mxu2 %v2232_v53 }
 0x7c8   : > { %3558 = vmatpush.msra.mxu3 %v2270_v54 }
 0x7c9   : > { %3542 = vmatpush.msra.mxu2 %v2230_v28 }
 0x7ca   : > { %3559 = vmatpush.msra.mxu3 %v2268_v29 }
 0x7cb   : > { %3543 = vmatpush.msra.mxu2 %v2228_v31 }
 0x7cc   : > { %3560 = vmatpush.msra.mxu3 %v2266_v15  ;;  %3544 = vmatmul.f32.vlgmr.msra.gmra.mxu2 %v5998_v1 }
 0x7ce   : > { %3561 = vmatpush.msra.mxu3 %v2264_v17 }
 0x7d0   : > { %3562 = vmatpush.msra.mxu3 %v2262_v32 }
 0x7d2   : > { %3563 = vmatpush.msra.mxu3 %v2260_v33 }
 0x7d3   : > { %3564 = vmatmul.f32.vlgmr.msra.gmra.mxu3 %v3242_v11 }
 0x7e3   : > { %v3265_v27 = vpop.f32.mrf.mxu0 }
 0x7e4   : > { %v3266_v42 = vadd.f32 %v3265_v27, %v3244_v21 }
 0x7ea   : > { %v3285_v41 = vpop.f32.mrf.mxu1 }
 0x7eb   : > { %v3286_v43 = vadd.f32 %v3285_v41, %v3266_v42 }
 0x7f3   : > { %v3305_v23 = vpop.f32.mrf.mxu2 }
 0x7f4   : > { %v3306_v44 = vadd.f32 %v3305_v23, %v3286_v43 }
 0x7fa   : > { %v3325_v24 = vpop.f32.mrf.mxu3 }
 0x7fb   : > { %v3326_v50 = vadd.f32 %v3325_v24, %v3306_v44 }
 0x807   : > { %v3345_v46 = vpop.f32.mrf.mxu0 }
 0x808   : > { %v3346_v52 = vadd.f32 %v3345_v46, %v3326_v50 }
 0x80e   : > { %v3365_v51 = vpop.f32.mrf.mxu1 }
 0x80f   : > { %v3366_v56 = vadd.f32 %v3365_v51, %v3346_v52  ;;  %v3425_v62 = vpop.f32.mrf.mxu0 }
 0x810   : > { %v3426_v1 = vadd.f32 %v3425_v62, %v3245_v61 }
 0x816   : > { %v3445_v63 = vpop.f32.mrf.mxu1 }
 0x817   : > { %v3446_v3 = vadd.f32 %v3445_v63, %v3426_v1 }
 0x827   : > { %v3505_v47 = vpop.f32.mrf.mxu0 }
 0x82e   : > { %v3525_v10 = vpop.f32.mrf.mxu1 }
 0x82f   : > { %v3385_v55 = vpop.f32.mrf.mxu2 }
 0x830   : > { %v3386_v58 = vadd.f32 %v3385_v55, %v3366_v56 }
 0x836   : > { %v3405_v59 = vpop.f32.mrf.mxu3 }
 0x837   : > { %v3406_v35 = vadd.f32 %v3405_v59, %v3386_v58  ;;  %v3465_v45 = vpop.f32.mrf.mxu2 }
 0x838   : > { %v3466_v7 = vadd.f32 %v3465_v45, %v3446_v3 }
 0x839   : > { %v3568_v48 = vadd.f32 %v3406_v35, %v5384_v39 }
 0x83b   : > { %3570 = vst [vmem:[%s4973_s11] sm:$0xff] %v3568_v48 }
 0x83e   : > { %v3485_v6 = vpop.f32.mrf.mxu3 }
 0x83f   : > { %v3486_v8 = vadd.f32 %v3485_v6, %v3466_v7 }
 0x841   : > { %v3506_v9 = vadd.f32 %v3505_v47, %v3486_v8 }
 0x843   : > { %v3526_v11 = vadd.f32 %v3525_v10, %v3506_v9 }
 0x84f   : > { %v3545_v49 = vpop.f32.mrf.mxu2 }
 0x850   : > { %v3546_v12 = vadd.f32 %v3545_v49, %v3526_v11 }
 0x856   : > { %v3565_v4 = vpop.f32.mrf.mxu3 }
 0x857   : > { %v3566_v13 = vadd.f32 %v3565_v4, %v3546_v12  ;;  %3575 = sbr.rel (%p3982_p5) target bundleno = 2419 (0x973), region = 152 }
 0x859   : > { %v3569_v39 = vadd.f32 %v3566_v13, %v5386_v40 }
 0x85b   : > { %3571 = vst [vmem:[%s4973_s11 + $0x8] sm:$0xff] %v3569_v39 }
 0x85c   : > { %v3576_v14 = vld [vmem:[%s4973_s11] sm:$0xff] }
 0x85d   : > { %v3578_v53 = vld [vmem:[%s6192_s20] sm:$0x3] }
 0x85e   : > { %v3579_v28 = vld [vmem:[%s6193_s18] sm:$0x3]  ;;  %v3607_v31 = vperm.slane %v3578_v53, 1 }
 0x85f   : > { %v3613_v17 = vperm.slane %v3579_v28, 0  ;;  %v3614_v32 = vperm.slane %v3579_v28, 1 }
 0x862   : > { %v3577_v18 = vld [vmem:[%s4973_s11 + $0x8] sm:$0xff] }
 0x863   : > { %v3580_v20 = vadd.f32 %v3577_v18, %v3576_v14 }
 0x865   : > { %3581 = vadd.xlane.f32.xlu0 %v3580_v20 }
 0x8d8   : > { %v3582_v5 = vpop.xlane.xlu0 %3581 }
 0x8d9   : > { %v3583_v36 = vmul.f32 %v3582_v5, %v5114_v38 }
 0x8db   : > { %v3584_v37 = vsub.f32 %v3576_v14, %v3583_v36  ;;  %v3585_v19 = vsub.f32 %v3577_v18, %v3583_v36 }
 0x8dd   : > { %v3586_v0 = vmul.f32 %v3584_v37, %v3584_v37  ;;  %v3587_v60 = vmul.f32 %v3585_v19, %v3585_v19 }
 0x8df   : > { %v3588_v2 = vadd.f32 %v3587_v60, %v3586_v0 }
 0x8e1   : > { %3589 = vadd.xlane.f32.xlu0 %v3588_v2 }
 0x954   : > { %v3590_v40 = vpop.xlane.xlu0 %3589 }
 0x955   : > { %v3591_v22 = vmul.f32 %v3590_v40, %v5114_v38  ;;  %v3606_v38 = vperm.slane %v3578_v53, 0 }
 0x957   : > { %v3592_v25 = vadd.f32 1e-06, %v3591_v22 }
 0x959   : > { %4183 = vrsqrt.f32 %v3592_v25  ;;  %vm3599_vm14 = vweird.f32 %v3592_v25 }
 0x95f   : > { %v4184_v30 = vpop.eup %4183 }
 0x960   : > { %v3594_v57 = vmul.f32 %v4184_v30, %v3592_v25  ;;  %vm3600_vm13 = vweird.f32 %v4184_v30 }
 0x961   : > { %vm3601_vm15 = vmor %vm3599_vm14, %vm3600_vm13 }
 0x962   : > { %v3595_v26 = vmul.f32 %v4184_v30, %v3594_v57 }
 0x964   : > { %v3596_v16 = vmul.f32 0.5, %v3595_v26 }
 0x966   : > { %v3597_v54 = vsub.f32 1.5, %v3596_v16 }
 0x968   : > { %v3598_v29 = vmul.f32 %v4184_v30, %v3597_v54 }
 0x96a   : > { %v3602_v15 = vsel %vm3601_vm15, %v4184_v30, %v3598_v29 }
 0x96b   : > { %v3603_v33 = vmul.f32 %v3602_v15, %v3584_v37  ;;  %v3604_v34 = vmul.f32 %v3602_v15, %v3585_v19 }
 0x96d   : > { %v3610_v21 = vmul.f32 %v3606_v38, %v3603_v33  ;;  %v3611_v27 = vmul.f32 %v3607_v31, %v3604_v34 }
 0x96f   : > { %v3617_v41 = vadd.f32 %v3613_v17, %v3610_v21  ;;  %v3618_v42 = vadd.f32 %v3614_v32, %v3611_v27 }
 0x971   : > { %3619 = vst [vmem:[%s4973_s11] sm:$0xff] %v3617_v41 }
 0x972   : > { %3620 = vst [vmem:[%s4973_s11 + $0x8] sm:$0xff] %v3618_v42 }
 0x973 PF: > { %s6194_s1 = sld [smem:[#allocation27_spill]] }
 0x974   : > { %s6195_s0 = sld [smem:[#allocation21_spill]] }
 0x975   : > { %s6196_s30 = sld [smem:[#allocation22_spill]] }
 0x976   : > { %s6197_s20 = sld [smem:[#allocation30_spill]] }
 0x977   : > { %s6198_s21 = sld [smem:[#allocation25_spill]] }
 0x978   : > { %s6200_s22 = sld [smem:[#allocation28_spill]] }
 0x979   : > { %s32_s23 = sadd.s32 1, %s6194_s1   ;;  %s6199_s1 = sld [smem:[#allocation26_spill]] }
 0x97a   : > { %p29_p6 = scmp.ge.s32.totalorder %s32_s23, 6   ;;  %s6201_s2 = sld [smem:[#allocation29_spill]] }
 0x97c   :  { %31 = sbr.rel (!%p29_p6) target bundleno = 27 (0x1b), region = 251 }
 0x981   :  { %3642 = vsyncpa [#allocation3], 1 }
 0x982   :  { %3644 = vsyncpa [#allocation3 + $0x1], 1 }
 0x983   :  { %3645 = vsyncpa [#allocation5], 1 }
 0x984   :  { %3646 = vsyncpa [#allocation8], 1 }

</bundles_post_ra>
